<compile_context>
chip_gen: v7x
topology: tpu7x:2x2x1
jax: 0.10.0
libtpu: 0.0.40
codegen_flags: <defaults>
</compile_context>

<pallas_src>
import functools

import jax
import jax.numpy as jnp
from jax.experimental import pallas as pl
from jax.experimental.pallas import tpu as pltpu


def _conv_bn_kernel(x_ref, w_ref, bias_ref, o_ref, *,
                    th, ow, stride, dilation, ksize_h, ksize_w):
    """Fused implicit-im2col conv + BN bias for one (image, row-tile).

    x_ref:    (1, H_slab, W_pad, C)  padded input image (bf16), VMEM-resident
                                     across the row-tile grid axis.
    w_ref:    (KH*KW*C, OC_pad)      conv weight with BN scale folded in (bf16).
    bias_ref: (1, OC_pad)            folded BN bias (f32).
    o_ref:    (1, TH, OW, OC_pad)    output tile (bf16).
    """
    h = pl.program_id(1)
    row0 = pl.multiple_of(h * (th * stride), th * stride)
    c = x_ref.shape[3]

    # Gather the KH*KW taps and fold them into the contraction dimension:
    # one lane-dense (TH*OW, KH*KW*C) LHS and ONE MXU matmul per tile.
    taps = []
    for kh in range(ksize_h):
        for kw in range(ksize_w):
            r0 = row0 + kh * dilation
            c0 = kw * dilation
            if stride == 1:
                tap = x_ref[0, pl.ds(r0, th), pl.ds(c0, ow), :]
            else:
                # TODO(synk): for stride>1 load one contiguous row slab per
                # tile and subsample once instead of per-tap strided reads
                # (otherwise XLU/relayout-bound for stride-2 convs).
                tap = x_ref[0, pl.ds(r0, th, stride), pl.ds(c0, ow, stride), :]
            taps.append(tap)
    lhs = jnp.concatenate(taps, axis=-1).reshape(th * ow, ksize_h * ksize_w * c)

    acc = jnp.dot(lhs, w_ref[...], preferred_element_type=jnp.float32)
    out = acc + bias_ref[...]                       # BN scale already in w
    o_ref[...] = out.reshape(o_ref.shape).astype(o_ref.dtype)


def basic_conv2d(x_nchw, weight, gamma, beta, running_mean, running_var, *,
                 stride=1, padding=0, dilation=1, eps=1e-5,
                 target_tile_pixels=1024, single_buffer_consts=True):
    """Forward of BasicConv2d: bn(conv(x)), eval-mode BN. NCHW f32 in / out."""
    N, C, H, W = x_nchw.shape
    OC, CI, KH, KW = weight.shape
    assert CI == C

    OH = (H + 2 * padding - dilation * (KH - 1) - 1) // stride + 1
    OW = (W + 2 * padding - dilation * (KW - 1) - 1) // stride + 1

    # Output-row tile: ~target_tile_pixels output pixels per tile.  Ensure
    # (a) a batch-1 call still has >= 2 parallel grid points (v7x: 2 TCs) and
    # (b) M = TH*OW is a multiple of 8 (sublane-aligned LHS / accumulator).
    TH = max(1, min(OH, max(1, target_tile_pixels // max(OW, 1))))
    if N == 1 and OH > 1:
        TH = min(TH, -(-OH // 2))
    while TH > 1 and (TH * OW) % 8 != 0:
        TH -= 1
    n_h = -(-OH // TH)
    OH_pad = n_h * TH

    # ---- glue: NCHW -> NHWC, spatial pad (extra bottom rows so the last,
    #      possibly ragged, row tile reads stay in-bounds) ----
    x = jnp.transpose(x_nchw, (0, 2, 3, 1))
    h_need = (OH_pad - 1) * stride + (KH - 1) * dilation + 1
    pad_bottom = max(padding, h_need - H - padding)
    x = jnp.pad(x, ((0, 0), (padding, pad_bottom), (padding, padding), (0, 0)))
    H_slab, W_pad = x.shape[1], x.shape[2]
    x_bf = x.astype(jnp.bfloat16)

    # Lane-dense output channels: pad OC up to a multiple of 128.
    # TODO(synk): round OC_pad (and folded K) to 256 on v6e/v7x when OC > 128.
    OC_pad = -(-OC // 128) * 128

    # Fold eval-mode BN: scale goes into the conv weight (f32, pre-bf16 cast),
    # bias remains as the kernel epilogue add.
    scale = gamma / jnp.sqrt(running_var + eps)
    bias = beta - running_mean * scale
    # weight (OC, C, KH, KW) -> (KH, KW, C, OC) -> (KH*KW*C, OC_pad), scaled.
    w_t = jnp.transpose(weight, (2, 3, 1, 0)).reshape(KH * KW * C, OC)
    w_t = w_t * scale[None, :]
    w_bf = jnp.pad(w_t, ((0, 0), (0, OC_pad - OC))).astype(jnp.bfloat16)
    bias2d = jnp.pad(bias.reshape(1, OC),
                     ((0, 0), (0, OC_pad - OC))).astype(jnp.float32)

    kernel = functools.partial(
        _conv_bn_kernel, th=TH, ow=OW, stride=stride, dilation=dilation,
        ksize_h=KH, ksize_w=KW)

    flops = 2 * N * OH_pad * OW * KH * KW * C * OC_pad
    bytes_accessed = int(x_bf.size * 2 + w_bf.size * 2
                         + N * OH_pad * OW * OC_pad * 2 + bias2d.size * 4)

    # Per-TC VMEM budget with headroom for compiler scratch / semaphores.
    try:
        vmem_cap = int(pltpu.get_tpu_info().vmem_capacity_bytes)
    except Exception:                                   # conservative fallback
        vmem_cap = 64 << 20
    vmem_cap_limit = min(100 << 20, (vmem_cap * 7) // 8)  # ~56MiB v7x, 100MiB v5e/v6e
    vmem_need = (2 * H_slab * W_pad * C * 2      # double-buffered image (bf16)
                 + 2 * TH * OW * OC_pad * 2      # double-buffered out tile (bf16)
                 + KH * KW * C * OC_pad * 2      # single-buffered weight (bf16)
                 + OC_pad * 4                    # single-buffered bias
                 + (4 << 20))                    # headroom
    vmem_limit = int(min(vmem_cap_limit, max(32 << 20, vmem_need)))

    # Constant-index operands need no double-buffering.
    const_kwargs = ({"pipeline_mode": pl.Buffered(1)}
                    if single_buffer_consts else {})

    out = pl.pallas_call(
        kernel,
        out_shape=jax.ShapeDtypeStruct((N, OH_pad, OW, OC_pad), jnp.bfloat16),
        grid_spec=pltpu.PrefetchScalarGridSpec(
            num_scalar_prefetch=0,
            grid=(N, n_h),
            in_specs=[
                # Whole padded image of batch n; block index is independent of
                # the row-tile axis, so it stays VMEM-resident (no re-DMA) and
                # the next image prefetches under the current one's tiles.
                pl.BlockSpec((1, H_slab, W_pad, C), lambda n, h: (n, 0, 0, 0)),
                pl.BlockSpec((KH * KW * C, OC_pad), lambda n, h: (0, 0),
                             **const_kwargs),
                pl.BlockSpec((1, OC_pad), lambda n, h: (0, 0),
                             **const_kwargs),
            ],
            out_specs=pl.BlockSpec((1, TH, OW, OC_pad),
                                   lambda n, h: (n, h, 0, 0)),
        ),
        compiler_params=pltpu.CompilerParams(
            dimension_semantics=("parallel", "parallel"),
            vmem_limit_bytes=vmem_limit),
        cost_estimate=pl.CostEstimate(flops=flops, transcendentals=0,
                                      bytes_accessed=bytes_accessed),
    )(x_bf, w_bf, bias2d)

    out = out[:, :OH, :, :OC]                     # drop row / channel padding
    return jnp.transpose(out, (0, 3, 1, 2)).astype(jnp.float32)  # NHWC -> NCHW


if __name__ == "__main__":
    # Shapes consistent with BasicConv2d(in_planes=4, out_planes=8, k=3,
    # stride=1, padding=1).
    N, C, H, W = 2, 4, 16, 16
    OC, KH, KW = 8, 3, 3
    stride, padding, dilation = 1, 1, 1
    eps = 1e-5

    key = jax.random.PRNGKey(0)
    kx, kw_, kg, kb, km, kv = jax.random.split(key, 6)
    x = jax.random.normal(kx, (N, C, H, W), dtype=jnp.float32)
    weight = jax.random.normal(kw_, (OC, C, KH, KW), dtype=jnp.float32) * 0.1
    gamma = jax.random.uniform(kg, (OC,), minval=0.5, maxval=1.5)
    beta = jax.random.normal(kb, (OC,)) * 0.1
    running_mean = jax.random.normal(km, (OC,)) * 0.1
    running_var = jax.random.uniform(kv, (OC,), minval=0.5, maxval=1.5)

    args = (x, weight, gamma, beta, running_mean, running_var)
    fn = jax.jit(functools.partial(basic_conv2d, stride=stride,
                                   padding=padding, dilation=dilation, eps=eps))
    try:
        out = jax.block_until_ready(fn(*args))
    except Exception:
        # Fallback for jax versions where pipeline_mode=pl.Buffered(1) is not
        # honored by the TPU pipeliner.
        fn = jax.jit(functools.partial(basic_conv2d, stride=stride,
                                       padding=padding, dilation=dilation,
                                       eps=eps, single_buffer_consts=False))
        out = jax.block_until_ready(fn(*args))

    # Reference mirrors the kernel's documented deviations (bf16 rounding of x
    # and of the scale-folded weight); conv + bias in f32.
    ref_scale = gamma / jnp.sqrt(running_var + eps)
    x_r = x.astype(jnp.bfloat16).astype(jnp.float32)
    w_r = (weight * ref_scale[:, None, None, None]
           ).astype(jnp.bfloat16).astype(jnp.float32)
    ref_conv = jax.lax.conv_general_dilated(
        x_r, w_r, window_strides=(stride, stride),
        padding=((padding, padding), (padding, padding)),
        rhs_dilation=(dilation, dilation),
        dimension_numbers=("NCHW", "OIHW", "NCHW"))
    ref = ref_conv + (beta - running_mean * ref_scale)[None, :, None, None]

    assert out.shape == (N, OC, H, W)
    err = float(jnp.max(jnp.abs(out - ref)))
    assert err < 5e-2, f"max abs err {err}"
    print("KERNEL_OK")
</pallas_src>

<mosaic_0001>
module attributes {stable_mosaic.version = 11 : i64} {
  func.func @_conv_bn_kernel(%arg0: i32, %arg1: i32, %arg2: memref<1x18x18x4xbf16, #tpu.memory_space<vmem>>, %arg3: memref<36x128xbf16, #tpu.memory_space<vmem>>, %arg4: memref<1x128xf32, #tpu.memory_space<vmem>>, %arg5: memref<1x16x16x128xbf16, #tpu.memory_space<vmem>>) attributes {dimension_semantics = [#tpu.dimension_semantics<parallel>, #tpu.dimension_semantics<parallel>], iteration_bounds = array<i64: 2, 1>, scalar_prefetch = 0 : i64, scratch_operands = 0 : i64, tpu.core_type = #tpu.core_type<tc>, window_params = [{transform_indices = @transform_0, window_bounds = array<i64: 1, 18, 18, 4>}, {pipeline_mode = #tpu.pipeline_mode<synchronous>, transform_indices = @transform_1, window_bounds = array<i64: 36, 128>}, {pipeline_mode = #tpu.pipeline_mode<synchronous>, transform_indices = @transform_2, window_bounds = array<i64: 1, 128>}, {transform_indices = @transform_3, window_bounds = array<i64: 1, 16, 16, 128>}]} {
    %c16_i32 = arith.constant 16 : i32
    %0 = arith.muli %arg1, %c16_i32 : i32
    %1 = tpu.assume_multiple %0, 16 : i32
    %c0_i32 = arith.constant 0 : i32
    %2 = arith.addi %1, %c0_i32 : i32
    %c0 = arith.constant 0 : index
    %3 = arith.index_cast %2 : i32 to index
    %c0_0 = arith.constant 0 : index
    %c0_1 = arith.constant 0 : index
    %4 = vector.load %arg2[%c0, %3, %c0_0, %c0_1] : memref<1x18x18x4xbf16, #tpu.memory_space<vmem>>, vector<1x16x16x4xbf16>
    %5 = vector.shape_cast %4 : vector<1x16x16x4xbf16> to vector<16x16x4xbf16>
    %c0_i32_2 = arith.constant 0 : i32
    %6 = arith.addi %1, %c0_i32_2 : i32
    %c0_3 = arith.constant 0 : index
    %7 = arith.index_cast %6 : i32 to index
    %c1 = arith.constant 1 : index
    %c0_4 = arith.constant 0 : index
    %8 = vector.load %arg2[%c0_3, %7, %c1, %c0_4] : memref<1x18x18x4xbf16, #tpu.memory_space<vmem>>, vector<1x16x16x4xbf16>
    %9 = vector.shape_cast %8 : vector<1x16x16x4xbf16> to vector<16x16x4xbf16>
    %c0_i32_5 = arith.constant 0 : i32
    %10 = arith.addi %1, %c0_i32_5 : i32
    %c0_6 = arith.constant 0 : index
    %11 = arith.index_cast %10 : i32 to index
    %c2 = arith.constant 2 : index
    %c0_7 = arith.constant 0 : index
    %12 = vector.load %arg2[%c0_6, %11, %c2, %c0_7] : memref<1x18x18x4xbf16, #tpu.memory_space<vmem>>, vector<1x16x16x4xbf16>
    %13 = vector.shape_cast %12 : vector<1x16x16x4xbf16> to vector<16x16x4xbf16>
    %c1_i32 = arith.constant 1 : i32
    %14 = arith.addi %1, %c1_i32 : i32
    %c0_8 = arith.constant 0 : index
    %15 = arith.index_cast %14 : i32 to index
    %c0_9 = arith.constant 0 : index
    %c0_10 = arith.constant 0 : index
    %16 = vector.load %arg2[%c0_8, %15, %c0_9, %c0_10] : memref<1x18x18x4xbf16, #tpu.memory_space<vmem>>, vector<1x16x16x4xbf16>
    %17 = vector.shape_cast %16 : vector<1x16x16x4xbf16> to vector<16x16x4xbf16>
    %c1_i32_11 = arith.constant 1 : i32
    %18 = arith.addi %1, %c1_i32_11 : i32
    %c0_12 = arith.constant 0 : index
    %19 = arith.index_cast %18 : i32 to index
    %c1_13 = arith.constant 1 : index
    %c0_14 = arith.constant 0 : index
    %20 = vector.load %arg2[%c0_12, %19, %c1_13, %c0_14] : memref<1x18x18x4xbf16, #tpu.memory_space<vmem>>, vector<1x16x16x4xbf16>
    %21 = vector.shape_cast %20 : vector<1x16x16x4xbf16> to vector<16x16x4xbf16>
    %c1_i32_15 = arith.constant 1 : i32
    %22 = arith.addi %1, %c1_i32_15 : i32
    %c0_16 = arith.constant 0 : index
    %23 = arith.index_cast %22 : i32 to index
    %c2_17 = arith.constant 2 : index
    %c0_18 = arith.constant 0 : index
    %24 = vector.load %arg2[%c0_16, %23, %c2_17, %c0_18] : memref<1x18x18x4xbf16, #tpu.memory_space<vmem>>, vector<1x16x16x4xbf16>
    %25 = vector.shape_cast %24 : vector<1x16x16x4xbf16> to vector<16x16x4xbf16>
    %c2_i32 = arith.constant 2 : i32
    %26 = arith.addi %1, %c2_i32 : i32
    %c0_19 = arith.constant 0 : index
    %27 = arith.index_cast %26 : i32 to index
    %c0_20 = arith.constant 0 : index
    %c0_21 = arith.constant 0 : index
    %28 = vector.load %arg2[%c0_19, %27, %c0_20, %c0_21] : memref<1x18x18x4xbf16, #tpu.memory_space<vmem>>, vector<1x16x16x4xbf16>
    %29 = vector.shape_cast %28 : vector<1x16x16x4xbf16> to vector<16x16x4xbf16>
    %c2_i32_22 = arith.constant 2 : i32
    %30 = arith.addi %1, %c2_i32_22 : i32
    %c0_23 = arith.constant 0 : index
    %31 = arith.index_cast %30 : i32 to index
    %c1_24 = arith.constant 1 : index
    %c0_25 = arith.constant 0 : index
    %32 = vector.load %arg2[%c0_23, %31, %c1_24, %c0_25] : memref<1x18x18x4xbf16, #tpu.memory_space<vmem>>, vector<1x16x16x4xbf16>
    %33 = vector.shape_cast %32 : vector<1x16x16x4xbf16> to vector<16x16x4xbf16>
    %c2_i32_26 = arith.constant 2 : i32
    %34 = arith.addi %1, %c2_i32_26 : i32
    %c0_27 = arith.constant 0 : index
    %35 = arith.index_cast %34 : i32 to index
    %c2_28 = arith.constant 2 : index
    %c0_29 = arith.constant 0 : index
    %36 = vector.load %arg2[%c0_27, %35, %c2_28, %c0_29] : memref<1x18x18x4xbf16, #tpu.memory_space<vmem>>, vector<1x16x16x4xbf16>
    %37 = vector.shape_cast %36 : vector<1x16x16x4xbf16> to vector<16x16x4xbf16>
    %38 = tpu.concatenate %5, %9, %13, %17, %21, %25, %29, %33, %37 in 2 : vector<16x16x4xbf16>, vector<16x16x4xbf16>, vector<16x16x4xbf16>, vector<16x16x4xbf16>, vector<16x16x4xbf16>, vector<16x16x4xbf16>, vector<16x16x4xbf16>, vector<16x16x4xbf16>, vector<16x16x4xbf16> -> vector<16x16x36xbf16>
    %39 = vector.shape_cast %38 : vector<16x16x36xbf16> to vector<256x36xbf16>
    %c0_30 = arith.constant 0 : index
    %c0_31 = arith.constant 0 : index
    %40 = vector.load %arg3[%c0_30, %c0_31] : memref<36x128xbf16, #tpu.memory_space<vmem>>, vector<36x128xbf16>
    %cst = arith.constant dense<0.000000e+00> : vector<256x128xf32>
    %41 = tpu.matmul %39, %40, %cst {dimension_numbers = #tpu.dot_dimension_numbers<[1], [0], [0], [1], [0, 0, 1, 1], [], []>} : vector<256x36xbf16>, vector<36x128xbf16>, vector<256x128xf32> -> vector<256x128xf32>
    %c0_32 = arith.constant 0 : index
    %c0_33 = arith.constant 0 : index
    %42 = vector.load %arg4[%c0_32, %c0_33] : memref<1x128xf32, #tpu.memory_space<vmem>>, vector<1x128xf32>
    %43 = vector.broadcast %42 : vector<1x128xf32> to vector<256x128xf32>
    %44 = arith.addf %41, %43 : vector<256x128xf32>
    %45 = vector.shape_cast %44 : vector<256x128xf32> to vector<1x16x16x128xf32>
    %46 = arith.truncf %45 : vector<1x16x16x128xf32> to vector<1x16x16x128xbf16>
    %c0_34 = arith.constant 0 : index
    %c0_35 = arith.constant 0 : index
    %c0_36 = arith.constant 0 : index
    %c0_37 = arith.constant 0 : index
    %47 = vector.load %arg5[%c0_34, %c0_35, %c0_36, %c0_37] : memref<1x16x16x128xbf16, #tpu.memory_space<vmem>>, vector<1x16x16x128xbf16>
    tpu.vector_store %arg5[%c0_34, %c0_35, %c0_36, %c0_37], %46 {strides = array<i32>} : memref<1x16x16x128xbf16, #tpu.memory_space<vmem>>, vector<1x16x16x128xbf16>,
    return
  }
  func.func @transform_0(%arg0: i32, %arg1: i32) -> (i32, i32, i32, i32) {
    %c0_i32 = arith.constant 0 : i32
    %c0_i32_0 = arith.constant 0 : i32
    %c0_i32_1 = arith.constant 0 : i32
    %c0_i32_2 = arith.constant 0 : i32
    return %arg0, %c0_i32, %c0_i32_0, %c0_i32_1 : i32, i32, i32, i32
  }
  func.func @transform_1(%arg0: i32, %arg1: i32) -> (i32, i32) {
    %c0_i32 = arith.constant 0 : i32
    %c0_i32_0 = arith.constant 0 : i32
    %c0_i32_1 = arith.constant 0 : i32
    return %c0_i32, %c0_i32_0 : i32, i32
  }
  func.func @transform_2(%arg0: i32, %arg1: i32) -> (i32, i32) {
    %c0_i32 = arith.constant 0 : i32
    %c0_i32_0 = arith.constant 0 : i32
    %c0_i32_1 = arith.constant 0 : i32
    return %c0_i32, %c0_i32_0 : i32, i32
  }
  func.func @transform_3(%arg0: i32, %arg1: i32) -> (i32, i32, i32, i32) {
    %c0_i32 = arith.constant 0 : i32
    %c0_i32_0 = arith.constant 0 : i32
    %c0_i32_1 = arith.constant 0 : i32
    return %arg0, %arg1, %c0_i32, %c0_i32_0 : i32, i32, i32, i32
  }
}

module attributes {stable_mosaic.version = 11 : i64} {
  func.func @_conv_bn_kernel(%arg0: i32, %arg1: i32, %arg2: memref<1x18x18x4xbf16, #tpu.memory_space<vmem>>, %arg3: memref<36x128xbf16, #tpu.memory_space<vmem>>, %arg4: memref<1x128xf32, #tpu.memory_space<vmem>>, %arg5: memref<1x16x16x128xbf16, #tpu.memory_space<vmem>>) attributes {dimension_semantics = [#tpu.dimension_semantics<parallel>, #tpu.dimension_semantics<parallel>], iteration_bounds = array<i64: 2, 1>, scalar_prefetch = 0 : i64, scratch_operands = 0 : i64, tpu.core_type = #tpu.core_type<tc>, window_params = [{transform_indices = @transform_0, window_bounds = array<i64: 1, 18, 18, 4>}, {pipeline_mode = #tpu.pipeline_mode<synchronous>, transform_indices = @transform_1, window_bounds = array<i64: 36, 128>}, {pipeline_mode = #tpu.pipeline_mode<synchronous>, transform_indices = @transform_2, window_bounds = array<i64: 1, 128>}, {transform_indices = @transform_3, window_bounds = array<i64: 1, 16, 16, 128>}]} {
    %c16_i32 = arith.constant 16 : i32
    %0 = arith.muli %arg1, %c16_i32 : i32
    %1 = tpu.assume_multiple %0, 16 : i32
    %c0_i32 = arith.constant 0 : i32
    %2 = arith.addi %1, %c0_i32 : i32
    %c0 = arith.constant 0 : index
    %3 = arith.index_cast %2 : i32 to index
    %c0_0 = arith.constant 0 : index
    %c0_1 = arith.constant 0 : index
    %4 = vector.load %arg2[%c0, %3, %c0_0, %c0_1] : memref<1x18x18x4xbf16, #tpu.memory_space<vmem>>, vector<1x16x16x4xbf16>
    %5 = vector.shape_cast %4 : vector<1x16x16x4xbf16> to vector<16x16x4xbf16>
    %c0_i32_2 = arith.constant 0 : i32
    %6 = arith.addi %1, %c0_i32_2 : i32
    %c0_3 = arith.constant 0 : index
    %7 = arith.index_cast %6 : i32 to index
    %c1 = arith.constant 1 : index
    %c0_4 = arith.constant 0 : index
    %8 = vector.load %arg2[%c0_3, %7, %c1, %c0_4] : memref<1x18x18x4xbf16, #tpu.memory_space<vmem>>, vector<1x16x16x4xbf16>
    %9 = vector.shape_cast %8 : vector<1x16x16x4xbf16> to vector<16x16x4xbf16>
    %c0_i32_5 = arith.constant 0 : i32
    %10 = arith.addi %1, %c0_i32_5 : i32
    %c0_6 = arith.constant 0 : index
    %11 = arith.index_cast %10 : i32 to index
    %c2 = arith.constant 2 : index
    %c0_7 = arith.constant 0 : index
    %12 = vector.load %arg2[%c0_6, %11, %c2, %c0_7] : memref<1x18x18x4xbf16, #tpu.memory_space<vmem>>, vector<1x16x16x4xbf16>
    %13 = vector.shape_cast %12 : vector<1x16x16x4xbf16> to vector<16x16x4xbf16>
    %c1_i32 = arith.constant 1 : i32
    %14 = arith.addi %1, %c1_i32 : i32
    %c0_8 = arith.constant 0 : index
    %15 = arith.index_cast %14 : i32 to index
    %c0_9 = arith.constant 0 : index
    %c0_10 = arith.constant 0 : index
    %16 = vector.load %arg2[%c0_8, %15, %c0_9, %c0_10] : memref<1x18x18x4xbf16, #tpu.memory_space<vmem>>, vector<1x16x16x4xbf16>
    %17 = vector.shape_cast %16 : vector<1x16x16x4xbf16> to vector<16x16x4xbf16>
    %c1_i32_11 = arith.constant 1 : i32
    %18 = arith.addi %1, %c1_i32_11 : i32
    %c0_12 = arith.constant 0 : index
    %19 = arith.index_cast %18 : i32 to index
    %c1_13 = arith.constant 1 : index
    %c0_14 = arith.constant 0 : index
    %20 = vector.load %arg2[%c0_12, %19, %c1_13, %c0_14] : memref<1x18x18x4xbf16, #tpu.memory_space<vmem>>, vector<1x16x16x4xbf16>
    %21 = vector.shape_cast %20 : vector<1x16x16x4xbf16> to vector<16x16x4xbf16>
    %c1_i32_15 = arith.constant 1 : i32
    %22 = arith.addi %1, %c1_i32_15 : i32
    %c0_16 = arith.constant 0 : index
    %23 = arith.index_cast %22 : i32 to index
    %c2_17 = arith.constant 2 : index
    %c0_18 = arith.constant 0 : index
    %24 = vector.load %arg2[%c0_16, %23, %c2_17, %c0_18] : memref<1x18x18x4xbf16, #tpu.memory_space<vmem>>, vector<1x16x16x4xbf16>
    %25 = vector.shape_cast %24 : vector<1x16x16x4xbf16> to vector<16x16x4xbf16>
    %c2_i32 = arith.constant 2 : i32
    %26 = arith.addi %1, %c2_i32 : i32
    %c0_19 = arith.constant 0 : index
    %27 = arith.index_cast %26 : i32 to index
    %c0_20 = arith.constant 0 : index
    %c0_21 = arith.constant 0 : index
    %28 = vector.load %arg2[%c0_19, %27, %c0_20, %c0_21] : memref<1x18x18x4xbf16, #tpu.memory_space<vmem>>, vector<1x16x16x4xbf16>
    %29 = vector.shape_cast %28 : vector<1x16x16x4xbf16> to vector<16x16x4xbf16>
    %c2_i32_22 = arith.constant 2 : i32
    %30 = arith.addi %1, %c2_i32_22 : i32
    %c0_23 = arith.constant 0 : index
    %31 = arith.index_cast %30 : i32 to index
    %c1_24 = arith.constant 1 : index
    %c0_25 = arith.constant 0 : index
    %32 = vector.load %arg2[%c0_23, %31, %c1_24, %c0_25] : memref<1x18x18x4xbf16, #tpu.memory_space<vmem>>, vector<1x16x16x4xbf16>
    %33 = vector.shape_cast %32 : vector<1x16x16x4xbf16> to vector<16x16x4xbf16>
    %c2_i32_26 = arith.constant 2 : i32
    %34 = arith.addi %1, %c2_i32_26 : i32
    %c0_27 = arith.constant 0 : index
    %35 = arith.index_cast %34 : i32 to index
    %c2_28 = arith.constant 2 : index
    %c0_29 = arith.constant 0 : index
    %36 = vector.load %arg2[%c0_27, %35, %c2_28, %c0_29] : memref<1x18x18x4xbf16, #tpu.memory_space<vmem>>, vector<1x16x16x4xbf16>
    %37 = vector.shape_cast %36 : vector<1x16x16x4xbf16> to vector<16x16x4xbf16>
    %38 = tpu.concatenate %5, %9, %13, %17, %21, %25, %29, %33, %37 in 2 : vector<16x16x4xbf16>, vector<16x16x4xbf16>, vector<16x16x4xbf16>, vector<16x16x4xbf16>, vector<16x16x4xbf16>, vector<16x16x4xbf16>, vector<16x16x4xbf16>, vector<16x16x4xbf16>, vector<16x16x4xbf16> -> vector<16x16x36xbf16>
    %39 = vector.shape_cast %38 : vector<16x16x36xbf16> to vector<256x36xbf16>
    %c0_30 = arith.constant 0 : index
    %c0_31 = arith.constant 0 : index
    %40 = vector.load %arg3[%c0_30, %c0_31] : memref<36x128xbf16, #tpu.memory_space<vmem>>, vector<36x128xbf16>
    %cst = arith.constant dense<0.000000e+00> : vector<256x128xf32>
    %41 = tpu.matmul %39, %40, %cst {dimension_numbers = #tpu.dot_dimension_numbers<[1], [0], [0], [1], [0, 0, 1, 1], [], []>} : vector<256x36xbf16>, vector<36x128xbf16>, vector<256x128xf32> -> vector<256x128xf32>
    %c0_32 = arith.constant 0 : index
    %c0_33 = arith.constant 0 : index
    %42 = vector.load %arg4[%c0_32, %c0_33] : memref<1x128xf32, #tpu.memory_space<vmem>>, vector<1x128xf32>
    %43 = vector.broadcast %42 : vector<1x128xf32> to vector<256x128xf32>
    %44 = arith.addf %41, %43 : vector<256x128xf32>
    %45 = vector.shape_cast %44 : vector<256x128xf32> to vector<1x16x16x128xf32>
    %46 = arith.truncf %45 : vector<1x16x16x128xf32> to vector<1x16x16x128xbf16>
    %c0_34 = arith.constant 0 : index
    %c0_35 = arith.constant 0 : index
    %c0_36 = arith.constant 0 : index
    %c0_37 = arith.constant 0 : index
    %47 = vector.load %arg5[%c0_34, %c0_35, %c0_36, %c0_37] : memref<1x16x16x128xbf16, #tpu.memory_space<vmem>>, vector<1x16x16x128xbf16>
    tpu.vector_store %arg5[%c0_34, %c0_35, %c0_36, %c0_37], %46 {strides = array<i32>} : memref<1x16x16x128xbf16, #tpu.memory_space<vmem>>, vector<1x16x16x128xbf16>,
    return
  }
  func.func @transform_0(%arg0: i32, %arg1: i32) -> (i32, i32, i32, i32) {
    %c0_i32 = arith.constant 0 : i32
    %c0_i32_0 = arith.constant 0 : i32
    %c0_i32_1 = arith.constant 0 : i32
    %c0_i32_2 = arith.constant 0 : i32
    return %arg0, %c0_i32, %c0_i32_0, %c0_i32_1 : i32, i32, i32, i32
  }
  func.func @transform_1(%arg0: i32, %arg1: i32) -> (i32, i32) {
    %c0_i32 = arith.constant 0 : i32
    %c0_i32_0 = arith.constant 0 : i32
    %c0_i32_1 = arith.constant 0 : i32
    return %c0_i32, %c0_i32_0 : i32, i32
  }
  func.func @transform_2(%arg0: i32, %arg1: i32) -> (i32, i32) {
    %c0_i32 = arith.constant 0 : i32
    %c0_i32_0 = arith.constant 0 : i32
    %c0_i32_1 = arith.constant 0 : i32
    return %c0_i32, %c0_i32_0 : i32, i32
  }
  func.func @transform_3(%arg0: i32, %arg1: i32) -> (i32, i32, i32, i32) {
    %c0_i32 = arith.constant 0 : i32
    %c0_i32_0 = arith.constant 0 : i32
    %c0_i32_1 = arith.constant 0 : i32
    return %arg0, %arg1, %c0_i32, %c0_i32_0 : i32, i32, i32, i32
  }
}

</mosaic_0001>

<bundles_post_ra>
// kernel: basic_conv2d.1
= control target key start
LH: loop header
LB: loop body
LE: loop exit
PB: predicated region body
PF: predicated region fallthrough
CT: control target
= control target key end

     0   :  { %s3412_s12 = smov 0   ;;  %s3414_s13 = smov 0   ;;  %s4713_s0 = inlined_call_operand.vmem [shape: bf16[2,18,18,4], index: 0, kind: input, shape index: {}]   ;;  %s4714_s1 = inlined_call_operand.vmem [shape: bf16[36,128], index: 1, kind: input, shape index: {}]   ;;  %s4715_s2 = inlined_call_operand.vmem [shape: f32[1,128], index: 2, kind: input, shape index: {}]   ;;  %s4716_s3 = inlined_call_operand.vmem [shape: bf16[2,16,16,128], index: 3, kind: output, shape index: {}]  }
   0x1   :  { %s3416_s14 = smov 0  }
   0x2 LB: > { %s25_s15 = sadd.s32 1, %s3378_s13  ;;  %p2657_p0 = scmp.ge.s32.totalorder %s3382_s14, 1  ;;  %s3382_s14 = sphi %s3416_s14, %s13_s14   ;;  %s3378_s13 = sphi %s3414_s13, %s4730_s13   ;;  %s3374_s12 = sphi %s3412_s12, %s4729_s12  }
   0x3   : > { %p27_p1 = scmp.ge.s32.totalorder %s25_s15, 2  ;;  %p151_p2 = scmp.lt.s32.totalorder %s3382_s14, 3 }
   0x5   : > { %s4732_s15 = smov (%p27_p1, %s25_s15), 0  ;;  %p152_p3 = pnand %p2657_p0, %p151_p2 }
   0x7   : > { %155 = sbr.rel (%p152_p3) target bundleno = 614 (0x266), region = 32 }
   0xe   : > { %p180_p4 = scmp.lt.s32.totalorder %s3374_s12, 1  ;;  %s3384_s20 = smov 12   ;;  %vm802_vm0 = vcmask 1046528   ;;  %vm529_vm1 = vsmask.f32 7424  ;;  %vm2231_vm2 = vcmask 1041408  }
   0xf   : > { %s3385_s21 = smov 8   ;;  %s3386_s22 = smov 4   ;;  %vm1907_vm3 = vcmask 31744   ;;  %vm1940_vm4 = vcmask 64512   ;;  %vm1973_vm5 = vcmask 97280   ;;  %vm2006_vm6 = vcmask 130048  }
  0x10   : > { %s4734_s12 = smov (!%p180_p4, %s3374_s12), 1  ;;  %s3387_s23 = smov 16   ;;  %vm2039_vm7 = vcmask 162816   ;;  %vm2072_vm8 = vcmask 195584   ;;  %vm2105_vm9 = vcmask 228352   ;;  %vm2138_vm10 = vcmask 261120  }
  0x11   : > { %s3180_s16 = smul.u32 216, %s4734_s12  ;;  %s3388_s24 = smov 20   ;;  %vm2198_vm11 = vcmask 293888  }
  0x12   : > { %s3389_s27 = smov 24   ;;  %s3390_s30 = smov 28  }
  0x13   : > { %s3436_s19 = scalar_lea.vmem %s4713_s0, %s3180_s16  ;;  %s3391_s4 = smov 32  }
  0x14   : > { %v2677_v0 = vld [vmem:[%s3436_s19 + $0x6c] sm:$0xf]  ;;  %v3440_v1 = vld [vmem:[%s3436_s19 + $0x70] sm:$0xf]  ;;  %v218_v6 = vld [vmem:[%s3436_s19 + $0x64] sm:$0xf] }
  0x15   : > { %v3443_v2 = vcombine.low %v2677_v0, %v3440_v1  ;;  %v2661_v3 = vld [vmem:[%s3436_s19 + $0xc] sm:$0xf]  ;;  %v3447_v4 = vld [vmem:[%s3436_s19 + $0x10] sm:$0xf]  ;;  %v257_v7 = vld [vmem:[%s3436_s19 + $0x60] sm:$0xe] }
  0x16   : > { %v3450_v5 = vcombine.low %v2661_v3, %v3447_v4  ;;  %v3457_v8 = vld [vmem:[%s3436_s19 + $0x68] ss:$0 sps:$4 sm:$0x11]   ;;  %v2829_v9 = vcombine.low %v257_v7, %v218_v6  ;;  %v217_v10 = vld [vmem:[%s3436_s19 + $0x60] sm:$0xf]  ;;  %s2987_s9 = sshll.u32 %s4734_s12, 7 }
  0x17   : > { %979 = vrot.lane.b32.xlu1 %v3443_v2, %s3384_s20  ;;  %v1142_v11 = vshll.u32 %v3443_v2, 16  ;;  %v202_v12 = vld [vmem:[%s3436_s19 + $0x4] sm:$0xf]  ;;  %v828_v14 = vrot.slane %v3457_v8, 1  ;;  %v249_v15 = vld [vmem:[%s3436_s19] sm:$0xe]  ;;  %v3468_v18 = vcombine.low %v217_v10, %v218_v6  ;;  %s4658_s16 = scalar_lea.vmem %s4716_s3, %s2987_s9 }
  0x18   : > { %963 = vrot.lane.b32.xlu0 %v3450_v5, %s3384_s20  ;;  %v827_v13 = vrot.slane %v2829_v9, 1  ;;  %v201_v16 = vld [vmem:[%s3436_s19] sm:$0xf]  ;;  %v1046_v17 = vshll.u32 %v3450_v5, 16  ;;  %v2821_v20 = vcombine.low %v249_v15, %v202_v12  ;;  %v219_v21 = vld [vmem:[%s3436_s19 + $0x6c] sm:$0xf] }
  0x19   : > { %v3220_v19 = vld [vmem:[%s3436_s19 + $0x8] ss:$0 sps:$4 sm:$0x11]   ;;  %v3473_v23 = vcombine.low %v201_v16, %v202_v12  ;;  %v220_v24 = vld [vmem:[%s3436_s19 + $0x70] sm:$0xf]  ;;  %v627_v30 = vshrl.u32 %v3468_v18, 16 }
  0x1a   : > { %v829_v22 = vsel %vm802_vm0, %v827_v13, %v828_v14  ;;  %v258_v25 = vld [vmem:[%s3436_s19 + $0x6c] sm:$0xe]  ;;  %v803_v26 = vrot.slane %v2821_v20, 1  ;;  %v804_v27 = vrot.slane %v3220_v19, 1  ;;  %v3480_v31 = vcombine.low %v219_v21, %v220_v24  ;;  %v204_v33 = vld [vmem:[%s3436_s19 + $0x10] sm:$0xf] }
  0x1b   : > { %867 = vrot.lane.b32.xlu1 %v829_v22, %s3385_s21  ;;  %v3224_v28 = vld [vmem:[%s3436_s19 + $0x74] ss:$0 sps:$4 sm:$0x11]   ;;  %v2830_v29 = vcombine.low %v258_v25, %v220_v24  ;;  %v203_v32 = vld [vmem:[%s3436_s19 + $0xc] sm:$0xf]  ;;  %v531_v41 = vshrl.u32 %v3473_v23, 16 }
  0x1c   : > { %v805_v34 = vsel %vm802_vm0, %v803_v26, %v804_v27  ;;  %v831_v36 = vrot.slane %v3224_v28, 1  ;;  %v250_v37 = vld [vmem:[%s3436_s19 + $0xc] sm:$0xe]  ;;  %v3486_v38 = vcombine.low %v203_v32, %v204_v33  ;;  %v3227_v39 = vld [vmem:[%s3436_s19 + $0x14] ss:$0 sps:$4 sm:$0x11]  }
  0x1d   : > { %v830_v35 = vrot.slane %v2830_v29, 1  ;;  %851 = vrot.lane.b32.xlu0 %v805_v34, %s3385_s21  ;;  %v2822_v40 = vcombine.low %v250_v37, %v204_v33  ;;  %v533_v42 = vshll.u32 %v3473_v23, 16  ;;  %v538_v43 = vshll.u32 %v3220_v19, 16  ;;  %v2679_v52 = vld [vmem:[%s3436_s19 + $0x78] sm:$0xf] }
  0x1e   : > { %v543_v45 = vshrl.u32 %v3486_v38, 16  ;;  %v545_v46 = vshll.u32 %v3486_v38, 16  ;;  %v639_v47 = vshrl.u32 %v3480_v31, 16  ;;  %v807_v49 = vrot.slane %v3227_v39, 1  ;;  %v3500_v57 = vld [vmem:[%s3436_s19 + $0x7c] sm:$0xf] }
  0x1f   : > { %v832_v44 = vsel %vm802_vm0, %v830_v35, %v831_v36  ;;  %v806_v48 = vrot.slane %v2822_v40, 1  ;;  %v550_v50 = vshll.u32 %v3227_v39, 16  ;;  %v535_v51 = vrot.slane %v533_v42, 1  ;;  %v2663_v62 = vld [vmem:[%s3436_s19 + $0x18] sm:$0xf] }
  0x20   : > { %869 = vrot.lane.b32.xlu1 %v832_v44, %s3385_s21  ;;  %v547_v53 = vrot.slane %v545_v46, 1  ;;  %v540_v54 = vrot.slane %v538_v43, 1  ;;  %v641_v55 = vshll.u32 %v3480_v31, 16  ;;  %v646_v56 = vshll.u32 %v3224_v28, 16  ;;  %v3506_v63 = vld [vmem:[%s3436_s19 + $0x1c] sm:$0xf] }
  0x21   : > { %v808_v58 = vsel %vm802_vm0, %v806_v48, %v807_v49  ;;  %v552_v59 = vrot.slane %v550_v50, 1  ;;  %v536_v60 = vor.u32 %v535_v51, %v531_v41  ;;  %v629_v61 = vshll.u32 %v3468_v18, 16  ;;  %v3513_v13 = vld [vmem:[%s3436_s19 + $0x74] ss:$0 sps:$4 sm:$0x11]  }
  0x22   : > { %853 = vrot.lane.b32.xlu0 %v808_v58, %s3385_s21  ;;  %v548_v0 = vor.u32 %v547_v53, %v543_v45  ;;  %v643_v3 = vrot.slane %v641_v55, 1  ;;  %v648_v6 = vrot.slane %v646_v56, 1  ;;  %v634_v7 = vshll.u32 %v3457_v8, 16  ;;  %v3518_v20 = vld [vmem:[%s3436_s19 + $0x14] ss:$0 sps:$4 sm:$0x11]  }
  0x23   : > { %v541_v9 = vsel %vm529_vm1, %v536_v60, %v540_v54  ;;  %v631_v10 = vrot.slane %v629_v61, 1  ;;  %v2846_v12 = vcombine.low %v2679_v52, %v3500_v57  ;;  %v2838_v19 = vcombine.low %v2663_v62, %v3506_v63  ;;  %v3525_v24 = vld [vmem:[%s3436_s19 + $0x80] ss:$0 sps:$4 sm:$0x11]   ;;  %v2717_v40 = vld [vmem:[%s3436_s19 + $0x6c] sm:$0xe] }
  0x24   : > { %v553_v14 = vsel %vm529_vm1, %v548_v0, %v552_v59  ;;  %v644_v15 = vor.u32 %v643_v3, %v639_v47  ;;  %v636_v16 = vrot.slane %v634_v7, 1  ;;  %v1140_v21 = vshrl.u32 %v3443_v2, 16  ;;  %v2709_v43 = vld [vmem:[%s3436_s19 + $0xc] sm:$0xe]  ;;  %v2718_v49 = vld [vmem:[%s3436_s19 + $0x78] sm:$0xe] }
  0x25   : > { %724 = vrot.lane.b32.xlu1 %v553_v14, %s3386_s22  ;;  %v632_v8 = vor.u32 %v631_v10, %v627_v30  ;;  %v1144_v22 = vrot.slane %v1142_v11, 1  ;;  %v1154_v26 = vshll.u32 %v2846_v12, 16  ;;  %v1147_v27 = vshll.u32 %v3513_v13, 16  ;;  %v3536_v11 = vld [vmem:[%s3436_s19 + $0x20] ss:$0 sps:$4 sm:$0x11]  }
  0x26   : > { %722 = vrot.lane.b32.xlu0 %v541_v9, %s3386_s22  ;;  %v649_v25 = vsel %vm529_vm1, %v644_v15, %v648_v6  ;;  %v1044_v28 = vshrl.u32 %v3450_v5, 16  ;;  %v1058_v30 = vshll.u32 %v2838_v19, 16  ;;  %v1048_v32 = vrot.slane %v1046_v17, 1  ;;  %v2710_v53 = vld [vmem:[%s3436_s19 + $0x18] sm:$0xe] }
  0x27   : > { %v637_v29 = vsel %vm529_vm1, %v632_v8, %v636_v16  ;;  %v1051_v2 = vshll.u32 %v3518_v20, 16  ;;  %v1145_v33 = vor.u32 %v1144_v22, %v1140_v21  ;;  %v1149_v34 = vrot.slane %v1147_v27, 1  ;;  %v2741_v54 = vld [vmem:[%s3436_s19 + $0x78] sm:$0xf]  ;;  %v3563_v60 = vld [vmem:[%s3436_s19 + $0x1c] sm:$0xf] }
  0x28   : > { %v1049_v35 = vor.u32 %v1048_v32, %v1044_v28  ;;  %v1152_v36 = vshrl.u32 %v2846_v12, 16  ;;  %v1156_v37 = vrot.slane %v1154_v26, 1  ;;  %v1159_v39 = vshll.u32 %v3525_v24, 16  ;;  %v2725_v55 = vld [vmem:[%s3436_s19 + $0x18] sm:$0xf] }
  0x29   : > { %740 = vrot.lane.b32.xlu1 %v649_v25, %s3386_s22  ;;  %v1053_v5 = vrot.slane %v1051_v2, 1  ;;  %v1056_v17 = vshrl.u32 %v2838_v19, 16  ;;  %v1060_v41 = vrot.slane %v1058_v30, 1  ;;  %v1063_v42 = vshll.u32 %v3536_v11, 16  ;;  %v2743_v7 = vld [vmem:[%s3436_s19 + $0x84] sm:$0xf] }
  0x2a   : > { %738 = vrot.lane.b32.xlu0 %v637_v29, %s3386_s22  ;;  %v2877_v44 = vcombine.low %v2717_v40, %v3440_v1  ;;  %v1150_v45 = vsel %vm529_vm1, %v1145_v33, %v1149_v34  ;;  %v1157_v46 = vor.u32 %v1156_v37, %v1152_v36  ;;  %v1161_v47 = vrot.slane %v1159_v39, 1  ;;  %v3555_v1 = vld [vmem:[%s3436_s19 + $0x7c] sm:$0xf]  ;;  %v3573_v9 = vld [vmem:[%s3436_s19 + $0x88] sm:$0xf] }
  0x2b   : > { %v2869_v48 = vcombine.low %v2709_v43, %v3447_v4  ;;  %v1054_v50 = vsel %vm529_vm1, %v1049_v35, %v1053_v5  ;;  %v1061_v51 = vor.u32 %v1060_v41, %v1056_v17  ;;  %v1065_v52 = vrot.slane %v1063_v42, 1  ;;  %v3580_v14 = vld [vmem:[%s3436_s19 + $0x28] sm:$0xf]  ;;  %v3586_v21 = vld [vmem:[%s3436_s19 + $0x80] ss:$0 sps:$4 sm:$0x11]  }
  0x2c   : > { %v2878_v56 = vcombine.low %v2718_v49, %v3500_v57  ;;  %v1162_v4 = vsel %vm529_vm1, %v1157_v46, %v1161_v47  ;;  %v1339_v58 = vrot.slane %v2877_v44, 1  ;;  %v1340_v59 = vrot.slane %v3513_v13, 1  ;;  %v2727_v13 = vld [vmem:[%s3436_s19 + $0x24] sm:$0xf]  ;;  %v221_v37 = vld [vmem:[%s3436_s19 + $0x78] sm:$0xf] }
  0x2d   : > { %981 = vrot.lane.b32.xlu1 %v2846_v12, %s3384_s20  ;;  %v2870_v61 = vcombine.low %v2710_v53, %v3506_v63  ;;  %v1066_v62 = vsel %vm529_vm1, %v1061_v51, %v1065_v52  ;;  %v1315_v0 = vrot.slane %v2869_v48, 1  ;;  %v1316_v3 = vrot.slane %v3518_v20, 1  ;;  %v3593_v26 = vld [vmem:[%s3436_s19 + $0x20] ss:$0 sps:$4 sm:$0x11]  }
  0x2e   : > { %965 = vrot.lane.b32.xlu0 %v2838_v19, %s3384_s20  ;;  %v2893_v57 = vcombine.low %v2741_v54, %v3555_v1  ;;  %v2885_v6 = vcombine.low %v2725_v55, %v3563_v60  ;;  %v1341_v10 = vsel %vm802_vm0, %v1339_v58, %v1340_v59  ;;  %v1342_v63 = vrot.slane %v2878_v56, 1  ;;  %v3599_v34 = vld [vmem:[%s3436_s19 + $0x8c] ss:$0 sps:$4 sm:$0x11]   ;;  %v3608_v39 = vld [vmem:[%s3436_s19 + $0x7c] sm:$0xf] }
  0x2f   : > { %v1343_v12 = vrot.slane %v3525_v24, 1  ;;  %v1317_v15 = vsel %vm802_vm0, %v1315_v0, %v1316_v3  ;;  %v1318_v16 = vrot.slane %v2870_v61, 1  ;;  %v1319_v19 = vrot.slane %v3536_v11, 1  ;;  %v3604_v36 = vld [vmem:[%s3436_s19 + $0x2c] ss:$0 sps:$4 sm:$0x11]  }
  0x30   : > { %v1654_v20 = vshll.u32 %v2893_v57, 16  ;;  %v2894_v8 = vcombine.low %v2743_v7, %v3573_v9  ;;  %v1558_v22 = vshll.u32 %v2885_v6, 16  ;;  %v2886_v24 = vcombine.low %v2727_v13, %v3580_v14  ;;  %v205_v40 = vld [vmem:[%s3436_s19 + $0x18] sm:$0xf]  ;;  %v3612_v17 = vld [vmem:[%s3436_s19 + $0x1c] sm:$0xf] }
  0x31   : > { %1251 = vrot.lane.b32.xlu1 %v1150_v45, %s3387_s23  ;;  %v1344_v25 = vsel %vm802_vm0, %v1342_v63, %v1343_v12  ;;  %v1320_v27 = vsel %vm802_vm0, %v1318_v16, %v1319_v19  ;;  %v1652_v29 = vshrl.u32 %v2893_v57, 16  ;;  %v1659_v32 = vshll.u32 %v3586_v21, 16  ;;  %v3309_v41 = vld [vmem:[%s4714_s1] sm:$0xff]   ;;  %v2781_v42 = vld [vmem:[%s3436_s19 + $0x78] sm:$0xe]  ;;  %v3314_v56 = vld [vmem:[%s4714_s1 + $0x8] sm:$0xff]  }
  0x32   : > { %1235 = vrot.lane.b32.xlu0 %v1054_v50, %s3387_s23  ;;  %v1666_v28 = vshll.u32 %v2894_v8, 16  ;;  %v1656_v30 = vrot.slane %v1654_v20, 1  ;;  %v1570_v2 = vshll.u32 %v2886_v24, 16  ;;  %v1556_v11 = vshrl.u32 %v2885_v6, 16  ;;  %v2773_v47 = vld [vmem:[%s3436_s19 + $0x18] sm:$0xe]  ;;  %3134 = vmatprep.subr.bf16.mxu0 %v3309_v41 }
  0x33   : > { %v1560_v33 = vrot.slane %v1558_v22, 1  ;;  %v1563_v35 = vshll.u32 %v3593_v26, 16  ;;  %v1661_v43 = vrot.slane %v1659_v32, 1  ;;  %v1664_v44 = vshrl.u32 %v2894_v8, 16  ;;  %3172 = vmatprep.subr.bf16.mxu1 %v3309_v41  ;;  %3135 = vmatpush3.bf16.msra.mxu0 %v3309_v41  ;;  %v223_v7 = vld [vmem:[%s3436_s19 + $0x84] sm:$0xf] }
  0x34   : > { %v1657_v5 = vor.u32 %v1656_v30, %v1652_v29  ;;  %v1668_v45 = vrot.slane %v1666_v28, 1  ;;  %v1671_v46 = vshll.u32 %v3599_v34, 16  ;;  %v1568_v48 = vshrl.u32 %v2886_v24, 16  ;;  %3175 = vmatpush3.bf16.msra.mxu1 %v3309_v41  ;;  %v3636_v61 = vld [vmem:[%s3436_s19 + $0x80] ss:$0 sps:$4 sm:$0x11]   ;;  %3136 = vmatprep.subr.bf16.mxu0 %v3314_v56 }
  0x35   : > { %1253 = vrot.lane.b32.xlu1 %v1162_v4, %s3387_s23  ;;  %v1572_v49 = vrot.slane %v1570_v2, 1  ;;  %v1575_v50 = vshll.u32 %v3604_v36, 16  ;;  %v3624_v51 = vcombine.low %v221_v37, %v3608_v39  ;;  %v1561_v52 = vor.u32 %v1560_v33, %v1556_v11  ;;  %3173 = vmatprep.subr.bf16.mxu1 %v3314_v56  ;;  %v207_v13 = vld [vmem:[%s3436_s19 + $0x24] sm:$0xf] }
  0x36   : > { %1237 = vrot.lane.b32.xlu0 %v1066_v62, %s3387_s23  ;;  %v1565_v53 = vrot.slane %v1563_v35, 1  ;;  %v3627_v54 = vcombine.low %v205_v40, %v3612_v17  ;;  %v2925_v55 = vcombine.low %v2781_v42, %v3555_v1  ;;  %v2917_v4 = vcombine.low %v2773_v47, %v3563_v60  ;;  %v2782_v16 = vld [vmem:[%s3436_s19 + $0x84] sm:$0xe]  ;;  %v3678_v40 = vld [vmem:[%s3436_s19 + $0x8c] ss:$0 sps:$4 sm:$0x11]  }
  0x37   : > { %v1669_v58 = vor.u32 %v1668_v45, %v1664_v44  ;;  %v1673_v59 = vrot.slane %v1671_v46, 1  ;;  %v1662_v1 = vsel %vm529_vm1, %v1657_v5, %v1661_v43  ;;  %v1573_v62 = vor.u32 %v1572_v49, %v1568_v48  ;;  %3137 = vmatpush3.bf16.msra.mxu0 %v3314_v56 }
  0x38   : > { %v1577_v0 = vrot.slane %v1575_v50, 1  ;;  %v653_v3 = vshll.u32 %v3624_v51, 16  ;;  %v1566_v60 = vsel %vm529_vm1, %v1561_v52, %v1565_v53  ;;  %v1851_v63 = vrot.slane %v2925_v55, 1  ;;  %3176 = vmatpush3.bf16.msra.mxu1 %v3314_v56  ;;  %v259_v53 = vld [vmem:[%s3436_s19 + $0x78] sm:$0xe] }
  0x39   : > { %1379 = vrot.lane.b32.xlu1 %v1341_v10, %s3388_s24  ;;  %v3648_v10 = vld [vmem:[%s3436_s19 + $0x88] sm:$0xf]  ;;  %v1852_v12 = vrot.slane %v3586_v21, 1  ;;  %v1674_v19 = vsel %vm529_vm1, %v1669_v58, %v1673_v59  ;;  %v1827_v20 = vrot.slane %v2917_v4, 1  ;;  %v658_v22 = vshll.u32 %v3636_v61, 16 }
  0x3a   : > { %1363 = vrot.lane.b32.xlu0 %v1317_v15, %s3388_s24  ;;  %v3653_v15 = vld [vmem:[%s3436_s19 + $0x28] sm:$0xf]  ;;  %v1578_v21 = vsel %vm529_vm1, %v1573_v62, %v1577_v0  ;;  %v3665_v28 = vcombine.low %v223_v7, %v3648_v10  ;;  %v555_v29 = vshrl.u32 %v3627_v54, 16  ;;  %v2926_v2 = vcombine.low %v2782_v16, %v3573_v9  ;;  %v3683_v9 = vld [vmem:[%s3436_s19 + $0x2c] ss:$0 sps:$4 sm:$0x11]  }
  0x3b   : > { %v3670_v32 = vcombine.low %v207_v13, %v3653_v15  ;;  %v660_v33 = vrot.slane %v658_v22, 1  ;;  %v1853_v35 = vsel %vm802_vm0, %v1851_v63, %v1852_v12  ;;  %v1855_v45 = vrot.slane %v3599_v34, 1  ;;  %v252_v63 = vld [vmem:[%s3436_s19 + $0x24] sm:$0xe] }
  0x3c   : > { %v665_v5 = vshll.u32 %v3665_v28, 16  ;;  %v1854_v44 = vrot.slane %v2926_v2, 1  ;;  %v1831_v47 = vrot.slane %v3604_v36, 1  ;;  %v663_v49 = vshrl.u32 %v3665_v28, 16  ;;  %v251_v36 = vld [vmem:[%s3436_s19 + $0x18] sm:$0xe] }
  0x3d   : > { %1381 = vrot.lane.b32.xlu1 %v1344_v25, %s3388_s24  ;;  %v651_v25 = vshrl.u32 %v3624_v51, 16  ;;  %v670_v52 = vshll.u32 %v3678_v40, 16  ;;  %v567_v56 = vshrl.u32 %v3670_v32, 16  ;;  %v574_v4 = vshll.u32 %v3683_v9, 16 }
  0x3e   : > { %1365 = vrot.lane.b32.xlu0 %v1320_v27, %s3388_s24  ;;  %v655_v27 = vrot.slane %v653_v3, 1  ;;  %v667_v50 = vrot.slane %v665_v5, 1  ;;  %v1856_v58 = vsel %vm802_vm0, %v1854_v44, %v1855_v45  ;;  %v2831_v62 = vcombine.low %v259_v53, %v3608_v39  ;;  %v260_v3 = vld [vmem:[%s3436_s19 + $0x84] sm:$0xe] }
  0x3f   : > { %v2823_v0 = vcombine.low %v251_v36, %v3612_v17  ;;  %v576_v7 = vrot.slane %v574_v4, 1  ;;  %v834_v12 = vrot.slane %v3636_v61, 1  ;;  %v2832_v16 = vcombine.low %v260_v3, %v3648_v10 }
  0x40   : > { %v656_v37 = vor.u32 %v655_v27, %v651_v25  ;;  %v668_v59 = vor.u32 %v667_v50, %v663_v49  ;;  %v833_v17 = vrot.slane %v2831_v62, 1  ;;  %v2824_v61 = vcombine.low %v252_v63, %v3653_v15  ;;  %v3730_v15 = vld [vmem:[%s3436_s19 + $0x94] sm:$0xf]  ;;  %v2711_v62 = vld [vmem:[%s3436_s19 + $0x24] sm:$0xe] }
  0x41   : > { %1491 = vrot.lane.b32.xlu1 %v2893_v57, %s3389_s27  ;;  %v3642_v57 = vld [vmem:[%s3436_s19 + $0x20] ss:$0 sps:$4 sm:$0x11]   ;;  %v836_v10 = vrot.slane %v2832_v16, 1 }
  0x42   : > { %1475 = vrot.lane.b32.xlu0 %v2885_v6, %s3389_s27  ;;  %v557_v6 = vshll.u32 %v3627_v54, 16  ;;  %v661_v48 = vsel %vm529_vm1, %v656_v37, %v660_v33  ;;  %v810_v13 = vrot.slane %v3642_v57, 1  ;;  %v835_v27 = vsel %vm802_vm0, %v833_v17, %v834_v12  ;;  %v2667_v33 = vld [vmem:[%s3436_s19 + $0x30] sm:$0xf] }
  0x43   : > { %v812_v2 = vrot.slane %v2824_v61, 1  ;;  %v2720_v12 = vld [vmem:[%s3436_s19 + $0x90] sm:$0xe] }
  0x44   : > { %v559_v30 = vrot.slane %v557_v6, 1  ;;  %v2880_v61 = vcombine.low %v2720_v12, %v3730_v15 }
  0x45   : > { %1493 = vrot.lane.b32.xlu1 %v2894_v8, %s3389_s27  ;;  %v1828_v8 = vrot.slane %v3593_v26, 1  ;;  %v562_v26 = vshll.u32 %v3642_v57, 16  ;;  %v2665_v57 = vld [vmem:[%s3436_s19 + $0x24] sm:$0xf] }
  0x46   : > { %1477 = vrot.lane.b32.xlu0 %v2886_v24, %s3389_s27  ;;  %v2774_v24 = vld [vmem:[%s3436_s19 + $0x24] sm:$0xe]  ;;  %v560_v42 = vor.u32 %v559_v30, %v555_v29  ;;  %v2683_v30 = vld [vmem:[%s3436_s19 + $0x90] sm:$0xf] }
  0x47   : > { %v2918_v11 = vcombine.low %v2774_v24, %v3580_v14  ;;  %v1829_v41 = vsel %vm802_vm0, %v1827_v20, %v1828_v8  ;;  %v564_v43 = vrot.slane %v562_v26, 1  ;;  %v569_v14 = vshll.u32 %v3670_v32, 16  ;;  %v2681_v20 = vld [vmem:[%s3436_s19 + $0x84] sm:$0xf]  ;;  %v3714_v8 = vld [vmem:[%s3436_s19 + $0x88] sm:$0xf] }
  0x48   : > { %v3720_v24 = vld [vmem:[%s3436_s19 + $0x28] sm:$0xf]  ;;  %v2847_v25 = vcombine.low %v2681_v20, %v3714_v8 }
  0x49   : > { %1763 = vrot.lane.b32.xlu1 %v1662_v1, %s3390_s30  ;;  %v1830_v46 = vrot.slane %v2918_v11, 1  ;;  %v565_v55 = vsel %vm529_vm1, %v560_v42, %v564_v43  ;;  %v571_v34 = vrot.slane %v569_v14, 1  ;;  %v672_v1 = vrot.slane %v670_v52, 1  ;;  %v3269_v43 = vld [vmem:[%s3436_s19 + $0x8c] ss:$0 sps:$4 sm:$0x11]  }
  0x4a   : > { %1747 = vrot.lane.b32.xlu0 %v1566_v60, %s3390_s30  ;;  %v2839_v29 = vcombine.low %v2665_v57, %v3720_v24  ;;  %v813_v11 = vrot.slane %v3683_v9, 1  ;;  %v1166_v37 = vshll.u32 %v2847_v25, 16  ;;  %v3746_v14 = vld [vmem:[%s3436_s19 + $0x2c] ss:$0 sps:$4 sm:$0x11]   ;;  %v1164_v45 = vshrl.u32 %v2847_v25, 16 }
  0x4b   : > { %v1832_v60 = vsel %vm802_vm0, %v1830_v46, %v1831_v47  ;;  %v572_v6 = vor.u32 %v571_v34, %v567_v56  ;;  %v673_v39 = vsel %vm529_vm1, %v668_v59, %v672_v1  ;;  %v1171_v49 = vshll.u32 %v3269_v43, 16  ;;  %v3751_v52 = vld [vmem:[%s3436_s19 + $0x98] ss:$0 sps:$4 sm:$0x11]   ;;  %v2719_v56 = vld [vmem:[%s3436_s19 + $0x84] sm:$0xe] }
  0x4c   : > { %v814_v9 = vsel %vm802_vm0, %v812_v2, %v813_v11  ;;  %v1168_v46 = vrot.slane %v1166_v37, 1  ;;  %v1068_v47 = vshrl.u32 %v2839_v29, 16  ;;  %v1075_v53 = vshll.u32 %v3746_v14, 16  ;;  %v2745_v57 = vld [vmem:[%s3436_s19 + $0x90] sm:$0xf] }
  0x4d   : > { %1765 = vrot.lane.b32.xlu1 %v1674_v19, %s3390_s30  ;;  %v809_v19 = vrot.slane %v2823_v0, 1  ;;  %v577_v22 = vsel %vm529_vm1, %v572_v6, %v576_v7  ;;  %v1173_v36 = vrot.slane %v1171_v49, 1  ;;  %v1183_v1 = vshll.u32 %v3751_v52, 16  ;;  %v2747_v11 = vld [vmem:[%s3436_s19 + $0x9c] sm:$0xf] }
  0x4e   : > { %1749 = vrot.lane.b32.xlu0 %v1578_v21, %s3390_s30  ;;  %v837_v21 = vrot.slane %v3678_v40, 1  ;;  %v2848_v40 = vcombine.low %v2683_v30, %v3730_v15  ;;  %v1169_v34 = vor.u32 %v1168_v46, %v1164_v45  ;;  %v1077_v0 = vrot.slane %v1075_v53, 1  ;;  %v3784_v15 = vld [vmem:[%s3436_s19 + $0x34] sm:$0xf]  ;;  %v3801_v45 = vld [vmem:[%s3436_s19 + $0x40] sm:$0xf] }
  0x4f   : > { %v811_v26 = vsel %vm802_vm0, %v809_v19, %v810_v13  ;;  %v2879_v7 = vcombine.low %v2719_v56, %v3714_v8  ;;  %v2871_v63 = vcombine.low %v2711_v62, %v3720_v24  ;;  %v3775_v24 = vld [vmem:[%s3436_s19 + $0x94] sm:$0xf]  ;;  %v3804_v46 = vld [vmem:[%s3436_s19 + $0x98] ss:$0 sps:$4 sm:$0x11]  }
  0x50   : > { %v838_v5 = vsel %vm802_vm0, %v836_v10, %v837_v21  ;;  %v1178_v44 = vshll.u32 %v2848_v40, 16  ;;  %v1176_v4 = vshrl.u32 %v2848_v40, 16  ;;  %v1174_v13 = vsel %vm529_vm1, %v1169_v34, %v1173_v36  ;;  %v3810_v49 = vld [vmem:[%s3436_s19 + $0x38] ss:$0 sps:$4 sm:$0x11]  }
  0x51   : > { %1891 = vrot.lane.b32.xlu1 %v1853_v35, %s3391_s4  ;;  %v3736_v35 = vld [vmem:[%s3436_s19 + $0x34] sm:$0xf]  ;;  %v1345_v8 = vrot.slane %v2879_v7, 1  ;;  %v1346_v21 = vrot.slane %v3269_v43, 1  ;;  %v2895_v2 = vcombine.low %v2745_v57, %v3775_v24  ;;  %v1587_v62 = vshll.u32 %v3810_v49, 16 }
  0x52   : > { %1875 = vrot.lane.b32.xlu0 %v1829_v41, %s3391_s4  ;;  %v1070_v41 = vshll.u32 %v2839_v29, 16  ;;  %v2840_v42 = vcombine.low %v2667_v33, %v3736_v35  ;;  %v1180_v59 = vrot.slane %v1178_v44, 1  ;;  %v3789_v33 = vld [vmem:[%s3436_s19 + $0xa0] sm:$0xf] }
  0x53   : > { %v1347_v37 = vsel %vm802_vm0, %v1345_v8, %v1346_v21  ;;  %v1678_v44 = vshll.u32 %v2895_v2, 16  ;;  %v1676_v56 = vshrl.u32 %v2895_v2, 16  ;;  %v1589_v8 = vrot.slane %v1587_v62, 1 }
  0x54   : > { %v1072_v50 = vrot.slane %v1070_v41, 1  ;;  %v1080_v3 = vshrl.u32 %v2840_v42, 16  ;;  %v1181_v16 = vor.u32 %v1180_v59, %v1176_v4  ;;  %v1683_v4 = vshll.u32 %v3804_v46, 16  ;;  %v3821_v59 = vld [vmem:[%s3436_s19 + $0x44] ss:$0 sps:$4 sm:$0x11]  }
  0x55   : > { %742 = vrot.lane.b32.xlu1 %v661_v48, %s3386_s22  ;;  %v1082_v48 = vshll.u32 %v2840_v42, 16  ;;  %v1680_v34 = vrot.slane %v1678_v44, 1  ;;  %v2784_v44 = vld [vmem:[%s3436_s19 + $0x9c] sm:$0xe] }
  0x56   : > { %726 = vrot.lane.b32.xlu0 %v565_v55, %s3386_s22  ;;  %v3755_v55 = vld [vmem:[%s3436_s19 + $0x38] ss:$0 sps:$4 sm:$0x11]  }
  0x57   : > { %v1087_v6 = vshll.u32 %v3755_v55, 16  ;;  %v1325_v43 = vrot.slane %v3755_v55, 1  ;;  %v2783_v55 = vld [vmem:[%s3436_s19 + $0x90] sm:$0xe] }
  0x58   : > { %v2927_v7 = vcombine.low %v2783_v55, %v3775_v24  ;;  %v1834_v55 = vrot.slane %v3810_v49, 1 }
  0x59   : > { %1893 = vrot.lane.b32.xlu1 %v1856_v58, %s3391_s4  ;;  %v1073_v58 = vor.u32 %v1072_v50, %v1068_v47  ;;  %v1089_v20 = vrot.slane %v1087_v6, 1  ;;  %v3319_v6 = vld [vmem:[%s4714_s1 + $0x10] ss:$0 sps:$4 sm:$0x33]  }
  0x5a   : > { %1877 = vrot.lane.b32.xlu0 %v1832_v60, %s3391_s4  ;;  %v1084_v60 = vrot.slane %v1082_v48, 1  ;;  %3178 = vmatprep.subr.msk.bf16.mxu0 %vm2231_vm2, %v3319_v6 }
  0x5b   : > { %v1078_v17 = vsel %vm529_vm1, %v1073_v58, %v1077_v0  ;;  %v3818_v58 = vld [vmem:[%s3436_s19 + $0xa4] ss:$0 sps:$4 sm:$0x11]   ;;  %v225_v0 = vld [vmem:[%s3436_s19 + $0x90] sm:$0xf]  ;;  %3179 = vmatprep.subr.msk.bf16.mxu1 %vm2231_vm2, %v3319_v6 }
  0x5c   : > { %v1085_v19 = vor.u32 %v1084_v60, %v1080_v3  ;;  %v3827_v60 = vld [vmem:[%s3436_s19 + $0x94] sm:$0xf] }
  0x5d   : > { %744 = vrot.lane.b32.xlu1 %v673_v39, %s3386_s22  ;;  %v1185_v39 = vrot.slane %v1183_v1, 1  ;;  %v3842_v57 = vcombine.low %v225_v0, %v3827_v60 }
  0x5e   : > { %728 = vrot.lane.b32.xlu0 %v577_v22, %s3386_s22  ;;  %v2712_v22 = vld [vmem:[%s3436_s19 + $0x30] sm:$0xe]  ;;  %v1090_v30 = vsel %vm529_vm1, %v1085_v19, %v1089_v20  ;;  %v1695_v19 = vshll.u32 %v3818_v58, 16 }
  0x5f   : > { %v1186_v10 = vsel %vm529_vm1, %v1181_v16, %v1185_v39  ;;  %v3835_v16 = vld [vmem:[%s3436_s19 + $0x34] sm:$0xf]  ;;  %v1685_v39 = vrot.slane %v1683_v4, 1  ;;  %v2775_v20 = vld [vmem:[%s3436_s19 + $0x30] sm:$0xe]  ;;  %4721 = vst [vmem:[#allocation2_spill] sm:$0xff] %v3842_v57 }
  0x61   : > { %871 = vrot.lane.b32.xlu1 %v835_v27, %s3385_s21  ;;  %v1322_v27 = vrot.slane %v3746_v14, 1  ;;  %v2731_v14 = vld [vmem:[%s3436_s19 + $0x3c] sm:$0xf] }
  0x62   : > { %855 = vrot.lane.b32.xlu0 %v811_v26, %s3385_s21  ;;  %v2729_v26 = vld [vmem:[%s3436_s19 + $0x30] sm:$0xf]  ;;  %v2888_v53 = vcombine.low %v2731_v14, %v3801_v45  ;;  %v3866_v14 = vld [vmem:[%s3436_s19 + $0xa0] sm:$0xf] }
  0x64   : > { %v1594_v3 = vshll.u32 %v2888_v53, 16 }
  0x65   : > { %873 = vrot.lane.b32.xlu1 %v838_v5, %s3385_s21  ;;  %v2887_v5 = vcombine.low %v2729_v26, %v3784_v15  ;;  %v3851_v26 = vld [vmem:[%s3436_s19 + $0x98] ss:$0 sps:$4 sm:$0x11]  }
  0x66   : > { %857 = vrot.lane.b32.xlu0 %v814_v9, %s3385_s21  ;;  %v2896_v9 = vcombine.low %v2747_v11, %v3789_v33  ;;  %v1596_v24 = vrot.slane %v1594_v3, 1  ;;  %v1857_v11 = vrot.slane %v2927_v7, 1  ;;  %v682_v4 = vshll.u32 %v3851_v26, 16 }
  0x67   : > { %v1582_v48 = vshll.u32 %v2887_v5, 16  ;;  %v1580_v36 = vshrl.u32 %v2887_v5, 16  ;;  %v2928_v7 = vcombine.low %v2784_v44, %v3789_v33 }
  0x68   : > { %v1688_v12 = vshrl.u32 %v2896_v9, 16 }
  0x69   : > { %983 = vrot.lane.b32.xlu1 %v2847_v25, %s3384_s20  ;;  %v1321_v25 = vrot.slane %v2871_v63, 1  ;;  %v1584_v1 = vrot.slane %v1582_v48, 1  ;;  %v1681_v63 = vor.u32 %v1680_v34, %v1676_v56  ;;  %v3871_v48 = vld [vmem:[%s3436_s19 + $0x40] sm:$0xf]  ;;  %v675_v56 = vshrl.u32 %v3842_v57, 16 }
  0x6a   : > { %967 = vrot.lane.b32.xlu0 %v2839_v29, %s3384_s20  ;;  %v2872_v29 = vcombine.low %v2712_v22, %v3736_v35  ;;  %v1348_v35 = vrot.slane %v2880_v61, 1  ;;  %v1592_v61 = vshrl.u32 %v2888_v53, 16 }
  0x6b   : > { %v1323_v41 = vsel %vm802_vm0, %v1321_v25, %v1322_v27  ;;  %v1585_v22 = vor.u32 %v1584_v1, %v1580_v36  ;;  %v2233_v25 = vsel %vm2231_vm2, %v3319_v6, 0  ;;  %v2919_v27 = vcombine.low %v2775_v20, %v3784_v15 }
  0x6c   : > { %3139 = vmatpush3.bf16.msra.mxu0 %v2233_v25  ;;  %3177 = vmatpush3.bf16.msra.mxu1 %v2233_v25  ;;  %v677_v15 = vshll.u32 %v3842_v57, 16  ;;  %v1861_v25 = vrot.slane %v3818_v58, 1 }
  0x6d   : > { %985 = vrot.lane.b32.xlu1 %v2848_v40, %s3384_s20  ;;  %v1349_v40 = vrot.slane %v3751_v52, 1  ;;  %v1690_v52 = vshll.u32 %v2896_v9, 16 }
  0x6e   : > { %969 = vrot.lane.b32.xlu0 %v2840_v42, %s3384_s20  ;;  %v1324_v42 = vrot.slane %v2872_v29, 1  ;;  %v679_v34 = vrot.slane %v677_v15, 1  ;;  %v261_v15 = vld [vmem:[%s3436_s19 + $0x90] sm:$0xe] }
  0x6f   : > { %v1350_v47 = vsel %vm802_vm0, %v1348_v35, %v1349_v40  ;;  %v3858_v35 = vld [vmem:[%s3436_s19 + $0x38] ss:$0 sps:$4 sm:$0x11]   ;;  %v1590_v40 = vsel %vm529_vm1, %v1585_v22, %v1589_v8 }
  0x70   : > { %v1326_v50 = vsel %vm802_vm0, %v1324_v42, %v1325_v43  ;;  %v586_v36 = vshll.u32 %v3858_v35, 16 }
  0x71   : > { %1255 = vrot.lane.b32.xlu1 %v1174_v13, %s3387_s23  ;;  %v209_v13 = vld [vmem:[%s3436_s19 + $0x30] sm:$0xf] }
  0x72   : > { %1239 = vrot.lane.b32.xlu0 %v1078_v17, %s3387_s23  ;;  %v1692_v17 = vrot.slane %v1690_v52, 1  ;;  %v3846_v21 = vcombine.low %v209_v13, %v3835_v16  ;;  %v680_v13 = vor.u32 %v679_v34, %v675_v56 }
  0x74   : > { %4722 = vst [vmem:[#allocation3_spill] sm:$0xff] %v3846_v21  ;;  %v1693_v29 = vor.u32 %v1692_v17, %v1688_v12  ;;  %v581_v43 = vshll.u32 %v3846_v21, 16  ;;  %v579_v0 = vshrl.u32 %v3846_v21, 16  ;;  %v588_v17 = vrot.slane %v586_v36, 1 }
  0x75   : > { %1257 = vrot.lane.b32.xlu1 %v1186_v10, %s3387_s23  ;;  %v1599_v10 = vshll.u32 %v3821_v59, 16 }
  0x76   : > { %1241 = vrot.lane.b32.xlu0 %v1090_v30, %s3387_s23  ;;  %v1697_v30 = vrot.slane %v1695_v19, 1  ;;  %v583_v3 = vrot.slane %v581_v43, 1  ;;  %v3899_v19 = vld [vmem:[%s3436_s19 + $0xa4] ss:$0 sps:$4 sm:$0x11]  }
  0x77   : > { %v1601_v42 = vrot.slane %v1599_v10, 1  ;;  %v1860_v10 = vrot.slane %v2928_v7, 1  ;;  %v253_v43 = vld [vmem:[%s3436_s19 + $0x30] sm:$0xe] }
  0x78   : > { %v1698_v52 = vsel %vm529_vm1, %v1693_v29, %v1697_v30  ;;  %v584_v8 = vor.u32 %v583_v3, %v579_v0  ;;  %v1837_v29 = vrot.slane %v3821_v59, 1  ;;  %v2825_v34 = vcombine.low %v253_v43, %v3835_v16  ;;  %v2685_v3 = vld [vmem:[%s3436_s19 + $0x9c] sm:$0xf] }
  0x79   : > { %1383 = vrot.lane.b32.xlu1 %v1347_v37, %s3388_s24  ;;  %v1858_v37 = vrot.slane %v3804_v46, 1  ;;  %v2776_v46 = vld [vmem:[%s3436_s19 + $0x3c] sm:$0xe]  ;;  %v1862_v44 = vsel %vm802_vm0, %v1860_v10, %v1861_v25  ;;  %v840_v0 = vrot.slane %v3851_v26, 1  ;;  %v2687_v25 = vld [vmem:[%s3436_s19 + $0xa8] sm:$0xf] }
  0x7a   : > { %1367 = vrot.lane.b32.xlu0 %v1323_v41, %s3388_s24  ;;  %v1597_v41 = vor.u32 %v1596_v24, %v1592_v61 }
  0x7b   : > { %v1859_v12 = vsel %vm802_vm0, %v1857_v11, %v1858_v37  ;;  %v694_v37 = vshll.u32 %v3899_v19, 16 }
  0x7c   : > { %v1602_v62 = vsel %vm529_vm1, %v1597_v41, %v1601_v42 }
  0x7d   : > { %1385 = vrot.lane.b32.xlu1 %v1350_v47, %s3388_s24  ;;  %v211_v47 = vld [vmem:[%s3436_s19 + $0x3c] sm:$0xf] }
  0x7e   : > { %1369 = vrot.lane.b32.xlu0 %v1326_v50, %s3388_s24  ;;  %v3889_v49 = vcombine.low %v211_v47, %v3871_v48 }
  0x80   : > { %4724 = vst [vmem:[#allocation5_spill] sm:$0xff] %v3889_v49  ;;  %v593_v61 = vshll.u32 %v3889_v49, 16  ;;  %v591_v41 = vshrl.u32 %v3889_v49, 16 }
  0x81   : > { %1495 = vrot.lane.b32.xlu1 %v2895_v2, %s3389_s27  ;;  %v1686_v2 = vsel %vm529_vm1, %v1681_v63, %v1685_v39  ;;  %v2920_v63 = vcombine.low %v2776_v46, %v3801_v45  ;;  %v684_v39 = vrot.slane %v682_v4, 1  ;;  %v3906_v45 = vld [vmem:[%s3436_s19 + $0x44] ss:$0 sps:$4 sm:$0x11]   ;;  %v696_v46 = vrot.slane %v694_v37, 1 }
  0x82   : > { %1479 = vrot.lane.b32.xlu0 %v2887_v5, %s3389_s27  ;;  %v595_v42 = vrot.slane %v593_v61, 1  ;;  %v598_v58 = vshll.u32 %v3906_v45, 16  ;;  %v262_v4 = vld [vmem:[%s3436_s19 + $0x9c] sm:$0xe] }
  0x83   : > { %v685_v30 = vsel %vm529_vm1, %v680_v13, %v684_v39  ;;  %v815_v39 = vrot.slane %v2825_v34, 1 }
  0x84   : > { %v600_v56 = vrot.slane %v598_v58, 1 }
  0x85   : > { %1497 = vrot.lane.b32.xlu1 %v2896_v9, %s3389_s27  ;;  %v227_v9 = vld [vmem:[%s3436_s19 + $0x9c] sm:$0xf] }
  0x86   : > { %1481 = vrot.lane.b32.xlu0 %v2888_v53, %s3389_s27  ;;  %v1833_v53 = vrot.slane %v2919_v27, 1  ;;  %v3884_v1 = vcombine.low %v227_v9, %v3866_v14  ;;  %v1836_v27 = vrot.slane %v2920_v63, 1  ;;  %v2833_v9 = vcombine.low %v261_v15, %v3827_v60  ;;  %v254_v60 = vld [vmem:[%s3436_s19 + $0x3c] sm:$0xe]  ;;  %v2671_v15 = vld [vmem:[%s3436_s19 + $0x48] sm:$0xf] }
  0x87   : > { %v2834_v63 = vcombine.low %v262_v4, %v3866_v14  ;;  %v2826_v26 = vcombine.low %v254_v60, %v3871_v48 }
  0x88   : > { %4723 = vst [vmem:[#allocation4_spill] sm:$0xff] %v3884_v1  ;;  %v689_v20 = vshll.u32 %v3884_v1, 16  ;;  %v1835_v33 = vsel %vm802_vm0, %v1833_v53, %v1834_v55  ;;  %v1838_v53 = vsel %vm802_vm0, %v1836_v27, %v1837_v29  ;;  %v596_v55 = vor.u32 %v595_v42, %v591_v41  ;;  %v3965_v27 = vld [vmem:[%s3436_s19 + $0xac] sm:$0xf] }
  0x89   : > { %v3861_v5 = vpop.permute.xlu1 %979  ;;  %1767 = vrot.lane.b32.xlu1 %v1686_v2, %s3390_s30  ;;  %v687_v2 = vshrl.u32 %v3884_v1, 16  ;;  %v842_v10 = vrot.slane %v2834_v63, 1  ;;  %v2850_v41 = vcombine.low %v2687_v25, %v3965_v27  ;;  %v3980_v42 = vld [vmem:[%s3436_s19 + $0xa4] ss:$0 sps:$4 sm:$0x11]  }
  0x8a   : > { %v3875_v50 = vpop.permute.xlu0 %963  ;;  %1751 = vrot.lane.b32.xlu0 %v1590_v40, %s3390_s30  ;;  %v691_v11 = vrot.slane %v689_v20, 1  ;;  %v589_v40 = vsel %vm529_vm1, %v584_v8, %v588_v17  ;;  %v601_v13 = vsel %vm529_vm1, %v596_v55, %v600_v56  ;;  %v816_v17 = vrot.slane %v3858_v35, 1  ;;  %v2669_v20 = vld [vmem:[%s3436_s19 + $0x3c] sm:$0xf] }
  0x8b   : > { %v843_v35 = vrot.slane %v3899_v19, 1  ;;  %v1202_v55 = vshll.u32 %v2850_v41, 16  ;;  %v1195_v34 = vshll.u32 %v3980_v42, 16  ;;  %v4003_v63 = vld [vmem:[%s3436_s19 + $0x50] ss:$0 sps:$4 sm:$0x11]  }
  0x8c   : > { %v692_v47 = vor.u32 %v691_v11, %v687_v2  ;;  %v818_v2 = vrot.slane %v2826_v26, 1  ;;  %v819_v11 = vrot.slane %v3906_v45, 1  ;;  %v2721_v26 = vld [vmem:[%s3436_s19 + $0x9c] sm:$0xe] }
  0x8d   : > { %v3891_v6 = vpop.permute.xlu1 %867  ;;  %1769 = vrot.lane.b32.xlu1 %v1698_v52, %s3390_s30  ;;  %v844_v58 = vsel %vm802_vm0, %v842_v10, %v843_v35  ;;  %v1204_v10 = vrot.slane %v1202_v55, 1  ;;  %v2713_v25 = vld [vmem:[%s3436_s19 + $0x3c] sm:$0xe] }
  0x8e   : > { %1753 = vrot.lane.b32.xlu0 %v1602_v62, %s3390_s30  ;;  %v839_v62 = vrot.slane %v2833_v9, 1  ;;  %v697_v7 = vsel %vm529_vm1, %v692_v47, %v696_v46  ;;  %v3985_v9 = vld [vmem:[%s3436_s19 + $0x44] ss:$0 sps:$4 sm:$0x11]  }
  0x8f   : > { %v3902_v22 = vpop.permute.xlu0 %851 }
  0x90   : > { %v841_v61 = vsel %vm802_vm0, %v839_v62, %v840_v0  ;;  %v3997_v62 = vld [vmem:[%s3436_s19 + $0xb0] ss:$0 sps:$4 sm:$0x11]  }
  0x91   : > { %1895 = vrot.lane.b32.xlu1 %v1859_v12, %s3391_s4  ;;  %v3944_v12 = vld [vmem:[%s3436_s19 + $0xa0] sm:$0xf]  ;;  %v1207_v35 = vshll.u32 %v3997_v62, 16 }
  0x92   : > { %v3910_v24 = vpop.permute.xlu1 %869  ;;  %1879 = vrot.lane.b32.xlu0 %v1835_v33, %s3391_s4  ;;  %v3953_v33 = vld [vmem:[%s3436_s19 + $0x40] sm:$0xf]  ;;  %v2849_v14 = vcombine.low %v2685_v3, %v3944_v12 }
  0x93   : > { %v2841_v48 = vcombine.low %v2669_v20, %v3953_v33  ;;  %v1197_v20 = vrot.slane %v1195_v34, 1  ;;  %v1209_v34 = vrot.slane %v1207_v35, 1 }
  0x94   : > { %v3922_v59 = vpop.permute.xlu0 %853  ;;  %v1190_v19 = vshll.u32 %v2849_v14, 16 }
  0x95   : > { %746 = vrot.lane.b32.xlu1 %v685_v30, %s3386_s22  ;;  %v817_v30 = vsel %vm802_vm0, %v815_v39, %v816_v17  ;;  %v1094_v43 = vshll.u32 %v2841_v48, 16  ;;  %v1092_v4 = vshrl.u32 %v2841_v48, 16  ;;  %v1200_v17 = vshrl.u32 %v2850_v41, 16 }
  0x96   : > { %730 = vrot.lane.b32.xlu0 %v589_v40, %s3386_s22  ;;  %v3975_v40 = vld [vmem:[%s3436_s19 + $0x4c] sm:$0xf]  ;;  %v1192_v56 = vrot.slane %v1190_v19, 1 }
  0x97   : > { %v3929_v52 = vpop.permute.xlu1 %724  ;;  %v2842_v47 = vcombine.low %v2671_v15, %v3975_v40  ;;  %v1096_v60 = vrot.slane %v1094_v43, 1  ;;  %v1111_v15 = vshll.u32 %v4003_v63, 16  ;;  %v4019_v43 = vld [vmem:[%s3436_s19 + $0xac] sm:$0xf] }
  0x98   : > { %v3934_v36 = vpop.permute.xlu0 %722 }
  0x99   : > { %1897 = vrot.lane.b32.xlu1 %v1862_v44, %s3391_s4  ;;  %v820_v44 = vsel %vm802_vm0, %v818_v2, %v819_v11  ;;  %v1106_v3 = vshll.u32 %v2842_v47, 16  ;;  %v1104_v11 = vshrl.u32 %v2842_v47, 16 }
  0x9a   : > { %1881 = vrot.lane.b32.xlu0 %v1838_v53, %s3391_s4  ;;  %v1188_v53 = vshrl.u32 %v2849_v14, 16 }
  0x9b   : > { %v3946_v16 = vpop.permute.xlu1 %740 }
  0x9c   : > { %v3955_v8 = vpop.permute.xlu0 %738  ;;  %v1193_v39 = vor.u32 %v1192_v56, %v1188_v53  ;;  %v2722_v53 = vld [vmem:[%s3436_s19 + $0xa8] sm:$0xe]  ;;  %v1205_v56 = vor.u32 %v1204_v10, %v1200_v17  ;;  %v4045_v10 = vld [vmem:[%s3436_s19 + $0xb8] sm:$0xf] }
  0x9d   : > { %748 = vrot.lane.b32.xlu1 %v697_v7, %s3386_s22  ;;  %v1099_v7 = vshll.u32 %v3985_v9, 16  ;;  %v2882_v17 = vcombine.low %v2722_v53, %v3965_v27  ;;  %v4053_v27 = vld [vmem:[%s3436_s19 + $0x58] sm:$0xf] }
  0x9e   : > { %732 = vrot.lane.b32.xlu0 %v601_v13, %s3386_s22  ;;  %v1198_v55 = vsel %vm529_vm1, %v1193_v39, %v1197_v20  ;;  %v4038_v39 = vld [vmem:[%s3436_s19 + $0x4c] sm:$0xf]  ;;  %v1352_v20 = vrot.slane %v3980_v42, 1 }
  0x9f   : > { %v3967_v29 = vpop.permute.xlu1 %981  ;;  %v1101_v2 = vrot.slane %v1099_v7, 1  ;;  %v1113_v7 = vrot.slane %v1111_v15, 1 }
  0xa0   : > { %v3971_v37 = vpop.permute.xlu0 %965 }
  0xa1   : > { %875 = vrot.lane.b32.xlu1 %v841_v61, %s3385_s21  ;;  %v1097_v61 = vor.u32 %v1096_v60, %v1092_v4  ;;  %v2714_v4 = vld [vmem:[%s3436_s19 + $0x48] sm:$0xe] }
  0xa2   : > { %859 = vrot.lane.b32.xlu0 %v817_v30, %s3385_s21  ;;  %v2874_v35 = vcombine.low %v2714_v4, %v3975_v40  ;;  %v4063_v40 = vld [vmem:[%s3436_s19 + $0xb0] ss:$0 sps:$4 sm:$0x11]   ;;  %v1355_v4 = vrot.slane %v3997_v62, 1 }
  0xa3   : > { %v3987_v45 = vpop.permute.xlu1 %1251 }
  0xa4   : > { %v3991_v46 = vpop.permute.xlu0 %1235 }
  0xa5   : > { %877 = vrot.lane.b32.xlu1 %v844_v58, %s3385_s21  ;;  %v2749_v58 = vld [vmem:[%s3436_s19 + $0xa8] sm:$0xf] }
  0xa6   : > { %861 = vrot.lane.b32.xlu0 %v820_v44, %s3385_s21  ;;  %v2873_v44 = vcombine.low %v2713_v25, %v3953_v33  ;;  %v1210_v25 = vsel %vm529_vm1, %v1205_v56, %v1209_v34 }
  0xa7   : > { %v3999_v0 = vpop.permute.xlu1 %1253 }
  0xa8   : > { %v4005_v13 = vpop.permute.xlu0 %1237 }
  0xa9   : > { %987 = vrot.lane.b32.xlu1 %v2849_v14, %s3384_s20  ;;  %v1108_v14 = vrot.slane %v1106_v3, 1  ;;  %v1102_v3 = vsel %vm529_vm1, %v1097_v61, %v1101_v2  ;;  %v2751_v61 = vld [vmem:[%s3436_s19 + $0xb4] sm:$0xf]  ;;  %v1327_v2 = vrot.slane %v2873_v44, 1 }
  0xaa   : > { %971 = vrot.lane.b32.xlu0 %v2841_v48, %s3384_s20  ;;  %v2881_v48 = vcombine.low %v2721_v26, %v3944_v12  ;;  %v4068_v44 = vcombine.low %v2751_v61, %v4045_v10 }
  0xab   : > { %v4012_v30 = vpop.permute.xlu1 %1379  ;;  %v1109_v12 = vor.u32 %v1108_v14, %v1104_v11  ;;  %v1328_v11 = vrot.slane %v3985_v9, 1  ;;  %v2735_v14 = vld [vmem:[%s3436_s19 + $0x54] sm:$0xf] }
  0xac   : > { %v4015_v19 = vpop.permute.xlu0 %1363  ;;  %v1351_v26 = vrot.slane %v2881_v48, 1  ;;  %v4073_v56 = vcombine.low %v2735_v14, %v4053_v27  ;;  %v1714_v62 = vshll.u32 %v4068_v44, 16 }
  0xad   : > { %989 = vrot.lane.b32.xlu1 %v2850_v41, %s3384_s20  ;;  %v4032_v41 = vcombine.low %v2749_v58, %v4019_v43  ;;  %v1114_v58 = vsel %vm529_vm1, %v1109_v12, %v1113_v7  ;;  %v1329_v34 = vsel %vm802_vm0, %v1327_v2, %v1328_v11  ;;  %v1331_v12 = vrot.slane %v4003_v63, 1  ;;  %v4088_v63 = vld [vmem:[%s3436_s19 + $0x50] ss:$0 sps:$4 sm:$0x11]  }
  0xae   : > { %973 = vrot.lane.b32.xlu0 %v2842_v47, %s3384_s20  ;;  %v2733_v47 = vld [vmem:[%s3436_s19 + $0x48] sm:$0xf]  ;;  %v1353_v9 = vsel %vm802_vm0, %v1351_v26, %v1352_v20  ;;  %v1707_v20 = vshll.u32 %v4063_v40, 16  ;;  %v4096_v2 = vld [vmem:[%s3436_s19 + $0xbc] ss:$0 sps:$4 sm:$0x11]   ;;  %v1909_v11 = vsel %vm1907_vm3, %v3473_v23, %v3934_v36 }
  0xaf   : > { %v4028_v60 = vpop.permute.xlu1 %1381  ;;  %v1702_v42 = vshll.u32 %v4032_v41, 16  ;;  %v4060_v48 = vcombine.low %v2733_v47, %v4038_v39 }
  0xb0   : > { %v4034_v33 = vpop.permute.xlu0 %1365  ;;  %v1709_v1 = vrot.slane %v1707_v20, 1 }
  0xb1   : > { %1259 = vrot.lane.b32.xlu1 %v1198_v55, %s3387_s23  ;;  %v1354_v55 = vrot.slane %v2882_v17, 1  ;;  %v1606_v47 = vshll.u32 %v4060_v48, 16  ;;  %v1700_v17 = vshrl.u32 %v4032_v41, 16  ;;  %v1704_v26 = vrot.slane %v1702_v42, 1 }
  0xb2   : > { %1243 = vrot.lane.b32.xlu0 %v1102_v3, %s3387_s23  ;;  %v1330_v3 = vrot.slane %v2874_v35, 1  ;;  %v1925_v35 = vsel %vm1907_vm3, %v3468_v18, %v3955_v8  ;;  %v2785_v18 = vld [vmem:[%s3436_s19 + $0xa8] sm:$0xe]  ;;  %v4106_v8 = vld [vmem:[%s3436_s19 + $0x5c] ss:$0 sps:$4 sm:$0x11]  }
  0xb3   : > { %v4055_v15 = vpop.permute.xlu1 %1491  ;;  %v1356_v14 = vsel %vm802_vm0, %v1354_v55, %v1355_v4  ;;  %v1705_v49 = vor.u32 %v1704_v26, %v1700_v17  ;;  %v1604_v21 = vshrl.u32 %v4060_v48, 16  ;;  %v1608_v57 = vrot.slane %v1606_v47, 1 }
  0xb4   : > { %v4065_v53 = vpop.permute.xlu0 %1475  ;;  %v1958_v23 = vsel %vm1940_vm4, %v1925_v35, %v3891_v6  ;;  %v1712_v55 = vshrl.u32 %v4068_v44, 16  ;;  %v1716_v4 = vrot.slane %v1714_v62, 1  ;;  %v1616_v47 = vshrl.u32 %v4073_v56, 16 }
  0xb5   : > { %1261 = vrot.lane.b32.xlu1 %v1210_v25, %s3387_s23  ;;  %v1618_v25 = vshll.u32 %v4073_v56, 16  ;;  %v2929_v6 = vcombine.low %v2785_v18, %v4019_v43  ;;  %v1623_v20 = vshll.u32 %v4106_v8, 16  ;;  %v1710_v35 = vsel %vm529_vm1, %v1705_v49, %v1709_v1 }
  0xb6   : > { %1245 = vrot.lane.b32.xlu0 %v1114_v58, %s3387_s23  ;;  %v1332_v58 = vsel %vm802_vm0, %v1330_v3, %v1331_v12  ;;  %v1942_v3 = vsel %vm1940_vm4, %v1909_v11, %v3902_v22  ;;  %v1719_v12 = vshll.u32 %v4096_v2, 16  ;;  %v1991_v22 = vsel %vm1973_vm5, %v1958_v23, %v3861_v5  ;;  %v229_v11 = vld [vmem:[%s3436_s19 + $0xa8] sm:$0xf]  ;;  %v4140_v23 = vld [vmem:[%s3436_s19 + $0x4c] sm:$0xf] }
  0xb7   : > { %v4079_v7 = vpop.permute.xlu1 %1493  ;;  %v1620_v17 = vrot.slane %v1618_v25, 1  ;;  %v1609_v25 = vor.u32 %v1608_v57, %v1604_v21  ;;  %v2024_v43 = vsel %vm2006_vm6, %v1991_v22, %v3987_v45  ;;  %v213_v5 = vld [vmem:[%s3436_s19 + $0x48] sm:$0xf]  ;;  %v231_v22 = vld [vmem:[%s3436_s19 + $0xb4] sm:$0xf] }
  0xb8   : > { %v4084_v61 = vpop.permute.xlu0 %1477  ;;  %v2057_v57 = vsel %vm2039_vm7, %v2024_v43, %v4012_v30  ;;  %v1721_v21 = vrot.slane %v1719_v12, 1  ;;  %v1927_v30 = vsel %vm1907_vm3, %v3480_v31, %v3946_v16  ;;  %v1863_v31 = vrot.slane %v2929_v6, 1  ;;  %v4172_v16 = vld [vmem:[%s3436_s19 + $0xb0] ss:$0 sps:$4 sm:$0x11]  }
  0xb9   : > { %1387 = vrot.lane.b32.xlu1 %v1353_v9, %s3388_s24  ;;  %v2777_v9 = vld [vmem:[%s3436_s19 + $0x48] sm:$0xe]  ;;  %v1621_v49 = vor.u32 %v1620_v17, %v1616_v47  ;;  %v2090_v45 = vsel %vm2072_vm8, %v2057_v57, %v4055_v15  ;;  %v4164_v15 = vcombine.low %v213_v5, %v4140_v23  ;;  %v1960_v47 = vsel %vm1940_vm4, %v1927_v30, %v3910_v24 }
  0xba   : > { %1371 = vrot.lane.b32.xlu0 %v1329_v34, %s3388_s24  ;;  %v1611_v34 = vshll.u32 %v4088_v63, 16  ;;  %v2921_v26 = vcombine.low %v2777_v9, %v4038_v39  ;;  %v1975_v39 = vsel %vm1973_vm5, %v1942_v3, %v3875_v50  ;;  %v1717_v9 = vor.u32 %v1716_v4, %v1712_v55 }
  0xbb   : > { %v1764_v42 = vpop.permute.xlu1 %1763  ;;  %v2008_v1 = vsel %vm2006_vm6, %v1975_v39, %v3991_v46  ;;  %v1840_v17 = vrot.slane %v4088_v63, 1  ;;  %v706_v43 = vshll.u32 %v4172_v16, 16  ;;  %v215_v39 = vld [vmem:[%s3436_s19 + $0x54] sm:$0xf] }
  0xbc   : > { %v1748_v36 = vpop.permute.xlu0 %1747  ;;  %v1613_v18 = vrot.slane %v1611_v34, 1  ;;  %v2041_v50 = vsel %vm2039_vm7, %v2008_v1, %v4015_v19  ;;  %v1625_v34 = vrot.slane %v1623_v20, 1  ;;  %v2123_v19 = vsel %vm2105_vm9, %v2090_v45, %v1764_v42 }
  0xbd   : > { %1389 = vrot.lane.b32.xlu1 %v1356_v14, %s3388_s24  ;;  %v4130_v14 = vld [vmem:[%s3436_s19 + $0xac] sm:$0xf]  ;;  %v605_v20 = vshll.u32 %v4164_v15, 16 }
  0xbe   : > { %1373 = vrot.lane.b32.xlu0 %v1332_v58, %s3388_s24  ;;  %v4155_v46 = vcombine.low %v229_v11, %v4130_v14  ;;  %v1614_v42 = vsel %vm529_vm1, %v1609_v25, %v1613_v18  ;;  %v4201_v25 = vld [vmem:[%s3436_s19 + $0xb8] sm:$0xf] }
  0xbf   : > { %v4125_v62 = vpop.permute.xlu1 %1765  ;;  %v4213_v18 = vld [vmem:[%s3436_s19 + $0x58] sm:$0xf] }
  0xc0   : > { %v4136_v58 = vpop.permute.xlu0 %1749  ;;  %v701_v6 = vshll.u32 %v4155_v46, 16 }
  0xc1   : > { %1499 = vrot.lane.b32.xlu1 %v4032_v41, %s3389_s27  ;;  %v2074_v41 = vsel %vm2072_vm8, %v2041_v50, %v4065_v53  ;;  %v4230_v50 = vcombine.low %v231_v22, %v4201_v25 }
  0xc2   : > { %1483 = vrot.lane.b32.xlu0 %v4060_v48, %s3389_s27  ;;  %v1911_v48 = vsel %vm1907_vm3, %v3486_v38, %v3929_v52  ;;  %v2107_v4 = vsel %vm2105_vm9, %v2074_v41, %v1748_v36  ;;  %v1864_v38 = vrot.slane %v4063_v40, 1  ;;  %v1839_v52 = vrot.slane %v2921_v26, 1  ;;  %v4181_v36 = vld [vmem:[%s3436_s19 + $0x50] ss:$0 sps:$4 sm:$0x11]  }
  0xc3   : > { %v1892_v55 = vpop.permute.xlu1 %1891  ;;  %v1993_v40 = vsel %vm1973_vm5, %v1960_v47, %v3967_v29  ;;  %v1944_v26 = vsel %vm1940_vm4, %v1911_v48, %v3922_v59  ;;  %v699_v59 = vshrl.u32 %v4155_v46, 16  ;;  %v708_v48 = vrot.slane %v706_v43, 1  ;;  %v255_v43 = vld [vmem:[%s3436_s19 + $0x48] sm:$0xe] }
  0xc4   : > { %v1876_v3 = vpop.permute.xlu0 %1875  ;;  %v2156_v12 = vsel %vm2138_vm10, %v2123_v19, %v1892_v55  ;;  %v1977_v63 = vsel %vm1973_vm5, %v1944_v26, %v3971_v37  ;;  %v2026_v29 = vsel %vm2006_vm6, %v1993_v40, %v3999_v0  ;;  %v603_v37 = vshrl.u32 %v4164_v15, 16 }
  0xc5   : > { %1501 = vrot.lane.b32.xlu1 %v4068_v44, %s3389_s27  ;;  %v2140_v53 = vsel %vm2138_vm10, %v2107_v4, %v1876_v3  ;;  %3156 = vmatprep.mubr.msk.bf16.mxu1 %vm2198_vm11, %v2156_v12  ;;  %v1722_v44 = vsel %vm529_vm1, %v1717_v9, %v1721_v21  ;;  %v2010_v9 = vsel %vm2006_vm6, %v1977_v63, %v4005_v13  ;;  %v610_v0 = vshll.u32 %v4181_v36, 16  ;;  %v2786_v21 = vld [vmem:[%s3436_s19 + $0xb4] sm:$0xe]  ;;  %v4251_v4 = vld [vmem:[%s3436_s19 + $0xbc] ss:$0 sps:$4 sm:$0x11]  }
  0xc6   : > { %1485 = vrot.lane.b32.xlu0 %v4073_v56, %s3389_s27  ;;  %3140 = vmatprep.mubr.msk.bf16.mxu0 %vm2198_vm11, %v2140_v53  ;;  %v1626_v56 = vsel %vm529_vm1, %v1621_v49, %v1625_v34  ;;  %v2059_v5 = vsel %vm2039_vm7, %v2026_v29, %v4028_v60  ;;  %v2043_v1 = vsel %vm2039_vm7, %v2010_v9, %v4034_v33  ;;  %v2778_v49 = vld [vmem:[%s3436_s19 + $0x54] sm:$0xe]  ;;  %v703_v13 = vrot.slane %v701_v6, 1 }
  0xc7   : > { %v4195_v24 = vpop.permute.xlu1 %742  ;;  %v2092_v57 = vsel %vm2072_vm8, %v2059_v5, %v4079_v7  ;;  %v2076_v60 = vsel %vm2072_vm8, %v2043_v1, %v4084_v61  ;;  %v607_v33 = vrot.slane %v605_v20, 1  ;;  %v4237_v34 = vcombine.low %v215_v39, %v4213_v18 }
  0xc8   : > { %v4207_v11 = vpop.permute.xlu0 %726  ;;  %v2109_v7 = vsel %vm2105_vm9, %v2076_v60, %v4136_v58  ;;  %v2930_v19 = vcombine.low %v2786_v21, %v4045_v10  ;;  %v2922_v61 = vcombine.low %v2778_v49, %v4053_v27  ;;  %v704_v58 = vor.u32 %v703_v13, %v699_v59  ;;  %v264_v13 = vld [vmem:[%s3436_s19 + $0xb4] sm:$0xe] }
  0xc9   : > { %1771 = vrot.lane.b32.xlu1 %v1710_v35, %s3390_s30  ;;  %v2125_v35 = vsel %vm2105_vm9, %v2092_v57, %v4125_v62  ;;  %v1865_v62 = vsel %vm802_vm0, %v1863_v31, %v1864_v38  ;;  %v713_v10 = vshll.u32 %v4230_v50, 16  ;;  %v1841_v27 = vsel %vm802_vm0, %v1839_v52, %v1840_v17 }
  0xca   : > { %1755 = vrot.lane.b32.xlu0 %v1614_v42, %s3390_s30  ;;  %v608_v12 = vor.u32 %v607_v33, %v603_v37  ;;  %v612_v53 = vrot.slane %v610_v0, 1  ;;  %v4258_v42 = vld [vmem:[%s3436_s19 + $0x5c] ss:$0 sps:$4 sm:$0x11]   ;;  %v617_v47 = vshll.u32 %v4237_v34, 16  ;;  %v1866_v31 = vrot.slane %v2930_v19, 1 }
  0xcb   : > { %v1894_v45 = vpop.permute.xlu1 %1893  ;;  %v1867_v38 = vrot.slane %v4096_v2, 1  ;;  %v1842_v6 = vrot.slane %v2922_v61, 1  ;;  %v1843_v40 = vrot.slane %v4106_v8, 1  ;;  %v709_v52 = vsel %vm529_vm1, %v704_v58, %v708_v48  ;;  %v263_v8 = vld [vmem:[%s3436_s19 + $0xa8] sm:$0xe] }
  0xcc   : > { %v2158_v30 = vsel %vm2138_vm10, %v2125_v35, %v1894_v45  ;;  %v1878_v41 = vpop.permute.xlu0 %1877  ;;  %v711_v17 = vshrl.u32 %v4230_v50, 16  ;;  %v715_v26 = vrot.slane %v713_v10, 1  ;;  %v613_v22 = vsel %vm529_vm1, %v608_v12, %v612_v53  ;;  %v256_v35 = vld [vmem:[%s3436_s19 + $0x54] sm:$0xe] }
  0xcd   : > { %v2142_v55 = vsel %vm2138_vm10, %v2109_v7, %v1878_v41  ;;  %1773 = vrot.lane.b32.xlu1 %v1722_v44, %s3390_s30  ;;  %3157 = vmatmul.mubr.msk.bf16.vlgmr.msra.gmra.mrb[0].mxu1 %vm2198_vm11, %v2158_v30  ;;  %v615_v63 = vshrl.u32 %v4237_v34, 16  ;;  %v619_v29 = vrot.slane %v617_v47, 1  ;;  %v622_v2 = vshll.u32 %v4258_v42, 16  ;;  %v2673_v48 = vld [vmem:[%s3436_s19 + $0x54] sm:$0xf] }
  0xce   : > { %1757 = vrot.lane.b32.xlu0 %v1626_v56, %s3390_s30  ;;  %3141 = vmatmul.mubr.msk.bf16.vlgmr.msra.gmra.mrb[0].mxu0 %vm2198_vm11, %v2142_v55  ;;  %v718_v56 = vshll.u32 %v4251_v4, 16  ;;  %v1868_v39 = vsel %vm802_vm0, %v1866_v31, %v1867_v38  ;;  %v716_v9 = vor.u32 %v715_v26, %v711_v17  ;;  %v2835_v37 = vcombine.low %v263_v8, %v4130_v14  ;;  %v2689_v55 = vld [vmem:[%s3436_s19 + $0xb4] sm:$0xf]  ;;  %v2691_v38 = vld [vmem:[%s3436_s19 + $0xc0] sm:$0xf] }
  0xcf   : > { %v4254_v3 = vpop.permute.xlu1 %744  ;;  %v1844_v1 = vsel %vm802_vm0, %v1842_v6, %v1843_v40  ;;  %v620_v57 = vor.u32 %v619_v29, %v615_v63  ;;  %v624_v21 = vrot.slane %v622_v2, 1  ;;  %v2827_v49 = vcombine.low %v255_v43, %v4140_v23  ;;  %v4323_v6 = vld [vmem:[%s3436_s19 + $0xc4] sm:$0xf] }
  0xd0   : > { %v4261_v44 = vpop.permute.xlu0 %728  ;;  %v720_v5 = vrot.slane %v718_v56, 1  ;;  %v845_v45 = vrot.slane %v2835_v37, 1  ;;  %v846_v33 = vrot.slane %v4172_v16, 1  ;;  %v2836_v7 = vcombine.low %v264_v13, %v4201_v25  ;;  %v4309_v16 = vld [vmem:[%s3436_s19 + $0x58] sm:$0xf] }
  0xd1   : > { %1899 = vrot.lane.b32.xlu1 %v1865_v62, %s3391_s4  ;;  %v625_v23 = vsel %vm529_vm1, %v620_v57, %v624_v21  ;;  %v821_v41 = vrot.slane %v2827_v49, 1  ;;  %v822_v19 = vrot.slane %v4181_v36, 1  ;;  %v2828_v61 = vcombine.low %v256_v35, %v4213_v18  ;;  %v4303_v62 = vld [vmem:[%s3436_s19 + $0xb8] sm:$0xf]  ;;  %v4329_v17 = vld [vmem:[%s3436_s19 + $0x64] sm:$0xf] }
  0xd2   : > { %1883 = vrot.lane.b32.xlu0 %v1841_v27, %s3391_s4  ;;  %v721_v14 = vsel %vm529_vm1, %v716_v9, %v720_v5  ;;  %v847_v36 = vsel %vm802_vm0, %v845_v45, %v846_v33  ;;  %v848_v25 = vrot.slane %v2836_v7, 1  ;;  %v849_v18 = vrot.slane %v4251_v4, 1  ;;  %v4333_v4 = vld [vmem:[%s3436_s19 + $0xbc] ss:$0 sps:$4 sm:$0x11]  }
  0xd3   : > { %v4270_v20 = vpop.permute.xlu1 %871  ;;  %v2851_v10 = vcombine.low %v2689_v55, %v4303_v62  ;;  %v823_v12 = vsel %vm802_vm0, %v821_v41, %v822_v19  ;;  %v824_v53 = vrot.slane %v2828_v61, 1  ;;  %v825_v47 = vrot.slane %v4258_v42, 1  ;;  %v4357_v35 = vld [vmem:[%s3436_s19 + $0x68] ss:$0 sps:$4 sm:$0x11]  }
  0xd4   : > { %v4276_v59 = vpop.permute.xlu0 %855  ;;  %v2843_v31 = vcombine.low %v2673_v48, %v4309_v16  ;;  %v850_v26 = vsel %vm802_vm0, %v848_v25, %v849_v18  ;;  %v2852_v42 = vcombine.low %v2691_v38, %v4323_v6  ;;  %v1219_v9 = vshll.u32 %v4333_v4, 16 }
  0xd5   : > { %750 = vrot.lane.b32.xlu1 %v709_v52, %s3386_s22  ;;  %v2675_v52 = vld [vmem:[%s3436_s19 + $0x60] sm:$0xf]  ;;  %v1214_v56 = vshll.u32 %v2851_v10, 16  ;;  %v826_v29 = vsel %vm802_vm0, %v824_v53, %v825_v47  ;;  %v1135_v18 = vshll.u32 %v4357_v35, 16  ;;  %v2715_v53 = vld [vmem:[%s3436_s19 + $0x54] sm:$0xe] }
  0xd6   : > { %734 = vrot.lane.b32.xlu0 %v613_v22, %s3386_s22  ;;  %v4339_v22 = vld [vmem:[%s3436_s19 + $0x5c] ss:$0 sps:$4 sm:$0x11]   ;;  %v2844_v2 = vcombine.low %v2675_v52, %v4329_v17  ;;  %v1118_v8 = vshll.u32 %v2843_v31, 16  ;;  %v1226_v57 = vshll.u32 %v2852_v42, 16  ;;  %v1116_v49 = vshrl.u32 %v2843_v31, 16 }
  0xd7   : > { %v4283_v0 = vpop.permute.xlu1 %873  ;;  %v1216_v5 = vrot.slane %v1214_v56, 1  ;;  %v1123_v37 = vshll.u32 %v4339_v22, 16  ;;  %v1221_v33 = vrot.slane %v1219_v9, 1  ;;  %v1224_v7 = vshrl.u32 %v2852_v42, 16  ;;  %v2724_v9 = vld [vmem:[%s3436_s19 + $0xc0] sm:$0xe] }
  0xd8   : > { %v4288_v60 = vpop.permute.xlu0 %857  ;;  %v1120_v13 = vrot.slane %v1118_v8, 1  ;;  %v1228_v19 = vrot.slane %v1226_v57, 1  ;;  %v1137_v8 = vrot.slane %v1135_v18, 1 }
  0xd9   : > { %1901 = vrot.lane.b32.xlu1 %v1868_v39, %s3391_s4  ;;  %v1212_v39 = vshrl.u32 %v2851_v10, 16  ;;  %v1125_v41 = vrot.slane %v1123_v37, 1  ;;  %v4385_v37 = vld [vmem:[%s3436_s19 + $0xc4] sm:$0xf] }
  0xda   : > { %1885 = vrot.lane.b32.xlu0 %v1844_v1, %s3391_s4  ;;  %v4352_v1 = vld [vmem:[%s3436_s19 + $0xc8] ss:$0 sps:$4 sm:$0x11]   ;;  %v1121_v48 = vor.u32 %v1120_v13, %v1116_v49  ;;  %v2884_v13 = vcombine.low %v2724_v9, %v4323_v6 }
  0xdb   : > { %v4296_v30 = vpop.permute.xlu1 %983  ;;  %v1231_v61 = vshll.u32 %v4352_v1, 16  ;;  %v1361_v18 = vrot.slane %v4352_v1, 1 }
  0xdc   : > { %v4305_v58 = vpop.permute.xlu0 %967  ;;  %v1126_v56 = vsel %vm529_vm1, %v1121_v48, %v1125_v41  ;;  %v2755_v48 = vld [vmem:[%s3436_s19 + $0xcc] sm:$0xf] }
  0xdd   : > { %752 = vrot.lane.b32.xlu1 %v721_v14, %s3386_s22  ;;  %v1130_v14 = vshll.u32 %v2844_v2, 16  ;;  %v1233_v38 = vrot.slane %v1231_v61, 1 }
  0xde   : > { %736 = vrot.lane.b32.xlu0 %v625_v23, %s3386_s22  ;;  %v1217_v23 = vor.u32 %v1216_v5, %v1212_v39  ;;  %v2875_v39 = vcombine.low %v2715_v53, %v4309_v16  ;;  %v2753_v5 = vld [vmem:[%s3436_s19 + $0xc0] sm:$0xf]  ;;  %v1334_v16 = vrot.slane %v4339_v22, 1  ;;  %v4408_v22 = vld [vmem:[%s3436_s19 + $0xd0] sm:$0xf] }
  0xdf   : > { %v4316_v27 = vpop.permute.xlu1 %985  ;;  %v1132_v25 = vrot.slane %v1130_v14, 1  ;;  %v2737_v14 = vld [vmem:[%s3436_s19 + $0x60] sm:$0xf] }
  0xe0   : > { %v4325_v40 = vpop.permute.xlu0 %969  ;;  %v1222_v47 = vsel %vm529_vm1, %v1217_v23, %v1221_v33  ;;  %v4395_v33 = vld [vmem:[%s3436_s19 + $0x64] sm:$0xf]  ;;  %v1333_v41 = vrot.slane %v2875_v39, 1  ;;  %v4430_v39 = vld [vmem:[%s3436_s19 + $0x68] ss:$0 sps:$4 sm:$0x11]  }
  0xe1   : > { %879 = vrot.lane.b32.xlu1 %v847_v36, %s3385_s21  ;;  %v1128_v36 = vshrl.u32 %v2844_v2, 16  ;;  %v2891_v6 = vcombine.low %v2737_v14, %v4395_v33  ;;  %v1635_v14 = vshll.u32 %v4430_v39, 16 }
  0xe2   : > { %863 = vrot.lane.b32.xlu0 %v823_v12, %s3385_s21  ;;  %v2723_v12 = vld [vmem:[%s3436_s19 + $0xb4] sm:$0xe]  ;;  %v1335_v53 = vsel %vm802_vm0, %v1333_v41, %v1334_v16  ;;  %v1929_v41 = vsel %vm1907_vm3, %v3624_v51, %v4195_v24 }
  0xe3   : > { %v4341_v63 = vpop.permute.xlu1 %1255  ;;  %v2883_v52 = vcombine.low %v2723_v12, %v4303_v62  ;;  %v1358_v62 = vrot.slane %v4333_v4, 1  ;;  %v1630_v9 = vshll.u32 %v2891_v6, 16 }
  0xe4   : > { %v4345_v43 = vpop.permute.xlu0 %1239 }
  0xe5   : > { %881 = vrot.lane.b32.xlu1 %v850_v26, %s3385_s21  ;;  %v1357_v49 = vrot.slane %v2883_v52, 1 }
  0xe6   : > { %865 = vrot.lane.b32.xlu0 %v826_v29, %s3385_s21  ;;  %v1133_v29 = vor.u32 %v1132_v25, %v1128_v36  ;;  %v4411_v36 = vld [vmem:[%s3436_s19 + $0xc8] ss:$0 sps:$4 sm:$0x11]   ;;  %v1360_v25 = vrot.slane %v2884_v13, 1 }
  0xe7   : > { %v4354_v21 = vpop.permute.xlu1 %1257  ;;  %v1731_v1 = vshll.u32 %v4411_v36, 16 }
  0xe8   : > { %v4359_v45 = vpop.permute.xlu0 %1241  ;;  %v1138_v23 = vsel %vm529_vm1, %v1133_v29, %v1137_v8  ;;  %v4424_v29 = vcombine.low %v2755_v48, %v4408_v22  ;;  %v4427_v8 = vld [vmem:[%s3436_s19 + $0x70] sm:$0xf]  ;;  %v1628_v48 = vshrl.u32 %v2891_v6, 16 }
  0xe9   : > { %991 = vrot.lane.b32.xlu1 %v2851_v10, %s3384_s20 }
  0xea   : > { %975 = vrot.lane.b32.xlu0 %v2843_v31, %s3384_s20  ;;  %v1229_v31 = vor.u32 %v1228_v19, %v1224_v7  ;;  %v2899_v19 = vcombine.low %v2753_v5, %v4385_v37 }
  0xeb   : > { %v4364_v55 = vpop.permute.xlu1 %1383 }
  0xec   : > { %v4368_v10 = vpop.permute.xlu0 %1367  ;;  %v1234_v57 = vsel %vm529_vm1, %v1229_v31, %v1233_v38  ;;  %v1337_v31 = vrot.slane %v4357_v35, 1  ;;  %v2739_v38 = vld [vmem:[%s3436_s19 + $0x6c] sm:$0xf]  ;;  %v1726_v52 = vshll.u32 %v2899_v19, 16  ;;  %v1362_v35 = vsel %vm802_vm0, %v1360_v25, %v1361_v18 }
  0xed   : > { %993 = vrot.lane.b32.xlu1 %v2852_v42, %s3384_s20  ;;  %v1913_v25 = vsel %vm1907_vm3, %v3627_v54, %v4207_v11  ;;  %v1962_v18 = vsel %vm1940_vm4, %v1929_v41, %v4270_v20 }
  0xee   : > { %977 = vrot.lane.b32.xlu0 %v2844_v2, %s3384_s20  ;;  %v2716_v2 = vld [vmem:[%s3436_s19 + $0x60] sm:$0xe]  ;;  %v1728_v16 = vrot.slane %v1726_v52, 1  ;;  %v1946_v51 = vsel %vm1940_vm4, %v1913_v25, %v4276_v59  ;;  %v1995_v24 = vsel %vm1973_vm5, %v1962_v18, %v4296_v30 }
  0xef   : > { %v4375_v26 = vpop.permute.xlu1 %1385  ;;  %v2876_v4 = vcombine.low %v2716_v2, %v4329_v17  ;;  %v1359_v17 = vsel %vm802_vm0, %v1357_v49, %v1358_v62  ;;  %v4437_v2 = vld [vmem:[%s3436_s19 + $0xd4] ss:$0 sps:$4 sm:$0x11]   ;;  %v1724_v49 = vshrl.u32 %v2899_v19, 16  ;;  %v1979_v20 = vsel %vm1973_vm5, %v1946_v51, %v4305_v58  ;;  %v2787_v58 = vld [vmem:[%s3436_s19 + $0xc0] sm:$0xe] }
  0xf0   : > { %v4380_v42 = vpop.permute.xlu0 %1369  ;;  %v2028_v52 = vsel %vm2006_vm6, %v1995_v24, %v4341_v63  ;;  %v2012_v59 = vsel %vm2006_vm6, %v1979_v20, %v4345_v43  ;;  %v2780_v24 = vld [vmem:[%s3436_s19 + $0x6c] sm:$0xe] }
  0xf1   : > { %1263 = vrot.lane.b32.xlu1 %v1222_v47, %s3387_s23  ;;  %v1336_v47 = vrot.slane %v2876_v4, 1  ;;  %v1733_v4 = vrot.slane %v1731_v1, 1  ;;  %v1729_v54 = vor.u32 %v1728_v16, %v1724_v49  ;;  %v2061_v30 = vsel %vm2039_vm7, %v2028_v52, %v4364_v55 }
  0xf2   : > { %1247 = vrot.lane.b32.xlu0 %v1126_v56, %s3387_s23  ;;  %v2045_v63 = vsel %vm2039_vm7, %v2012_v59, %v4368_v10 }
  0xf3   : > { %v4397_v7 = vpop.permute.xlu1 %1495  ;;  %v1338_v62 = vsel %vm802_vm0, %v1336_v47, %v1337_v31  ;;  %v1743_v47 = vshll.u32 %v4437_v2, 16  ;;  %v4458_v31 = vld [vmem:[%s3436_s19 + $0x74] ss:$0 sps:$4 sm:$0x11]   ;;  %v1734_v41 = vsel %vm529_vm1, %v1729_v54, %v1733_v4  ;;  %v1915_v4 = vsel %vm1907_vm3, %v3670_v32, %v4261_v44 }
  0xf4   : > { %v4402_v61 = vpop.permute.xlu0 %1479  ;;  %v2094_v16 = vsel %vm2072_vm8, %v2061_v30, %v4397_v7  ;;  %v1647_v43 = vshll.u32 %v4458_v31, 16 }
  0xf5   : > { %1265 = vrot.lane.b32.xlu1 %v1234_v57, %s3387_s23  ;;  %v4441_v57 = vcombine.low %v2739_v38, %v4427_v8  ;;  %v2078_v55 = vsel %vm2072_vm8, %v2045_v63, %v4402_v61  ;;  %v1931_v61 = vsel %vm1907_vm3, %v3665_v28, %v4254_v3  ;;  %v1948_v3 = vsel %vm1940_vm4, %v1915_v4, %v4288_v60 }
  0xf6   : > { %1249 = vrot.lane.b32.xlu0 %v1138_v23, %s3387_s23  ;;  %v1738_v23 = vshll.u32 %v4424_v29, 16  ;;  %v1649_v44 = vrot.slane %v1647_v43, 1  ;;  %v1870_v60 = vrot.slane %v4411_v36, 1 }
  0xf7   : > { %v4416_v12 = vpop.permute.xlu1 %1497  ;;  %v1642_v11 = vshll.u32 %v4441_v57, 16  ;;  %v1640_v49 = vshrl.u32 %v4441_v57, 16 }
  0xf8   : > { %v4421_v56 = vpop.permute.xlu0 %1481 }
  0xf9   : > { %1391 = vrot.lane.b32.xlu1 %v1359_v17, %s3388_s24  ;;  %v1632_v17 = vrot.slane %v1630_v9, 1  ;;  %v1637_v9 = vrot.slane %v1635_v14, 1  ;;  %v1745_v14 = vrot.slane %v1743_v47, 1  ;;  %v2788_v47 = vld [vmem:[%s3436_s19 + $0xcc] sm:$0xe] }
  0xfa   : > { %1375 = vrot.lane.b32.xlu0 %v1335_v53, %s3388_s24  ;;  %v1736_v53 = vshrl.u32 %v4424_v29, 16  ;;  %v2932_v52 = vcombine.low %v2788_v47, %v4408_v22 }
  0xfb   : > { %v1768_v5 = vpop.permute.xlu1 %1767 }
  0xfc   : > { %v1752_v13 = vpop.permute.xlu0 %1751 }
  0xfd   : > { %1393 = vrot.lane.b32.xlu1 %v1362_v35, %s3388_s24  ;;  %v1740_v35 = vrot.slane %v1738_v23, 1  ;;  %v2111_v10 = vsel %vm2105_vm9, %v2078_v55, %v1752_v13 }
  0xfe   : > { %1377 = vrot.lane.b32.xlu0 %v1338_v62, %s3388_s24  ;;  %v1633_v62 = vor.u32 %v1632_v17, %v1628_v48  ;;  %v1644_v48 = vrot.slane %v1642_v11, 1  ;;  %v2779_v17 = vld [vmem:[%s3436_s19 + $0x60] sm:$0xe] }
  0xff   : > { %v4464_v38 = vpop.permute.xlu1 %1769  ;;  %v1741_v18 = vor.u32 %v1740_v35, %v1736_v53  ;;  %v2923_v28 = vcombine.low %v2779_v17, %v4395_v33  ;;  %v2924_v35 = vcombine.low %v2780_v24, %v4427_v8  ;;  %v1873_v8 = vrot.slane %v4437_v2, 1 }
 0x100   : > { %v4471_v1 = vpop.permute.xlu0 %1753  ;;  %v1638_v13 = vsel %vm529_vm1, %v1633_v62, %v1637_v9  ;;  %v1645_v32 = vor.u32 %v1644_v48, %v1640_v49  ;;  %v1849_v49 = vrot.slane %v4458_v31, 1 }
 0x101   : > { %1503 = vrot.lane.b32.xlu1 %v2899_v19, %s3389_s27  ;;  %v2127_v19 = vsel %vm2105_vm9, %v2094_v16, %v1768_v5  ;;  %v1746_v33 = vsel %vm529_vm1, %v1741_v18, %v1745_v14  ;;  %v1845_v36 = vrot.slane %v2923_v28, 1  ;;  %v1848_v62 = vrot.slane %v2924_v35, 1 }
 0x102   : > { %1487 = vrot.lane.b32.xlu0 %v2891_v6, %s3389_s27  ;;  %v2931_v6 = vcombine.low %v2787_v58, %v4385_v37  ;;  %v1964_v37 = vsel %vm1940_vm4, %v1931_v61, %v4283_v0  ;;  %v1981_v0 = vsel %vm1973_vm5, %v1948_v3, %v4325_v40  ;;  %v1846_v40 = vrot.slane %v4430_v39, 1 }
 0x103   : > { %v1896_v23 = vpop.permute.xlu1 %1895  ;;  %v1650_v39 = vsel %vm529_vm1, %v1645_v32, %v1649_v44  ;;  %v1850_v14 = vsel %vm802_vm0, %v1848_v62, %v1849_v49  ;;  %v4726_v44 = vld [vmem:[#allocation3_spill] sm:$0xff] }
 0x104   : > { %v2160_v25 = vsel %vm2138_vm10, %v2127_v19, %v1896_v23  ;;  %v1880_v7 = vpop.permute.xlu0 %1879  ;;  %v1869_v11 = vrot.slane %v2931_v6, 1 }
 0x105   : > { %v2144_v5 = vsel %vm2138_vm10, %v2111_v10, %v1880_v7  ;;  %1505 = vrot.lane.b32.xlu1 %v4424_v29, %s3389_s27  ;;  %3160 = vmatprep.mubr.msk.bf16.mxu1 %vm2198_vm11, %v2160_v25  ;;  %v1997_v29 = vsel %vm1973_vm5, %v1964_v37, %v4316_v27  ;;  %v2014_v27 = vsel %vm2006_vm6, %v1981_v0, %v4359_v45 }
 0x106   : > { %1489 = vrot.lane.b32.xlu0 %v4441_v57, %s3389_s27  ;;  %3144 = vmatprep.mubr.msk.bf16.mxu0 %vm2198_vm11, %v2144_v5  ;;  %v2030_v57 = vsel %vm2006_vm6, %v1997_v29, %v4354_v21  ;;  %v2047_v21 = vsel %vm2039_vm7, %v2014_v27, %v4380_v42  ;;  %v1871_v22 = vsel %vm802_vm0, %v1869_v11, %v1870_v60  ;;  %v4725_v29 = vld [vmem:[#allocation2_spill] sm:$0xff] }
 0x107   : > { %v4515_v53 = vpop.permute.xlu1 %746  ;;  %v2063_v54 = vsel %vm2039_vm7, %v2030_v57, %v4375_v26  ;;  %v2080_v45 = vsel %vm2072_vm8, %v2047_v21, %v4421_v56  ;;  %v1872_v56 = vrot.slane %v2932_v52, 1 }
 0x108   : > { %v4522_v51 = vpop.permute.xlu0 %730  ;;  %v2096_v20 = vsel %vm2072_vm8, %v2063_v54, %v4416_v12  ;;  %v2113_v42 = vsel %vm2105_vm9, %v2080_v45, %v4471_v1  ;;  %v1847_v1 = vsel %vm802_vm0, %v1845_v36, %v1846_v40  ;;  %v1933_v32 = vsel %vm1907_vm3, %v4725_v29, %v4515_v53 }
 0x109   : > { %1775 = vrot.lane.b32.xlu1 %v1734_v41, %s3390_s30  ;;  %v2129_v26 = vsel %vm2105_vm9, %v2096_v20, %v4464_v38  ;;  %v1874_v63 = vsel %vm802_vm0, %v1872_v56, %v1873_v8  ;;  %v1917_v47 = vsel %vm1907_vm3, %v4726_v44, %v4522_v51 }
 0x10a   : > { %1759 = vrot.lane.b32.xlu0 %v1638_v13, %s3390_s30 }
 0x10b   : > { %v1898_v9 = vpop.permute.xlu1 %1897 }
 0x10c   : > { %v2162_v12 = vsel %vm2138_vm10, %v2129_v26, %v1898_v9  ;;  %v1882_v59 = vpop.permute.xlu0 %1881  ;;  %v4727_v9 = vld [vmem:[#allocation4_spill] sm:$0xff] }
 0x10d   : > { %v2146_v30 = vsel %vm2138_vm10, %v2113_v42, %v1882_v59  ;;  %1777 = vrot.lane.b32.xlu1 %v1746_v33, %s3390_s30  ;;  %3161 = vmatmul.mubr.msk.bf16.gmra.mrb[4].mxu1 %vm2198_vm11, %v2162_v12  ;;  %v4728_v42 = vld [vmem:[#allocation5_spill] sm:$0xff] }
 0x10e   : > { %1761 = vrot.lane.b32.xlu0 %v1650_v39, %s3390_s30  ;;  %3145 = vmatmul.mubr.msk.bf16.gmra.mrb[4].mxu0 %vm2198_vm11, %v2146_v30 }
 0x10f   : > { %v749_v38 = vpop.permute.xlu1 %748 }
 0x110   : > { %v733_v58 = vpop.permute.xlu0 %732  ;;  %v1935_v39 = vsel %vm1907_vm3, %v4727_v9, %v749_v38 }
 0x111   : > { %1903 = vrot.lane.b32.xlu1 %v1871_v22, %s3391_s4  ;;  %v1919_v12 = vsel %vm1907_vm3, %v4728_v42, %v733_v58 }
 0x112   : > { %1887 = vrot.lane.b32.xlu0 %v1847_v1, %s3391_s4 }
 0x113   : > { %v876_v16 = vpop.permute.xlu1 %875 }
 0x114   : > { %v860_v43 = vpop.permute.xlu0 %859  ;;  %v1966_v0 = vsel %vm1940_vm4, %v1933_v32, %v876_v16 }
 0x115   : > { %1905 = vrot.lane.b32.xlu1 %v1874_v63, %s3391_s4  ;;  %v1950_v57 = vsel %vm1940_vm4, %v1917_v47, %v860_v43 }
 0x116   : > { %1889 = vrot.lane.b32.xlu0 %v1850_v14, %s3391_s4 }
 0x117   : > { %v878_v2 = vpop.permute.xlu1 %877 }
 0x118   : > { %v862_v55 = vpop.permute.xlu0 %861  ;;  %v1968_v59 = vsel %vm1940_vm4, %v1935_v39, %v878_v2 }
 0x119   : > { %v1952_v30 = vsel %vm1940_vm4, %v1919_v12, %v862_v55 }
 0x11b   : > { %v988_v19 = vpop.permute.xlu1 %987 }
 0x11c   : > { %v972_v23 = vpop.permute.xlu0 %971  ;;  %v1999_v33 = vsel %vm1973_vm5, %v1966_v0, %v988_v19 }
 0x11d   : > { %v1983_v24 = vsel %vm1973_vm5, %v1950_v57, %v972_v23 }
 0x11f   : > { %v990_v31 = vpop.permute.xlu1 %989 }
 0x120   : > { %v974_v41 = vpop.permute.xlu0 %973  ;;  %v2001_v22 = vsel %vm1973_vm5, %v1968_v59, %v990_v31 }
 0x121   : > { %v1985_v8 = vsel %vm1973_vm5, %v1952_v30, %v974_v41 }
 0x123   : > { %v1260_v48 = vpop.permute.xlu1 %1259 }
 0x124   : > { %v1244_v17 = vpop.permute.xlu0 %1243  ;;  %v2032_v27 = vsel %vm2006_vm6, %v1999_v33, %v1260_v48 }
 0x125   : > { %v2016_v11 = vsel %vm2006_vm6, %v1983_v24, %v1244_v17 }
 0x127   : > { %v1262_v10 = vpop.permute.xlu1 %1261 }
 0x128   : > { %v1246_v25 = vpop.permute.xlu0 %1245  ;;  %v2034_v38 = vsel %vm2006_vm6, %v2001_v22, %v1262_v10 }
 0x129   : > { %v2018_v62 = vsel %vm2006_vm6, %v1985_v8, %v1246_v25 }
 0x12b   : > { %v1388_v7 = vpop.permute.xlu1 %1387 }
 0x12c   : > { %v1372_v18 = vpop.permute.xlu0 %1371  ;;  %v2065_v53 = vsel %vm2039_vm7, %v2032_v27, %v1388_v7 }
 0x12d   : > { %v2049_v40 = vsel %vm2039_vm7, %v2016_v11, %v1372_v18 }
 0x12f   : > { %v1390_v6 = vpop.permute.xlu1 %1389 }
 0x130   : > { %v1374_v61 = vpop.permute.xlu0 %1373  ;;  %v2067_v49 = vsel %vm2039_vm7, %v2034_v38, %v1390_v6 }
 0x131   : > { %v2051_v58 = vsel %vm2039_vm7, %v2018_v62, %v1374_v61 }
 0x133   : > { %v1500_v5 = vpop.permute.xlu1 %1499 }
 0x134   : > { %v1484_v13 = vpop.permute.xlu0 %1483  ;;  %v2098_v51 = vsel %vm2072_vm8, %v2065_v53, %v1500_v5 }
 0x135   : > { %v2082_v21 = vsel %vm2072_vm8, %v2049_v40, %v1484_v13 }
 0x137   : > { %v1502_v4 = vpop.permute.xlu1 %1501 }
 0x138   : > { %v1486_v37 = vpop.permute.xlu0 %1485  ;;  %v2100_v63 = vsel %vm2072_vm8, %v2067_v49, %v1502_v4 }
 0x139   : > { %v2084_v16 = vsel %vm2072_vm8, %v2051_v58, %v1486_v37 }
 0x13b   : > { %v1772_v28 = vpop.permute.xlu1 %1771 }
 0x13c   : > { %v1756_v3 = vpop.permute.xlu0 %1755  ;;  %v2131_v20 = vsel %vm2105_vm9, %v2098_v51, %v1772_v28 }
 0x13d   : > { %v2115_v52 = vsel %vm2105_vm9, %v2082_v21, %v1756_v3 }
 0x13f   : > { %v1774_v60 = vpop.permute.xlu1 %1773 }
 0x140   : > { %v1758_v54 = vpop.permute.xlu0 %1757  ;;  %v2133_v14 = vsel %vm2105_vm9, %v2100_v63, %v1774_v60 }
 0x141   : > { %v2117_v2 = vsel %vm2105_vm9, %v2084_v16, %v1758_v54 }
 0x143   : > { %v1900_v36 = vpop.permute.xlu1 %1899 }
 0x144   : > { %v2164_v45 = vsel %vm2138_vm10, %v2131_v20, %v1900_v36  ;;  %v1884_v26 = vpop.permute.xlu0 %1883 }
 0x145   : > { %v2148_v35 = vsel %vm2138_vm10, %v2115_v52, %v1884_v26  ;;  %3164 = vmatprep.mubr.msk.bf16.mxu1 %vm2198_vm11, %v2164_v45 }
 0x146   : > { %3148 = vmatprep.mubr.msk.bf16.mxu0 %vm2198_vm11, %v2148_v35 }
 0x147   : > { %v751_v56 = vpop.permute.xlu1 %750 }
 0x148   : > { %v735_v1 = vpop.permute.xlu0 %734  ;;  %v1937_v24 = vsel %vm1907_vm3, %v4155_v46, %v751_v56 }
 0x149   : > { %v1921_v27 = vsel %vm1907_vm3, %v4164_v15, %v735_v1 }
 0x14b   : > { %v1902_v43 = vpop.permute.xlu1 %1901 }
 0x14c   : > { %v2166_v55 = vsel %vm2138_vm10, %v2133_v14, %v1902_v43  ;;  %v1886_v19 = vpop.permute.xlu0 %1885 }
 0x14d   : > { %v2150_v23 = vsel %vm2138_vm10, %v2117_v2, %v1886_v19  ;;  %3165 = vmatmul.mubr.msk.bf16.gmra.mrb[8].mxu1 %vm2198_vm11, %v2166_v55  ;;  %v4648_v19 = vld [vmem:[%s4715_s2] ss:$0 sm:$0xff] }
 0x14e   : > { %3149 = vmatmul.mubr.msk.bf16.gmra.mrb[8].mxu0 %vm2198_vm11, %v2150_v23 }
 0x14f   : > { %v753_v31 = vpop.permute.xlu1 %752 }
 0x150   : > { %v737_v41 = vpop.permute.xlu0 %736  ;;  %v1939_v36 = vsel %vm1907_vm3, %v4230_v50, %v753_v31 }
 0x151   : > { %v1923_v15 = vsel %vm1907_vm3, %v4237_v34, %v737_v41 }
 0x153   : > { %v880_v48 = vpop.permute.xlu1 %879 }
 0x154   : > { %v864_v17 = vpop.permute.xlu0 %863  ;;  %v1970_v54 = vsel %vm1940_vm4, %v1937_v24, %v880_v48 }
 0x155   : > { %v1954_v11 = vsel %vm1940_vm4, %v1921_v27, %v864_v17 }
 0x157   : > { %v882_v10 = vpop.permute.xlu1 %881 }
 0x158   : > { %v866_v25 = vpop.permute.xlu0 %865  ;;  %v1972_v45 = vsel %vm1940_vm4, %v1939_v36, %v882_v10 }
 0x159   : > { %v1956_v39 = vsel %vm1940_vm4, %v1923_v15, %v866_v25 }
 0x15b   : > { %v992_v7 = vpop.permute.xlu1 %991 }
 0x15c   : > { %v976_v18 = vpop.permute.xlu0 %975  ;;  %v2003_v53 = vsel %vm1973_vm5, %v1970_v54, %v992_v7 }
 0x15d   : > { %v1987_v51 = vsel %vm1973_vm5, %v1954_v11, %v976_v18 }
 0x15f   : > { %v994_v6 = vpop.permute.xlu1 %993 }
 0x160   : > { %v978_v61 = vpop.permute.xlu0 %977  ;;  %v2005_v35 = vsel %vm1973_vm5, %v1972_v45, %v994_v6 }
 0x161   : > { %v1989_v59 = vsel %vm1973_vm5, %v1956_v39, %v978_v61 }
 0x163   : > { %v1264_v5 = vpop.permute.xlu1 %1263 }
 0x164   : > { %v1248_v13 = vpop.permute.xlu0 %1247  ;;  %v2036_v21 = vsel %vm2006_vm6, %v2003_v53, %v1264_v5 }
 0x165   : > { %v2020_v46 = vsel %vm2006_vm6, %v1987_v51, %v1248_v13 }
 0x167   : > { %v1266_v4 = vpop.permute.xlu1 %1265 }
 0x168   : > { %v1250_v37 = vpop.permute.xlu0 %1249  ;;  %v2038_v30 = vsel %vm2006_vm6, %v2005_v35, %v1266_v4 }
 0x169   : > { %v2022_v8 = vsel %vm2006_vm6, %v1989_v59, %v1250_v37 }
 0x16b   : > { %v1392_v28 = vpop.permute.xlu1 %1391 }
 0x16c   : > { %v1376_v3 = vpop.permute.xlu0 %1375  ;;  %v2069_v52 = vsel %vm2039_vm7, %v2036_v21, %v1392_v28 }
 0x16d   : > { %v2053_v26 = vsel %vm2039_vm7, %v2020_v46, %v1376_v3 }
 0x16f   : > { %v1394_v29 = vpop.permute.xlu1 %1393 }
 0x170   : > { %v1378_v32 = vpop.permute.xlu0 %1377  ;;  %v2071_v38 = vsel %vm2039_vm7, %v2038_v30, %v1394_v29 }
 0x171   : > { %v2055_v62 = vsel %vm2039_vm7, %v2022_v8, %v1378_v32 }
 0x173   : > { %v1504_v44 = vpop.permute.xlu1 %1503 }
 0x174   : > { %v1488_v47 = vpop.permute.xlu0 %1487  ;;  %v2102_v9 = vsel %vm2072_vm8, %v2069_v52, %v1504_v44 }
 0x175   : > { %v2086_v42 = vsel %vm2072_vm8, %v2053_v26, %v1488_v47 }
 0x177   : > { %v1506_v0 = vpop.permute.xlu1 %1505 }
 0x178   : > { %v1490_v57 = vpop.permute.xlu0 %1489  ;;  %v2104_v49 = vsel %vm2072_vm8, %v2071_v38, %v1506_v0 }
 0x179   : > { %v2088_v58 = vsel %vm2072_vm8, %v2055_v62, %v1490_v57 }
 0x17b   : > { %v1776_v33 = vpop.permute.xlu1 %1775 }
 0x17c   : > { %v1760_v60 = vpop.permute.xlu0 %1759  ;;  %v2135_v50 = vsel %vm2105_vm9, %v2102_v9, %v1776_v33 }
 0x17d   : > { %v2119_v34 = vsel %vm2105_vm9, %v2086_v42, %v1760_v60 }
 0x17f   : > { %v1778_v40 = vpop.permute.xlu1 %1777 }
 0x180   : > { %v1762_v20 = vpop.permute.xlu0 %1761  ;;  %v2137_v63 = vsel %vm2105_vm9, %v2104_v49, %v1778_v40 }
 0x181   : > { %v2121_v14 = vsel %vm2105_vm9, %v2088_v58, %v1762_v20 }
 0x183   : > { %v1904_v12 = vpop.permute.xlu1 %1903 }
 0x184   : > { %v2168_v22 = vsel %vm2138_vm10, %v2135_v50, %v1904_v12  ;;  %v1888_v56 = vpop.permute.xlu0 %1887 }
 0x185   : > { %v2152_v1 = vsel %vm2138_vm10, %v2119_v34, %v1888_v56  ;;  %3168 = vmatprep.mubr.msk.bf16.mxu1 %vm2198_vm11, %v2168_v22 }
 0x186   : > { %3152 = vmatprep.mubr.msk.bf16.mxu0 %vm2198_vm11, %v2152_v1 }
 0x187   : > { %v1906_v16 = vpop.permute.xlu1 %1905 }
 0x188   : > { %v2170_v43 = vsel %vm2138_vm10, %v2137_v63, %v1906_v16  ;;  %v1890_v2 = vpop.permute.xlu0 %1889 }
 0x189   : > { %v2154_v55 = vsel %vm2138_vm10, %v2121_v14, %v1890_v2  ;;  %3169 = vmatmul.mubr.msk.bf16.gmra.mrb[12].mxu1 %vm2198_vm11, %v2170_v43 }
 0x18a   : > { %3153 = vmatmul.mubr.msk.bf16.gmra.mrb[12].mxu0 %vm2198_vm11, %v2154_v55 }
 0x1a0   : > { %v3158_v23 = vpop.f32.mrb[0].mxu1 }
 0x1a1   : > { %v3142_v31 = vpop.f32.mrb[0].mxu0  ;;  %v2333_v41 = vpop.f32.mrb[1].mxu1  ;;  %v2342_v10 = vadd.f32 %v3158_v23, %v4648_v19 }
 0x1a2   : > { %v2269_v48 = vpop.f32.mrb[1].mxu0  ;;  %v3159_v17 = vpop.f32.mrb[2].mxu1  ;;  %v2278_v6 = vadd.f32 %v3142_v31, %v4648_v19  ;;  %v2334_v61 = vadd.f32 %v4648_v19, %v2333_v41 }
 0x1a3   : > { %v3143_v25 = vpop.f32.mrb[2].mxu0  ;;  %v2345_v7 = vadd.f32 %v3159_v17, %v4648_v19  ;;  %v2336_v18 = vpop.f32.mrb[3].mxu1  ;;  %v2270_v37 = vadd.f32 %v4648_v19, %v2269_v48 }
 0x1a4   : > { %v2281_v5 = vadd.f32 %v3143_v25, %v4648_v19  ;;  %v2272_v13 = vpop.f32.mrb[3].mxu0  ;;  %v2337_v4 = vadd.f32 %v4648_v19, %v2336_v18 }
 0x1a5   : > { %v3068_v28 = vpack.c.bf16 %v2345_v7, %v2342_v10  ;;  %v2273_v3 = vadd.f32 %v4648_v19, %v2272_v13 }
 0x1a6   : > { %v3028_v29 = vpack.c.bf16 %v2281_v5, %v2278_v6  ;;  %v3063_v32 = vpack.c.bf16 %v2337_v4, %v2334_v61 }
 0x1a7   : > { %3108 = vst [vmem:[%s4658_s16 + $0x48] sm:$0xff] %v3068_v28   ;;  %v3023_v44 = vpack.c.bf16 %v2273_v3, %v2270_v37 }
 0x1a8   : > { %3100 = vst [vmem:[%s4658_s16 + $0x8] sm:$0xff] %v3028_v29   ;;  %3107 = vst [vmem:[%s4658_s16 + $0x40] sm:$0xff] %v3063_v32  }
 0x1a9   : > { %3024 = vst [vmem:[%s4658_s16] sm:$0xff] %v3023_v44  }
 0x1e0   : > { %v3162_v47 = vpop.f32.mrb[4].mxu1 }
 0x1e1   : > { %v3146_v0 = vpop.f32.mrb[4].mxu0  ;;  %v2349_v57 = vpop.f32.mrb[5].mxu1  ;;  %v2358_v24 = vadd.f32 %v3162_v47, %v4648_v19 }
 0x1e2   : > { %v2285_v33 = vpop.f32.mrb[5].mxu0  ;;  %v3163_v60 = vpop.f32.mrb[6].mxu1  ;;  %v2294_v53 = vadd.f32 %v3146_v0, %v4648_v19  ;;  %v2350_v40 = vadd.f32 %v4648_v19, %v2349_v57 }
 0x1e3   : > { %v3147_v27 = vpop.f32.mrb[6].mxu0  ;;  %v2361_v54 = vadd.f32 %v3163_v60, %v4648_v19  ;;  %v2352_v11 = vpop.f32.mrb[7].mxu1  ;;  %v2286_v36 = vadd.f32 %v4648_v19, %v2285_v33 }
 0x1e4   : > { %v2297_v51 = vadd.f32 %v3147_v27, %v4648_v19  ;;  %v2288_v21 = vpop.f32.mrb[7].mxu0  ;;  %v2353_v20 = vadd.f32 %v4648_v19, %v2352_v11 }
 0x1e5   : > { %v3078_v46 = vpack.c.bf16 %v2361_v54, %v2358_v24  ;;  %v2289_v52 = vadd.f32 %v4648_v19, %v2288_v21 }
 0x1e6   : > { %v3038_v15 = vpack.c.bf16 %v2297_v51, %v2294_v53  ;;  %v3073_v45 = vpack.c.bf16 %v2353_v20, %v2350_v40 }
 0x1e7   : > { %3110 = vst [vmem:[%s4658_s16 + $0x58] sm:$0xff] %v3078_v46   ;;  %v3033_v26 = vpack.c.bf16 %v2289_v52, %v2286_v36 }
 0x1e8   : > { %3102 = vst [vmem:[%s4658_s16 + $0x18] sm:$0xff] %v3038_v15   ;;  %3109 = vst [vmem:[%s4658_s16 + $0x50] sm:$0xff] %v3073_v45  }
 0x1e9   : > { %3101 = vst [vmem:[%s4658_s16 + $0x10] sm:$0xff] %v3033_v26  }
 0x220   : > { %v3166_v9 = vpop.f32.mrb[8].mxu1 }
 0x221   : > { %v3150_v39 = vpop.f32.mrb[8].mxu0  ;;  %v2365_v35 = vpop.f32.mrb[9].mxu1  ;;  %v2374_v12 = vadd.f32 %v3166_v9, %v4648_v19 }
 0x222   : > { %v2301_v42 = vpop.f32.mrb[9].mxu0  ;;  %v3167_v50 = vpop.f32.mrb[10].mxu1  ;;  %v2310_v22 = vadd.f32 %v3150_v39, %v4648_v19  ;;  %v2366_v56 = vadd.f32 %v4648_v19, %v2365_v35 }
 0x223   : > { %v3151_v59 = vpop.f32.mrb[10].mxu0  ;;  %v2377_v30 = vadd.f32 %v3167_v50, %v4648_v19  ;;  %v2368_v34 = vpop.f32.mrb[11].mxu1  ;;  %v2302_v62 = vadd.f32 %v4648_v19, %v2301_v42 }
 0x224   : > { %v2313_v8 = vadd.f32 %v3151_v59, %v4648_v19  ;;  %v2304_v38 = vpop.f32.mrb[11].mxu0  ;;  %v2369_v1 = vadd.f32 %v4648_v19, %v2368_v34 }
 0x225   : > { %v3088_v49 = vpack.c.bf16 %v2377_v30, %v2374_v12  ;;  %v2305_v58 = vadd.f32 %v4648_v19, %v2304_v38 }
 0x226   : > { %v3048_v63 = vpack.c.bf16 %v2313_v8, %v2310_v22  ;;  %v3083_v16 = vpack.c.bf16 %v2369_v1, %v2366_v56 }
 0x227   : > { %3112 = vst [vmem:[%s4658_s16 + $0x68] sm:$0xff] %v3088_v49   ;;  %v3043_v14 = vpack.c.bf16 %v2305_v58, %v2302_v62 }
 0x228   : > { %3104 = vst [vmem:[%s4658_s16 + $0x28] sm:$0xff] %v3048_v63   ;;  %3111 = vst [vmem:[%s4658_s16 + $0x60] sm:$0xff] %v3083_v16  }
 0x229   : > { %3103 = vst [vmem:[%s4658_s16 + $0x20] sm:$0xff] %v3043_v14  }
 0x25c   : > { %v3170_v43 = vpop.f32.mrb[12].mxu1 }
 0x25d   : > { %v3154_v2 = vpop.f32.mrb[12].mxu0  ;;  %v2381_v55 = vpop.f32.mrb[13].mxu1  ;;  %v2390_v41 = vadd.f32 %v3170_v43, %v4648_v19 }
 0x25e   : > { %v2317_v23 = vpop.f32.mrb[13].mxu0  ;;  %v3171_v31 = vpop.f32.mrb[14].mxu1  ;;  %v2326_v25 = vadd.f32 %v3154_v2, %v4648_v19  ;;  %v2382_v7 = vadd.f32 %v4648_v19, %v2381_v55 }
 0x25f   : > { %v3155_v48 = vpop.f32.mrb[14].mxu0  ;;  %v2393_v17 = vadd.f32 %v3171_v31, %v4648_v19  ;;  %v2384_v10 = vpop.f32.mrb[15].mxu1  ;;  %v2318_v5 = vadd.f32 %v4648_v19, %v2317_v23 }
 0x260   : > { %v2329_v18 = vadd.f32 %v3155_v48, %v4648_v19  ;;  %v2320_v6 = vpop.f32.mrb[15].mxu0  ;;  %v2385_v61 = vadd.f32 %v4648_v19, %v2384_v10 }
 0x261   : > { %v3098_v13 = vpack.c.bf16 %v2393_v17, %v2390_v41  ;;  %v2321_v4 = vadd.f32 %v4648_v19, %v2320_v6 }
 0x262   : > { %v3058_v37 = vpack.c.bf16 %v2329_v18, %v2326_v25  ;;  %v3093_v28 = vpack.c.bf16 %v2385_v61, %v2382_v7 }
 0x263   : > { %3114 = vst [vmem:[%s4658_s16 + $0x78] sm:$0xff] %v3098_v13   ;;  %v3053_v3 = vpack.c.bf16 %v2321_v4, %v2318_v5 }
 0x264   : > { %3106 = vst [vmem:[%s4658_s16 + $0x38] sm:$0xff] %v3058_v37   ;;  %3113 = vst [vmem:[%s4658_s16 + $0x70] sm:$0xff] %v3093_v28  }
 0x265   : > { %3105 = vst [vmem:[%s4658_s16 + $0x30] sm:$0xff] %v3053_v3  }
 0x266 PF: > { %s13_s14 = sadd.s32 1, %s3382_s14   ;;  %s4729_s12 = smov %s3378_s13 }
 0x267   : > { %p10_p5 = scmp.ge.s32.totalorder %s13_s14, 4   ;;  %s4730_s13 = smov %s4732_s15 }
 0x269   :  { %12 = sbr.rel (!%p10_p5) target bundleno = 2 (0x2), region = 65 }

// kernel: basic_conv2d.1
= control target key start
LH: loop header
LB: loop body
LE: loop exit
PB: predicated region body
PF: predicated region fallthrough
CT: control target
= control target key end

     0   :  { %s3412_s12 = smov 0   ;;  %s3414_s13 = smov 0   ;;  %s4713_s0 = inlined_call_operand.vmem [shape: bf16[2,18,18,4], index: 0, kind: input, shape index: {}]   ;;  %s4714_s1 = inlined_call_operand.vmem [shape: bf16[36,128], index: 1, kind: input, shape index: {}]   ;;  %s4715_s2 = inlined_call_operand.vmem [shape: f32[1,128], index: 2, kind: input, shape index: {}]   ;;  %s4716_s3 = inlined_call_operand.vmem [shape: bf16[2,16,16,128], index: 3, kind: output, shape index: {}]  }
   0x1   :  { %s3416_s14 = smov 0  }
   0x2 LB: > { %s25_s15 = sadd.s32 1, %s3378_s13  ;;  %p2657_p0 = scmp.ge.s32.totalorder %s3382_s14, 1  ;;  %s3382_s14 = sphi %s3416_s14, %s13_s14   ;;  %s3378_s13 = sphi %s3414_s13, %s4730_s13   ;;  %s3374_s12 = sphi %s3412_s12, %s4729_s12  }
   0x3   : > { %p27_p1 = scmp.ge.s32.totalorder %s25_s15, 2  ;;  %p151_p2 = scmp.lt.s32.totalorder %s3382_s14, 3 }
   0x5   : > { %s4732_s15 = smov (%p27_p1, %s25_s15), 0  ;;  %p152_p3 = pnand %p2657_p0, %p151_p2 }
   0x7   : > { %155 = sbr.rel (%p152_p3) target bundleno = 614 (0x266), region = 32 }
   0xe   : > { %p180_p4 = scmp.lt.s32.totalorder %s3374_s12, 1  ;;  %s3384_s20 = smov 12   ;;  %vm802_vm0 = vcmask 1046528   ;;  %vm529_vm1 = vsmask.f32 7424  ;;  %vm2231_vm2 = vcmask 1041408  }
   0xf   : > { %s3385_s21 = smov 8   ;;  %s3386_s22 = smov 4   ;;  %vm1907_vm3 = vcmask 31744   ;;  %vm1940_vm4 = vcmask 64512   ;;  %vm1973_vm5 = vcmask 97280   ;;  %vm2006_vm6 = vcmask 130048  }
  0x10   : > { %s4734_s12 = smov (!%p180_p4, %s3374_s12), 1  ;;  %s3387_s23 = smov 16   ;;  %vm2039_vm7 = vcmask 162816   ;;  %vm2072_vm8 = vcmask 195584   ;;  %vm2105_vm9 = vcmask 228352   ;;  %vm2138_vm10 = vcmask 261120  }
  0x11   : > { %s3180_s16 = smul.u32 216, %s4734_s12  ;;  %s3388_s24 = smov 20   ;;  %vm2198_vm11 = vcmask 293888  }
  0x12   : > { %s3389_s27 = smov 24   ;;  %s3390_s30 = smov 28  }
  0x13   : > { %s3436_s19 = scalar_lea.vmem %s4713_s0, %s3180_s16  ;;  %s3391_s4 = smov 32  }
  0x14   : > { %v2677_v0 = vld [vmem:[%s3436_s19 + $0x6c] sm:$0xf]  ;;  %v3440_v1 = vld [vmem:[%s3436_s19 + $0x70] sm:$0xf]  ;;  %v218_v6 = vld [vmem:[%s3436_s19 + $0x64] sm:$0xf] }
  0x15   : > { %v3443_v2 = vcombine.low %v2677_v0, %v3440_v1  ;;  %v2661_v3 = vld [vmem:[%s3436_s19 + $0xc] sm:$0xf]  ;;  %v3447_v4 = vld [vmem:[%s3436_s19 + $0x10] sm:$0xf]  ;;  %v257_v7 = vld [vmem:[%s3436_s19 + $0x60] sm:$0xe] }
  0x16   : > { %v3450_v5 = vcombine.low %v2661_v3, %v3447_v4  ;;  %v3457_v8 = vld [vmem:[%s3436_s19 + $0x68] ss:$0 sps:$4 sm:$0x11]   ;;  %v2829_v9 = vcombine.low %v257_v7, %v218_v6  ;;  %v217_v10 = vld [vmem:[%s3436_s19 + $0x60] sm:$0xf]  ;;  %s2987_s9 = sshll.u32 %s4734_s12, 7 }
  0x17   : > { %979 = vrot.lane.b32.xlu1 %v3443_v2, %s3384_s20  ;;  %v1142_v11 = vshll.u32 %v3443_v2, 16  ;;  %v202_v12 = vld [vmem:[%s3436_s19 + $0x4] sm:$0xf]  ;;  %v828_v14 = vrot.slane %v3457_v8, 1  ;;  %v249_v15 = vld [vmem:[%s3436_s19] sm:$0xe]  ;;  %v3468_v18 = vcombine.low %v217_v10, %v218_v6  ;;  %s4658_s16 = scalar_lea.vmem %s4716_s3, %s2987_s9 }
  0x18   : > { %963 = vrot.lane.b32.xlu0 %v3450_v5, %s3384_s20  ;;  %v827_v13 = vrot.slane %v2829_v9, 1  ;;  %v201_v16 = vld [vmem:[%s3436_s19] sm:$0xf]  ;;  %v1046_v17 = vshll.u32 %v3450_v5, 16  ;;  %v2821_v20 = vcombine.low %v249_v15, %v202_v12  ;;  %v219_v21 = vld [vmem:[%s3436_s19 + $0x6c] sm:$0xf] }
  0x19   : > { %v3220_v19 = vld [vmem:[%s3436_s19 + $0x8] ss:$0 sps:$4 sm:$0x11]   ;;  %v3473_v23 = vcombine.low %v201_v16, %v202_v12  ;;  %v220_v24 = vld [vmem:[%s3436_s19 + $0x70] sm:$0xf]  ;;  %v627_v30 = vshrl.u32 %v3468_v18, 16 }
  0x1a   : > { %v829_v22 = vsel %vm802_vm0, %v827_v13, %v828_v14  ;;  %v258_v25 = vld [vmem:[%s3436_s19 + $0x6c] sm:$0xe]  ;;  %v803_v26 = vrot.slane %v2821_v20, 1  ;;  %v804_v27 = vrot.slane %v3220_v19, 1  ;;  %v3480_v31 = vcombine.low %v219_v21, %v220_v24  ;;  %v204_v33 = vld [vmem:[%s3436_s19 + $0x10] sm:$0xf] }
  0x1b   : > { %867 = vrot.lane.b32.xlu1 %v829_v22, %s3385_s21  ;;  %v3224_v28 = vld [vmem:[%s3436_s19 + $0x74] ss:$0 sps:$4 sm:$0x11]   ;;  %v2830_v29 = vcombine.low %v258_v25, %v220_v24  ;;  %v203_v32 = vld [vmem:[%s3436_s19 + $0xc] sm:$0xf]  ;;  %v531_v41 = vshrl.u32 %v3473_v23, 16 }
  0x1c   : > { %v805_v34 = vsel %vm802_vm0, %v803_v26, %v804_v27  ;;  %v831_v36 = vrot.slane %v3224_v28, 1  ;;  %v250_v37 = vld [vmem:[%s3436_s19 + $0xc] sm:$0xe]  ;;  %v3486_v38 = vcombine.low %v203_v32, %v204_v33  ;;  %v3227_v39 = vld [vmem:[%s3436_s19 + $0x14] ss:$0 sps:$4 sm:$0x11]  }
  0x1d   : > { %v830_v35 = vrot.slane %v2830_v29, 1  ;;  %851 = vrot.lane.b32.xlu0 %v805_v34, %s3385_s21  ;;  %v2822_v40 = vcombine.low %v250_v37, %v204_v33  ;;  %v533_v42 = vshll.u32 %v3473_v23, 16  ;;  %v538_v43 = vshll.u32 %v3220_v19, 16  ;;  %v2679_v52 = vld [vmem:[%s3436_s19 + $0x78] sm:$0xf] }
  0x1e   : > { %v543_v45 = vshrl.u32 %v3486_v38, 16  ;;  %v545_v46 = vshll.u32 %v3486_v38, 16  ;;  %v639_v47 = vshrl.u32 %v3480_v31, 16  ;;  %v807_v49 = vrot.slane %v3227_v39, 1  ;;  %v3500_v57 = vld [vmem:[%s3436_s19 + $0x7c] sm:$0xf] }
  0x1f   : > { %v832_v44 = vsel %vm802_vm0, %v830_v35, %v831_v36  ;;  %v806_v48 = vrot.slane %v2822_v40, 1  ;;  %v550_v50 = vshll.u32 %v3227_v39, 16  ;;  %v535_v51 = vrot.slane %v533_v42, 1  ;;  %v2663_v62 = vld [vmem:[%s3436_s19 + $0x18] sm:$0xf] }
  0x20   : > { %869 = vrot.lane.b32.xlu1 %v832_v44, %s3385_s21  ;;  %v547_v53 = vrot.slane %v545_v46, 1  ;;  %v540_v54 = vrot.slane %v538_v43, 1  ;;  %v641_v55 = vshll.u32 %v3480_v31, 16  ;;  %v646_v56 = vshll.u32 %v3224_v28, 16  ;;  %v3506_v63 = vld [vmem:[%s3436_s19 + $0x1c] sm:$0xf] }
  0x21   : > { %v808_v58 = vsel %vm802_vm0, %v806_v48, %v807_v49  ;;  %v552_v59 = vrot.slane %v550_v50, 1  ;;  %v536_v60 = vor.u32 %v535_v51, %v531_v41  ;;  %v629_v61 = vshll.u32 %v3468_v18, 16  ;;  %v3513_v13 = vld [vmem:[%s3436_s19 + $0x74] ss:$0 sps:$4 sm:$0x11]  }
  0x22   : > { %853 = vrot.lane.b32.xlu0 %v808_v58, %s3385_s21  ;;  %v548_v0 = vor.u32 %v547_v53, %v543_v45  ;;  %v643_v3 = vrot.slane %v641_v55, 1  ;;  %v648_v6 = vrot.slane %v646_v56, 1  ;;  %v634_v7 = vshll.u32 %v3457_v8, 16  ;;  %v3518_v20 = vld [vmem:[%s3436_s19 + $0x14] ss:$0 sps:$4 sm:$0x11]  }
  0x23   : > { %v541_v9 = vsel %vm529_vm1, %v536_v60, %v540_v54  ;;  %v631_v10 = vrot.slane %v629_v61, 1  ;;  %v2846_v12 = vcombine.low %v2679_v52, %v3500_v57  ;;  %v2838_v19 = vcombine.low %v2663_v62, %v3506_v63  ;;  %v3525_v24 = vld [vmem:[%s3436_s19 + $0x80] ss:$0 sps:$4 sm:$0x11]   ;;  %v2717_v40 = vld [vmem:[%s3436_s19 + $0x6c] sm:$0xe] }
  0x24   : > { %v553_v14 = vsel %vm529_vm1, %v548_v0, %v552_v59  ;;  %v644_v15 = vor.u32 %v643_v3, %v639_v47  ;;  %v636_v16 = vrot.slane %v634_v7, 1  ;;  %v1140_v21 = vshrl.u32 %v3443_v2, 16  ;;  %v2709_v43 = vld [vmem:[%s3436_s19 + $0xc] sm:$0xe]  ;;  %v2718_v49 = vld [vmem:[%s3436_s19 + $0x78] sm:$0xe] }
  0x25   : > { %724 = vrot.lane.b32.xlu1 %v553_v14, %s3386_s22  ;;  %v632_v8 = vor.u32 %v631_v10, %v627_v30  ;;  %v1144_v22 = vrot.slane %v1142_v11, 1  ;;  %v1154_v26 = vshll.u32 %v2846_v12, 16  ;;  %v1147_v27 = vshll.u32 %v3513_v13, 16  ;;  %v3536_v11 = vld [vmem:[%s3436_s19 + $0x20] ss:$0 sps:$4 sm:$0x11]  }
  0x26   : > { %722 = vrot.lane.b32.xlu0 %v541_v9, %s3386_s22  ;;  %v649_v25 = vsel %vm529_vm1, %v644_v15, %v648_v6  ;;  %v1044_v28 = vshrl.u32 %v3450_v5, 16  ;;  %v1058_v30 = vshll.u32 %v2838_v19, 16  ;;  %v1048_v32 = vrot.slane %v1046_v17, 1  ;;  %v2710_v53 = vld [vmem:[%s3436_s19 + $0x18] sm:$0xe] }
  0x27   : > { %v637_v29 = vsel %vm529_vm1, %v632_v8, %v636_v16  ;;  %v1051_v2 = vshll.u32 %v3518_v20, 16  ;;  %v1145_v33 = vor.u32 %v1144_v22, %v1140_v21  ;;  %v1149_v34 = vrot.slane %v1147_v27, 1  ;;  %v2741_v54 = vld [vmem:[%s3436_s19 + $0x78] sm:$0xf]  ;;  %v3563_v60 = vld [vmem:[%s3436_s19 + $0x1c] sm:$0xf] }
  0x28   : > { %v1049_v35 = vor.u32 %v1048_v32, %v1044_v28  ;;  %v1152_v36 = vshrl.u32 %v2846_v12, 16  ;;  %v1156_v37 = vrot.slane %v1154_v26, 1  ;;  %v1159_v39 = vshll.u32 %v3525_v24, 16  ;;  %v2725_v55 = vld [vmem:[%s3436_s19 + $0x18] sm:$0xf] }
  0x29   : > { %740 = vrot.lane.b32.xlu1 %v649_v25, %s3386_s22  ;;  %v1053_v5 = vrot.slane %v1051_v2, 1  ;;  %v1056_v17 = vshrl.u32 %v2838_v19, 16  ;;  %v1060_v41 = vrot.slane %v1058_v30, 1  ;;  %v1063_v42 = vshll.u32 %v3536_v11, 16  ;;  %v2743_v7 = vld [vmem:[%s3436_s19 + $0x84] sm:$0xf] }
  0x2a   : > { %738 = vrot.lane.b32.xlu0 %v637_v29, %s3386_s22  ;;  %v2877_v44 = vcombine.low %v2717_v40, %v3440_v1  ;;  %v1150_v45 = vsel %vm529_vm1, %v1145_v33, %v1149_v34  ;;  %v1157_v46 = vor.u32 %v1156_v37, %v1152_v36  ;;  %v1161_v47 = vrot.slane %v1159_v39, 1  ;;  %v3555_v1 = vld [vmem:[%s3436_s19 + $0x7c] sm:$0xf]  ;;  %v3573_v9 = vld [vmem:[%s3436_s19 + $0x88] sm:$0xf] }
  0x2b   : > { %v2869_v48 = vcombine.low %v2709_v43, %v3447_v4  ;;  %v1054_v50 = vsel %vm529_vm1, %v1049_v35, %v1053_v5  ;;  %v1061_v51 = vor.u32 %v1060_v41, %v1056_v17  ;;  %v1065_v52 = vrot.slane %v1063_v42, 1  ;;  %v3580_v14 = vld [vmem:[%s3436_s19 + $0x28] sm:$0xf]  ;;  %v3586_v21 = vld [vmem:[%s3436_s19 + $0x80] ss:$0 sps:$4 sm:$0x11]  }
  0x2c   : > { %v2878_v56 = vcombine.low %v2718_v49, %v3500_v57  ;;  %v1162_v4 = vsel %vm529_vm1, %v1157_v46, %v1161_v47  ;;  %v1339_v58 = vrot.slane %v2877_v44, 1  ;;  %v1340_v59 = vrot.slane %v3513_v13, 1  ;;  %v2727_v13 = vld [vmem:[%s3436_s19 + $0x24] sm:$0xf]  ;;  %v221_v37 = vld [vmem:[%s3436_s19 + $0x78] sm:$0xf] }
  0x2d   : > { %981 = vrot.lane.b32.xlu1 %v2846_v12, %s3384_s20  ;;  %v2870_v61 = vcombine.low %v2710_v53, %v3506_v63  ;;  %v1066_v62 = vsel %vm529_vm1, %v1061_v51, %v1065_v52  ;;  %v1315_v0 = vrot.slane %v2869_v48, 1  ;;  %v1316_v3 = vrot.slane %v3518_v20, 1  ;;  %v3593_v26 = vld [vmem:[%s3436_s19 + $0x20] ss:$0 sps:$4 sm:$0x11]  }
  0x2e   : > { %965 = vrot.lane.b32.xlu0 %v2838_v19, %s3384_s20  ;;  %v2893_v57 = vcombine.low %v2741_v54, %v3555_v1  ;;  %v2885_v6 = vcombine.low %v2725_v55, %v3563_v60  ;;  %v1341_v10 = vsel %vm802_vm0, %v1339_v58, %v1340_v59  ;;  %v1342_v63 = vrot.slane %v2878_v56, 1  ;;  %v3599_v34 = vld [vmem:[%s3436_s19 + $0x8c] ss:$0 sps:$4 sm:$0x11]   ;;  %v3608_v39 = vld [vmem:[%s3436_s19 + $0x7c] sm:$0xf] }
  0x2f   : > { %v1343_v12 = vrot.slane %v3525_v24, 1  ;;  %v1317_v15 = vsel %vm802_vm0, %v1315_v0, %v1316_v3  ;;  %v1318_v16 = vrot.slane %v2870_v61, 1  ;;  %v1319_v19 = vrot.slane %v3536_v11, 1  ;;  %v3604_v36 = vld [vmem:[%s3436_s19 + $0x2c] ss:$0 sps:$4 sm:$0x11]  }
  0x30   : > { %v1654_v20 = vshll.u32 %v2893_v57, 16  ;;  %v2894_v8 = vcombine.low %v2743_v7, %v3573_v9  ;;  %v1558_v22 = vshll.u32 %v2885_v6, 16  ;;  %v2886_v24 = vcombine.low %v2727_v13, %v3580_v14  ;;  %v205_v40 = vld [vmem:[%s3436_s19 + $0x18] sm:$0xf]  ;;  %v3612_v17 = vld [vmem:[%s3436_s19 + $0x1c] sm:$0xf] }
  0x31   : > { %1251 = vrot.lane.b32.xlu1 %v1150_v45, %s3387_s23  ;;  %v1344_v25 = vsel %vm802_vm0, %v1342_v63, %v1343_v12  ;;  %v1320_v27 = vsel %vm802_vm0, %v1318_v16, %v1319_v19  ;;  %v1652_v29 = vshrl.u32 %v2893_v57, 16  ;;  %v1659_v32 = vshll.u32 %v3586_v21, 16  ;;  %v3309_v41 = vld [vmem:[%s4714_s1] sm:$0xff]   ;;  %v2781_v42 = vld [vmem:[%s3436_s19 + $0x78] sm:$0xe]  ;;  %v3314_v56 = vld [vmem:[%s4714_s1 + $0x8] sm:$0xff]  }
  0x32   : > { %1235 = vrot.lane.b32.xlu0 %v1054_v50, %s3387_s23  ;;  %v1666_v28 = vshll.u32 %v2894_v8, 16  ;;  %v1656_v30 = vrot.slane %v1654_v20, 1  ;;  %v1570_v2 = vshll.u32 %v2886_v24, 16  ;;  %v1556_v11 = vshrl.u32 %v2885_v6, 16  ;;  %v2773_v47 = vld [vmem:[%s3436_s19 + $0x18] sm:$0xe]  ;;  %3134 = vmatprep.subr.bf16.mxu0 %v3309_v41 }
  0x33   : > { %v1560_v33 = vrot.slane %v1558_v22, 1  ;;  %v1563_v35 = vshll.u32 %v3593_v26, 16  ;;  %v1661_v43 = vrot.slane %v1659_v32, 1  ;;  %v1664_v44 = vshrl.u32 %v2894_v8, 16  ;;  %3172 = vmatprep.subr.bf16.mxu1 %v3309_v41  ;;  %3135 = vmatpush3.bf16.msra.mxu0 %v3309_v41  ;;  %v223_v7 = vld [vmem:[%s3436_s19 + $0x84] sm:$0xf] }
  0x34   : > { %v1657_v5 = vor.u32 %v1656_v30, %v1652_v29  ;;  %v1668_v45 = vrot.slane %v1666_v28, 1  ;;  %v1671_v46 = vshll.u32 %v3599_v34, 16  ;;  %v1568_v48 = vshrl.u32 %v2886_v24, 16  ;;  %3175 = vmatpush3.bf16.msra.mxu1 %v3309_v41  ;;  %v3636_v61 = vld [vmem:[%s3436_s19 + $0x80] ss:$0 sps:$4 sm:$0x11]   ;;  %3136 = vmatprep.subr.bf16.mxu0 %v3314_v56 }
  0x35   : > { %1253 = vrot.lane.b32.xlu1 %v1162_v4, %s3387_s23  ;;  %v1572_v49 = vrot.slane %v1570_v2, 1  ;;  %v1575_v50 = vshll.u32 %v3604_v36, 16  ;;  %v3624_v51 = vcombine.low %v221_v37, %v3608_v39  ;;  %v1561_v52 = vor.u32 %v1560_v33, %v1556_v11  ;;  %3173 = vmatprep.subr.bf16.mxu1 %v3314_v56  ;;  %v207_v13 = vld [vmem:[%s3436_s19 + $0x24] sm:$0xf] }
  0x36   : > { %1237 = vrot.lane.b32.xlu0 %v1066_v62, %s3387_s23  ;;  %v1565_v53 = vrot.slane %v1563_v35, 1  ;;  %v3627_v54 = vcombine.low %v205_v40, %v3612_v17  ;;  %v2925_v55 = vcombine.low %v2781_v42, %v3555_v1  ;;  %v2917_v4 = vcombine.low %v2773_v47, %v3563_v60  ;;  %v2782_v16 = vld [vmem:[%s3436_s19 + $0x84] sm:$0xe]  ;;  %v3678_v40 = vld [vmem:[%s3436_s19 + $0x8c] ss:$0 sps:$4 sm:$0x11]  }
  0x37   : > { %v1669_v58 = vor.u32 %v1668_v45, %v1664_v44  ;;  %v1673_v59 = vrot.slane %v1671_v46, 1  ;;  %v1662_v1 = vsel %vm529_vm1, %v1657_v5, %v1661_v43  ;;  %v1573_v62 = vor.u32 %v1572_v49, %v1568_v48  ;;  %3137 = vmatpush3.bf16.msra.mxu0 %v3314_v56 }
  0x38   : > { %v1577_v0 = vrot.slane %v1575_v50, 1  ;;  %v653_v3 = vshll.u32 %v3624_v51, 16  ;;  %v1566_v60 = vsel %vm529_vm1, %v1561_v52, %v1565_v53  ;;  %v1851_v63 = vrot.slane %v2925_v55, 1  ;;  %3176 = vmatpush3.bf16.msra.mxu1 %v3314_v56  ;;  %v259_v53 = vld [vmem:[%s3436_s19 + $0x78] sm:$0xe] }
  0x39   : > { %1379 = vrot.lane.b32.xlu1 %v1341_v10, %s3388_s24  ;;  %v3648_v10 = vld [vmem:[%s3436_s19 + $0x88] sm:$0xf]  ;;  %v1852_v12 = vrot.slane %v3586_v21, 1  ;;  %v1674_v19 = vsel %vm529_vm1, %v1669_v58, %v1673_v59  ;;  %v1827_v20 = vrot.slane %v2917_v4, 1  ;;  %v658_v22 = vshll.u32 %v3636_v61, 16 }
  0x3a   : > { %1363 = vrot.lane.b32.xlu0 %v1317_v15, %s3388_s24  ;;  %v3653_v15 = vld [vmem:[%s3436_s19 + $0x28] sm:$0xf]  ;;  %v1578_v21 = vsel %vm529_vm1, %v1573_v62, %v1577_v0  ;;  %v3665_v28 = vcombine.low %v223_v7, %v3648_v10  ;;  %v555_v29 = vshrl.u32 %v3627_v54, 16  ;;  %v2926_v2 = vcombine.low %v2782_v16, %v3573_v9  ;;  %v3683_v9 = vld [vmem:[%s3436_s19 + $0x2c] ss:$0 sps:$4 sm:$0x11]  }
  0x3b   : > { %v3670_v32 = vcombine.low %v207_v13, %v3653_v15  ;;  %v660_v33 = vrot.slane %v658_v22, 1  ;;  %v1853_v35 = vsel %vm802_vm0, %v1851_v63, %v1852_v12  ;;  %v1855_v45 = vrot.slane %v3599_v34, 1  ;;  %v252_v63 = vld [vmem:[%s3436_s19 + $0x24] sm:$0xe] }
  0x3c   : > { %v665_v5 = vshll.u32 %v3665_v28, 16  ;;  %v1854_v44 = vrot.slane %v2926_v2, 1  ;;  %v1831_v47 = vrot.slane %v3604_v36, 1  ;;  %v663_v49 = vshrl.u32 %v3665_v28, 16  ;;  %v251_v36 = vld [vmem:[%s3436_s19 + $0x18] sm:$0xe] }
  0x3d   : > { %1381 = vrot.lane.b32.xlu1 %v1344_v25, %s3388_s24  ;;  %v651_v25 = vshrl.u32 %v3624_v51, 16  ;;  %v670_v52 = vshll.u32 %v3678_v40, 16  ;;  %v567_v56 = vshrl.u32 %v3670_v32, 16  ;;  %v574_v4 = vshll.u32 %v3683_v9, 16 }
  0x3e   : > { %1365 = vrot.lane.b32.xlu0 %v1320_v27, %s3388_s24  ;;  %v655_v27 = vrot.slane %v653_v3, 1  ;;  %v667_v50 = vrot.slane %v665_v5, 1  ;;  %v1856_v58 = vsel %vm802_vm0, %v1854_v44, %v1855_v45  ;;  %v2831_v62 = vcombine.low %v259_v53, %v3608_v39  ;;  %v260_v3 = vld [vmem:[%s3436_s19 + $0x84] sm:$0xe] }
  0x3f   : > { %v2823_v0 = vcombine.low %v251_v36, %v3612_v17  ;;  %v576_v7 = vrot.slane %v574_v4, 1  ;;  %v834_v12 = vrot.slane %v3636_v61, 1  ;;  %v2832_v16 = vcombine.low %v260_v3, %v3648_v10 }
  0x40   : > { %v656_v37 = vor.u32 %v655_v27, %v651_v25  ;;  %v668_v59 = vor.u32 %v667_v50, %v663_v49  ;;  %v833_v17 = vrot.slane %v2831_v62, 1  ;;  %v2824_v61 = vcombine.low %v252_v63, %v3653_v15  ;;  %v3730_v15 = vld [vmem:[%s3436_s19 + $0x94] sm:$0xf]  ;;  %v2711_v62 = vld [vmem:[%s3436_s19 + $0x24] sm:$0xe] }
  0x41   : > { %1491 = vrot.lane.b32.xlu1 %v2893_v57, %s3389_s27  ;;  %v3642_v57 = vld [vmem:[%s3436_s19 + $0x20] ss:$0 sps:$4 sm:$0x11]   ;;  %v836_v10 = vrot.slane %v2832_v16, 1 }
  0x42   : > { %1475 = vrot.lane.b32.xlu0 %v2885_v6, %s3389_s27  ;;  %v557_v6 = vshll.u32 %v3627_v54, 16  ;;  %v661_v48 = vsel %vm529_vm1, %v656_v37, %v660_v33  ;;  %v810_v13 = vrot.slane %v3642_v57, 1  ;;  %v835_v27 = vsel %vm802_vm0, %v833_v17, %v834_v12  ;;  %v2667_v33 = vld [vmem:[%s3436_s19 + $0x30] sm:$0xf] }
  0x43   : > { %v812_v2 = vrot.slane %v2824_v61, 1  ;;  %v2720_v12 = vld [vmem:[%s3436_s19 + $0x90] sm:$0xe] }
  0x44   : > { %v559_v30 = vrot.slane %v557_v6, 1  ;;  %v2880_v61 = vcombine.low %v2720_v12, %v3730_v15 }
  0x45   : > { %1493 = vrot.lane.b32.xlu1 %v2894_v8, %s3389_s27  ;;  %v1828_v8 = vrot.slane %v3593_v26, 1  ;;  %v562_v26 = vshll.u32 %v3642_v57, 16  ;;  %v2665_v57 = vld [vmem:[%s3436_s19 + $0x24] sm:$0xf] }
  0x46   : > { %1477 = vrot.lane.b32.xlu0 %v2886_v24, %s3389_s27  ;;  %v2774_v24 = vld [vmem:[%s3436_s19 + $0x24] sm:$0xe]  ;;  %v560_v42 = vor.u32 %v559_v30, %v555_v29  ;;  %v2683_v30 = vld [vmem:[%s3436_s19 + $0x90] sm:$0xf] }
  0x47   : > { %v2918_v11 = vcombine.low %v2774_v24, %v3580_v14  ;;  %v1829_v41 = vsel %vm802_vm0, %v1827_v20, %v1828_v8  ;;  %v564_v43 = vrot.slane %v562_v26, 1  ;;  %v569_v14 = vshll.u32 %v3670_v32, 16  ;;  %v2681_v20 = vld [vmem:[%s3436_s19 + $0x84] sm:$0xf]  ;;  %v3714_v8 = vld [vmem:[%s3436_s19 + $0x88] sm:$0xf] }
  0x48   : > { %v3720_v24 = vld [vmem:[%s3436_s19 + $0x28] sm:$0xf]  ;;  %v2847_v25 = vcombine.low %v2681_v20, %v3714_v8 }
  0x49   : > { %1763 = vrot.lane.b32.xlu1 %v1662_v1, %s3390_s30  ;;  %v1830_v46 = vrot.slane %v2918_v11, 1  ;;  %v565_v55 = vsel %vm529_vm1, %v560_v42, %v564_v43  ;;  %v571_v34 = vrot.slane %v569_v14, 1  ;;  %v672_v1 = vrot.slane %v670_v52, 1  ;;  %v3269_v43 = vld [vmem:[%s3436_s19 + $0x8c] ss:$0 sps:$4 sm:$0x11]  }
  0x4a   : > { %1747 = vrot.lane.b32.xlu0 %v1566_v60, %s3390_s30  ;;  %v2839_v29 = vcombine.low %v2665_v57, %v3720_v24  ;;  %v813_v11 = vrot.slane %v3683_v9, 1  ;;  %v1166_v37 = vshll.u32 %v2847_v25, 16  ;;  %v3746_v14 = vld [vmem:[%s3436_s19 + $0x2c] ss:$0 sps:$4 sm:$0x11]   ;;  %v1164_v45 = vshrl.u32 %v2847_v25, 16 }
  0x4b   : > { %v1832_v60 = vsel %vm802_vm0, %v1830_v46, %v1831_v47  ;;  %v572_v6 = vor.u32 %v571_v34, %v567_v56  ;;  %v673_v39 = vsel %vm529_vm1, %v668_v59, %v672_v1  ;;  %v1171_v49 = vshll.u32 %v3269_v43, 16  ;;  %v3751_v52 = vld [vmem:[%s3436_s19 + $0x98] ss:$0 sps:$4 sm:$0x11]   ;;  %v2719_v56 = vld [vmem:[%s3436_s19 + $0x84] sm:$0xe] }
  0x4c   : > { %v814_v9 = vsel %vm802_vm0, %v812_v2, %v813_v11  ;;  %v1168_v46 = vrot.slane %v1166_v37, 1  ;;  %v1068_v47 = vshrl.u32 %v2839_v29, 16  ;;  %v1075_v53 = vshll.u32 %v3746_v14, 16  ;;  %v2745_v57 = vld [vmem:[%s3436_s19 + $0x90] sm:$0xf] }
  0x4d   : > { %1765 = vrot.lane.b32.xlu1 %v1674_v19, %s3390_s30  ;;  %v809_v19 = vrot.slane %v2823_v0, 1  ;;  %v577_v22 = vsel %vm529_vm1, %v572_v6, %v576_v7  ;;  %v1173_v36 = vrot.slane %v1171_v49, 1  ;;  %v1183_v1 = vshll.u32 %v3751_v52, 16  ;;  %v2747_v11 = vld [vmem:[%s3436_s19 + $0x9c] sm:$0xf] }
  0x4e   : > { %1749 = vrot.lane.b32.xlu0 %v1578_v21, %s3390_s30  ;;  %v837_v21 = vrot.slane %v3678_v40, 1  ;;  %v2848_v40 = vcombine.low %v2683_v30, %v3730_v15  ;;  %v1169_v34 = vor.u32 %v1168_v46, %v1164_v45  ;;  %v1077_v0 = vrot.slane %v1075_v53, 1  ;;  %v3784_v15 = vld [vmem:[%s3436_s19 + $0x34] sm:$0xf]  ;;  %v3801_v45 = vld [vmem:[%s3436_s19 + $0x40] sm:$0xf] }
  0x4f   : > { %v811_v26 = vsel %vm802_vm0, %v809_v19, %v810_v13  ;;  %v2879_v7 = vcombine.low %v2719_v56, %v3714_v8  ;;  %v2871_v63 = vcombine.low %v2711_v62, %v3720_v24  ;;  %v3775_v24 = vld [vmem:[%s3436_s19 + $0x94] sm:$0xf]  ;;  %v3804_v46 = vld [vmem:[%s3436_s19 + $0x98] ss:$0 sps:$4 sm:$0x11]  }
  0x50   : > { %v838_v5 = vsel %vm802_vm0, %v836_v10, %v837_v21  ;;  %v1178_v44 = vshll.u32 %v2848_v40, 16  ;;  %v1176_v4 = vshrl.u32 %v2848_v40, 16  ;;  %v1174_v13 = vsel %vm529_vm1, %v1169_v34, %v1173_v36  ;;  %v3810_v49 = vld [vmem:[%s3436_s19 + $0x38] ss:$0 sps:$4 sm:$0x11]  }
  0x51   : > { %1891 = vrot.lane.b32.xlu1 %v1853_v35, %s3391_s4  ;;  %v3736_v35 = vld [vmem:[%s3436_s19 + $0x34] sm:$0xf]  ;;  %v1345_v8 = vrot.slane %v2879_v7, 1  ;;  %v1346_v21 = vrot.slane %v3269_v43, 1  ;;  %v2895_v2 = vcombine.low %v2745_v57, %v3775_v24  ;;  %v1587_v62 = vshll.u32 %v3810_v49, 16 }
  0x52   : > { %1875 = vrot.lane.b32.xlu0 %v1829_v41, %s3391_s4  ;;  %v1070_v41 = vshll.u32 %v2839_v29, 16  ;;  %v2840_v42 = vcombine.low %v2667_v33, %v3736_v35  ;;  %v1180_v59 = vrot.slane %v1178_v44, 1  ;;  %v3789_v33 = vld [vmem:[%s3436_s19 + $0xa0] sm:$0xf] }
  0x53   : > { %v1347_v37 = vsel %vm802_vm0, %v1345_v8, %v1346_v21  ;;  %v1678_v44 = vshll.u32 %v2895_v2, 16  ;;  %v1676_v56 = vshrl.u32 %v2895_v2, 16  ;;  %v1589_v8 = vrot.slane %v1587_v62, 1 }
  0x54   : > { %v1072_v50 = vrot.slane %v1070_v41, 1  ;;  %v1080_v3 = vshrl.u32 %v2840_v42, 16  ;;  %v1181_v16 = vor.u32 %v1180_v59, %v1176_v4  ;;  %v1683_v4 = vshll.u32 %v3804_v46, 16  ;;  %v3821_v59 = vld [vmem:[%s3436_s19 + $0x44] ss:$0 sps:$4 sm:$0x11]  }
  0x55   : > { %742 = vrot.lane.b32.xlu1 %v661_v48, %s3386_s22  ;;  %v1082_v48 = vshll.u32 %v2840_v42, 16  ;;  %v1680_v34 = vrot.slane %v1678_v44, 1  ;;  %v2784_v44 = vld [vmem:[%s3436_s19 + $0x9c] sm:$0xe] }
  0x56   : > { %726 = vrot.lane.b32.xlu0 %v565_v55, %s3386_s22  ;;  %v3755_v55 = vld [vmem:[%s3436_s19 + $0x38] ss:$0 sps:$4 sm:$0x11]  }
  0x57   : > { %v1087_v6 = vshll.u32 %v3755_v55, 16  ;;  %v1325_v43 = vrot.slane %v3755_v55, 1  ;;  %v2783_v55 = vld [vmem:[%s3436_s19 + $0x90] sm:$0xe] }
  0x58   : > { %v2927_v7 = vcombine.low %v2783_v55, %v3775_v24  ;;  %v1834_v55 = vrot.slane %v3810_v49, 1 }
  0x59   : > { %1893 = vrot.lane.b32.xlu1 %v1856_v58, %s3391_s4  ;;  %v1073_v58 = vor.u32 %v1072_v50, %v1068_v47  ;;  %v1089_v20 = vrot.slane %v1087_v6, 1  ;;  %v3319_v6 = vld [vmem:[%s4714_s1 + $0x10] ss:$0 sps:$4 sm:$0x33]  }
  0x5a   : > { %1877 = vrot.lane.b32.xlu0 %v1832_v60, %s3391_s4  ;;  %v1084_v60 = vrot.slane %v1082_v48, 1  ;;  %3178 = vmatprep.subr.msk.bf16.mxu0 %vm2231_vm2, %v3319_v6 }
  0x5b   : > { %v1078_v17 = vsel %vm529_vm1, %v1073_v58, %v1077_v0  ;;  %v3818_v58 = vld [vmem:[%s3436_s19 + $0xa4] ss:$0 sps:$4 sm:$0x11]   ;;  %v225_v0 = vld [vmem:[%s3436_s19 + $0x90] sm:$0xf]  ;;  %3179 = vmatprep.subr.msk.bf16.mxu1 %vm2231_vm2, %v3319_v6 }
  0x5c   : > { %v1085_v19 = vor.u32 %v1084_v60, %v1080_v3  ;;  %v3827_v60 = vld [vmem:[%s3436_s19 + $0x94] sm:$0xf] }
  0x5d   : > { %744 = vrot.lane.b32.xlu1 %v673_v39, %s3386_s22  ;;  %v1185_v39 = vrot.slane %v1183_v1, 1  ;;  %v3842_v57 = vcombine.low %v225_v0, %v3827_v60 }
  0x5e   : > { %728 = vrot.lane.b32.xlu0 %v577_v22, %s3386_s22  ;;  %v2712_v22 = vld [vmem:[%s3436_s19 + $0x30] sm:$0xe]  ;;  %v1090_v30 = vsel %vm529_vm1, %v1085_v19, %v1089_v20  ;;  %v1695_v19 = vshll.u32 %v3818_v58, 16 }
  0x5f   : > { %v1186_v10 = vsel %vm529_vm1, %v1181_v16, %v1185_v39  ;;  %v3835_v16 = vld [vmem:[%s3436_s19 + $0x34] sm:$0xf]  ;;  %v1685_v39 = vrot.slane %v1683_v4, 1  ;;  %v2775_v20 = vld [vmem:[%s3436_s19 + $0x30] sm:$0xe]  ;;  %4721 = vst [vmem:[#allocation2_spill] sm:$0xff] %v3842_v57 }
  0x61   : > { %871 = vrot.lane.b32.xlu1 %v835_v27, %s3385_s21  ;;  %v1322_v27 = vrot.slane %v3746_v14, 1  ;;  %v2731_v14 = vld [vmem:[%s3436_s19 + $0x3c] sm:$0xf] }
  0x62   : > { %855 = vrot.lane.b32.xlu0 %v811_v26, %s3385_s21  ;;  %v2729_v26 = vld [vmem:[%s3436_s19 + $0x30] sm:$0xf]  ;;  %v2888_v53 = vcombine.low %v2731_v14, %v3801_v45  ;;  %v3866_v14 = vld [vmem:[%s3436_s19 + $0xa0] sm:$0xf] }
  0x64   : > { %v1594_v3 = vshll.u32 %v2888_v53, 16 }
  0x65   : > { %873 = vrot.lane.b32.xlu1 %v838_v5, %s3385_s21  ;;  %v2887_v5 = vcombine.low %v2729_v26, %v3784_v15  ;;  %v3851_v26 = vld [vmem:[%s3436_s19 + $0x98] ss:$0 sps:$4 sm:$0x11]  }
  0x66   : > { %857 = vrot.lane.b32.xlu0 %v814_v9, %s3385_s21  ;;  %v2896_v9 = vcombine.low %v2747_v11, %v3789_v33  ;;  %v1596_v24 = vrot.slane %v1594_v3, 1  ;;  %v1857_v11 = vrot.slane %v2927_v7, 1  ;;  %v682_v4 = vshll.u32 %v3851_v26, 16 }
  0x67   : > { %v1582_v48 = vshll.u32 %v2887_v5, 16  ;;  %v1580_v36 = vshrl.u32 %v2887_v5, 16  ;;  %v2928_v7 = vcombine.low %v2784_v44, %v3789_v33 }
  0x68   : > { %v1688_v12 = vshrl.u32 %v2896_v9, 16 }
  0x69   : > { %983 = vrot.lane.b32.xlu1 %v2847_v25, %s3384_s20  ;;  %v1321_v25 = vrot.slane %v2871_v63, 1  ;;  %v1584_v1 = vrot.slane %v1582_v48, 1  ;;  %v1681_v63 = vor.u32 %v1680_v34, %v1676_v56  ;;  %v3871_v48 = vld [vmem:[%s3436_s19 + $0x40] sm:$0xf]  ;;  %v675_v56 = vshrl.u32 %v3842_v57, 16 }
  0x6a   : > { %967 = vrot.lane.b32.xlu0 %v2839_v29, %s3384_s20  ;;  %v2872_v29 = vcombine.low %v2712_v22, %v3736_v35  ;;  %v1348_v35 = vrot.slane %v2880_v61, 1  ;;  %v1592_v61 = vshrl.u32 %v2888_v53, 16 }
  0x6b   : > { %v1323_v41 = vsel %vm802_vm0, %v1321_v25, %v1322_v27  ;;  %v1585_v22 = vor.u32 %v1584_v1, %v1580_v36  ;;  %v2233_v25 = vsel %vm2231_vm2, %v3319_v6, 0  ;;  %v2919_v27 = vcombine.low %v2775_v20, %v3784_v15 }
  0x6c   : > { %3139 = vmatpush3.bf16.msra.mxu0 %v2233_v25  ;;  %3177 = vmatpush3.bf16.msra.mxu1 %v2233_v25  ;;  %v677_v15 = vshll.u32 %v3842_v57, 16  ;;  %v1861_v25 = vrot.slane %v3818_v58, 1 }
  0x6d   : > { %985 = vrot.lane.b32.xlu1 %v2848_v40, %s3384_s20  ;;  %v1349_v40 = vrot.slane %v3751_v52, 1  ;;  %v1690_v52 = vshll.u32 %v2896_v9, 16 }
  0x6e   : > { %969 = vrot.lane.b32.xlu0 %v2840_v42, %s3384_s20  ;;  %v1324_v42 = vrot.slane %v2872_v29, 1  ;;  %v679_v34 = vrot.slane %v677_v15, 1  ;;  %v261_v15 = vld [vmem:[%s3436_s19 + $0x90] sm:$0xe] }
  0x6f   : > { %v1350_v47 = vsel %vm802_vm0, %v1348_v35, %v1349_v40  ;;  %v3858_v35 = vld [vmem:[%s3436_s19 + $0x38] ss:$0 sps:$4 sm:$0x11]   ;;  %v1590_v40 = vsel %vm529_vm1, %v1585_v22, %v1589_v8 }
  0x70   : > { %v1326_v50 = vsel %vm802_vm0, %v1324_v42, %v1325_v43  ;;  %v586_v36 = vshll.u32 %v3858_v35, 16 }
  0x71   : > { %1255 = vrot.lane.b32.xlu1 %v1174_v13, %s3387_s23  ;;  %v209_v13 = vld [vmem:[%s3436_s19 + $0x30] sm:$0xf] }
  0x72   : > { %1239 = vrot.lane.b32.xlu0 %v1078_v17, %s3387_s23  ;;  %v1692_v17 = vrot.slane %v1690_v52, 1  ;;  %v3846_v21 = vcombine.low %v209_v13, %v3835_v16  ;;  %v680_v13 = vor.u32 %v679_v34, %v675_v56 }
  0x74   : > { %4722 = vst [vmem:[#allocation3_spill] sm:$0xff] %v3846_v21  ;;  %v1693_v29 = vor.u32 %v1692_v17, %v1688_v12  ;;  %v581_v43 = vshll.u32 %v3846_v21, 16  ;;  %v579_v0 = vshrl.u32 %v3846_v21, 16  ;;  %v588_v17 = vrot.slane %v586_v36, 1 }
  0x75   : > { %1257 = vrot.lane.b32.xlu1 %v1186_v10, %s3387_s23  ;;  %v1599_v10 = vshll.u32 %v3821_v59, 16 }
  0x76   : > { %1241 = vrot.lane.b32.xlu0 %v1090_v30, %s3387_s23  ;;  %v1697_v30 = vrot.slane %v1695_v19, 1  ;;  %v583_v3 = vrot.slane %v581_v43, 1  ;;  %v3899_v19 = vld [vmem:[%s3436_s19 + $0xa4] ss:$0 sps:$4 sm:$0x11]  }
  0x77   : > { %v1601_v42 = vrot.slane %v1599_v10, 1  ;;  %v1860_v10 = vrot.slane %v2928_v7, 1  ;;  %v253_v43 = vld [vmem:[%s3436_s19 + $0x30] sm:$0xe] }
  0x78   : > { %v1698_v52 = vsel %vm529_vm1, %v1693_v29, %v1697_v30  ;;  %v584_v8 = vor.u32 %v583_v3, %v579_v0  ;;  %v1837_v29 = vrot.slane %v3821_v59, 1  ;;  %v2825_v34 = vcombine.low %v253_v43, %v3835_v16  ;;  %v2685_v3 = vld [vmem:[%s3436_s19 + $0x9c] sm:$0xf] }
  0x79   : > { %1383 = vrot.lane.b32.xlu1 %v1347_v37, %s3388_s24  ;;  %v1858_v37 = vrot.slane %v3804_v46, 1  ;;  %v2776_v46 = vld [vmem:[%s3436_s19 + $0x3c] sm:$0xe]  ;;  %v1862_v44 = vsel %vm802_vm0, %v1860_v10, %v1861_v25  ;;  %v840_v0 = vrot.slane %v3851_v26, 1  ;;  %v2687_v25 = vld [vmem:[%s3436_s19 + $0xa8] sm:$0xf] }
  0x7a   : > { %1367 = vrot.lane.b32.xlu0 %v1323_v41, %s3388_s24  ;;  %v1597_v41 = vor.u32 %v1596_v24, %v1592_v61 }
  0x7b   : > { %v1859_v12 = vsel %vm802_vm0, %v1857_v11, %v1858_v37  ;;  %v694_v37 = vshll.u32 %v3899_v19, 16 }
  0x7c   : > { %v1602_v62 = vsel %vm529_vm1, %v1597_v41, %v1601_v42 }
  0x7d   : > { %1385 = vrot.lane.b32.xlu1 %v1350_v47, %s3388_s24  ;;  %v211_v47 = vld [vmem:[%s3436_s19 + $0x3c] sm:$0xf] }
  0x7e   : > { %1369 = vrot.lane.b32.xlu0 %v1326_v50, %s3388_s24  ;;  %v3889_v49 = vcombine.low %v211_v47, %v3871_v48 }
  0x80   : > { %4724 = vst [vmem:[#allocation5_spill] sm:$0xff] %v3889_v49  ;;  %v593_v61 = vshll.u32 %v3889_v49, 16  ;;  %v591_v41 = vshrl.u32 %v3889_v49, 16 }
  0x81   : > { %1495 = vrot.lane.b32.xlu1 %v2895_v2, %s3389_s27  ;;  %v1686_v2 = vsel %vm529_vm1, %v1681_v63, %v1685_v39  ;;  %v2920_v63 = vcombine.low %v2776_v46, %v3801_v45  ;;  %v684_v39 = vrot.slane %v682_v4, 1  ;;  %v3906_v45 = vld [vmem:[%s3436_s19 + $0x44] ss:$0 sps:$4 sm:$0x11]   ;;  %v696_v46 = vrot.slane %v694_v37, 1 }
  0x82   : > { %1479 = vrot.lane.b32.xlu0 %v2887_v5, %s3389_s27  ;;  %v595_v42 = vrot.slane %v593_v61, 1  ;;  %v598_v58 = vshll.u32 %v3906_v45, 16  ;;  %v262_v4 = vld [vmem:[%s3436_s19 + $0x9c] sm:$0xe] }
  0x83   : > { %v685_v30 = vsel %vm529_vm1, %v680_v13, %v684_v39  ;;  %v815_v39 = vrot.slane %v2825_v34, 1 }
  0x84   : > { %v600_v56 = vrot.slane %v598_v58, 1 }
  0x85   : > { %1497 = vrot.lane.b32.xlu1 %v2896_v9, %s3389_s27  ;;  %v227_v9 = vld [vmem:[%s3436_s19 + $0x9c] sm:$0xf] }
  0x86   : > { %1481 = vrot.lane.b32.xlu0 %v2888_v53, %s3389_s27  ;;  %v1833_v53 = vrot.slane %v2919_v27, 1  ;;  %v3884_v1 = vcombine.low %v227_v9, %v3866_v14  ;;  %v1836_v27 = vrot.slane %v2920_v63, 1  ;;  %v2833_v9 = vcombine.low %v261_v15, %v3827_v60  ;;  %v254_v60 = vld [vmem:[%s3436_s19 + $0x3c] sm:$0xe]  ;;  %v2671_v15 = vld [vmem:[%s3436_s19 + $0x48] sm:$0xf] }
  0x87   : > { %v2834_v63 = vcombine.low %v262_v4, %v3866_v14  ;;  %v2826_v26 = vcombine.low %v254_v60, %v3871_v48 }
  0x88   : > { %4723 = vst [vmem:[#allocation4_spill] sm:$0xff] %v3884_v1  ;;  %v689_v20 = vshll.u32 %v3884_v1, 16  ;;  %v1835_v33 = vsel %vm802_vm0, %v1833_v53, %v1834_v55  ;;  %v1838_v53 = vsel %vm802_vm0, %v1836_v27, %v1837_v29  ;;  %v596_v55 = vor.u32 %v595_v42, %v591_v41  ;;  %v3965_v27 = vld [vmem:[%s3436_s19 + $0xac] sm:$0xf] }
  0x89   : > { %v3861_v5 = vpop.permute.xlu1 %979  ;;  %1767 = vrot.lane.b32.xlu1 %v1686_v2, %s3390_s30  ;;  %v687_v2 = vshrl.u32 %v3884_v1, 16  ;;  %v842_v10 = vrot.slane %v2834_v63, 1  ;;  %v2850_v41 = vcombine.low %v2687_v25, %v3965_v27  ;;  %v3980_v42 = vld [vmem:[%s3436_s19 + $0xa4] ss:$0 sps:$4 sm:$0x11]  }
  0x8a   : > { %v3875_v50 = vpop.permute.xlu0 %963  ;;  %1751 = vrot.lane.b32.xlu0 %v1590_v40, %s3390_s30  ;;  %v691_v11 = vrot.slane %v689_v20, 1  ;;  %v589_v40 = vsel %vm529_vm1, %v584_v8, %v588_v17  ;;  %v601_v13 = vsel %vm529_vm1, %v596_v55, %v600_v56  ;;  %v816_v17 = vrot.slane %v3858_v35, 1  ;;  %v2669_v20 = vld [vmem:[%s3436_s19 + $0x3c] sm:$0xf] }
  0x8b   : > { %v843_v35 = vrot.slane %v3899_v19, 1  ;;  %v1202_v55 = vshll.u32 %v2850_v41, 16  ;;  %v1195_v34 = vshll.u32 %v3980_v42, 16  ;;  %v4003_v63 = vld [vmem:[%s3436_s19 + $0x50] ss:$0 sps:$4 sm:$0x11]  }
  0x8c   : > { %v692_v47 = vor.u32 %v691_v11, %v687_v2  ;;  %v818_v2 = vrot.slane %v2826_v26, 1  ;;  %v819_v11 = vrot.slane %v3906_v45, 1  ;;  %v2721_v26 = vld [vmem:[%s3436_s19 + $0x9c] sm:$0xe] }
  0x8d   : > { %v3891_v6 = vpop.permute.xlu1 %867  ;;  %1769 = vrot.lane.b32.xlu1 %v1698_v52, %s3390_s30  ;;  %v844_v58 = vsel %vm802_vm0, %v842_v10, %v843_v35  ;;  %v1204_v10 = vrot.slane %v1202_v55, 1  ;;  %v2713_v25 = vld [vmem:[%s3436_s19 + $0x3c] sm:$0xe] }
  0x8e   : > { %1753 = vrot.lane.b32.xlu0 %v1602_v62, %s3390_s30  ;;  %v839_v62 = vrot.slane %v2833_v9, 1  ;;  %v697_v7 = vsel %vm529_vm1, %v692_v47, %v696_v46  ;;  %v3985_v9 = vld [vmem:[%s3436_s19 + $0x44] ss:$0 sps:$4 sm:$0x11]  }
  0x8f   : > { %v3902_v22 = vpop.permute.xlu0 %851 }
  0x90   : > { %v841_v61 = vsel %vm802_vm0, %v839_v62, %v840_v0  ;;  %v3997_v62 = vld [vmem:[%s3436_s19 + $0xb0] ss:$0 sps:$4 sm:$0x11]  }
  0x91   : > { %1895 = vrot.lane.b32.xlu1 %v1859_v12, %s3391_s4  ;;  %v3944_v12 = vld [vmem:[%s3436_s19 + $0xa0] sm:$0xf]  ;;  %v1207_v35 = vshll.u32 %v3997_v62, 16 }
  0x92   : > { %v3910_v24 = vpop.permute.xlu1 %869  ;;  %1879 = vrot.lane.b32.xlu0 %v1835_v33, %s3391_s4  ;;  %v3953_v33 = vld [vmem:[%s3436_s19 + $0x40] sm:$0xf]  ;;  %v2849_v14 = vcombine.low %v2685_v3, %v3944_v12 }
  0x93   : > { %v2841_v48 = vcombine.low %v2669_v20, %v3953_v33  ;;  %v1197_v20 = vrot.slane %v1195_v34, 1  ;;  %v1209_v34 = vrot.slane %v1207_v35, 1 }
  0x94   : > { %v3922_v59 = vpop.permute.xlu0 %853  ;;  %v1190_v19 = vshll.u32 %v2849_v14, 16 }
  0x95   : > { %746 = vrot.lane.b32.xlu1 %v685_v30, %s3386_s22  ;;  %v817_v30 = vsel %vm802_vm0, %v815_v39, %v816_v17  ;;  %v1094_v43 = vshll.u32 %v2841_v48, 16  ;;  %v1092_v4 = vshrl.u32 %v2841_v48, 16  ;;  %v1200_v17 = vshrl.u32 %v2850_v41, 16 }
  0x96   : > { %730 = vrot.lane.b32.xlu0 %v589_v40, %s3386_s22  ;;  %v3975_v40 = vld [vmem:[%s3436_s19 + $0x4c] sm:$0xf]  ;;  %v1192_v56 = vrot.slane %v1190_v19, 1 }
  0x97   : > { %v3929_v52 = vpop.permute.xlu1 %724  ;;  %v2842_v47 = vcombine.low %v2671_v15, %v3975_v40  ;;  %v1096_v60 = vrot.slane %v1094_v43, 1  ;;  %v1111_v15 = vshll.u32 %v4003_v63, 16  ;;  %v4019_v43 = vld [vmem:[%s3436_s19 + $0xac] sm:$0xf] }
  0x98   : > { %v3934_v36 = vpop.permute.xlu0 %722 }
  0x99   : > { %1897 = vrot.lane.b32.xlu1 %v1862_v44, %s3391_s4  ;;  %v820_v44 = vsel %vm802_vm0, %v818_v2, %v819_v11  ;;  %v1106_v3 = vshll.u32 %v2842_v47, 16  ;;  %v1104_v11 = vshrl.u32 %v2842_v47, 16 }
  0x9a   : > { %1881 = vrot.lane.b32.xlu0 %v1838_v53, %s3391_s4  ;;  %v1188_v53 = vshrl.u32 %v2849_v14, 16 }
  0x9b   : > { %v3946_v16 = vpop.permute.xlu1 %740 }
  0x9c   : > { %v3955_v8 = vpop.permute.xlu0 %738  ;;  %v1193_v39 = vor.u32 %v1192_v56, %v1188_v53  ;;  %v2722_v53 = vld [vmem:[%s3436_s19 + $0xa8] sm:$0xe]  ;;  %v1205_v56 = vor.u32 %v1204_v10, %v1200_v17  ;;  %v4045_v10 = vld [vmem:[%s3436_s19 + $0xb8] sm:$0xf] }
  0x9d   : > { %748 = vrot.lane.b32.xlu1 %v697_v7, %s3386_s22  ;;  %v1099_v7 = vshll.u32 %v3985_v9, 16  ;;  %v2882_v17 = vcombine.low %v2722_v53, %v3965_v27  ;;  %v4053_v27 = vld [vmem:[%s3436_s19 + $0x58] sm:$0xf] }
  0x9e   : > { %732 = vrot.lane.b32.xlu0 %v601_v13, %s3386_s22  ;;  %v1198_v55 = vsel %vm529_vm1, %v1193_v39, %v1197_v20  ;;  %v4038_v39 = vld [vmem:[%s3436_s19 + $0x4c] sm:$0xf]  ;;  %v1352_v20 = vrot.slane %v3980_v42, 1 }
  0x9f   : > { %v3967_v29 = vpop.permute.xlu1 %981  ;;  %v1101_v2 = vrot.slane %v1099_v7, 1  ;;  %v1113_v7 = vrot.slane %v1111_v15, 1 }
  0xa0   : > { %v3971_v37 = vpop.permute.xlu0 %965 }
  0xa1   : > { %875 = vrot.lane.b32.xlu1 %v841_v61, %s3385_s21  ;;  %v1097_v61 = vor.u32 %v1096_v60, %v1092_v4  ;;  %v2714_v4 = vld [vmem:[%s3436_s19 + $0x48] sm:$0xe] }
  0xa2   : > { %859 = vrot.lane.b32.xlu0 %v817_v30, %s3385_s21  ;;  %v2874_v35 = vcombine.low %v2714_v4, %v3975_v40  ;;  %v4063_v40 = vld [vmem:[%s3436_s19 + $0xb0] ss:$0 sps:$4 sm:$0x11]   ;;  %v1355_v4 = vrot.slane %v3997_v62, 1 }
  0xa3   : > { %v3987_v45 = vpop.permute.xlu1 %1251 }
  0xa4   : > { %v3991_v46 = vpop.permute.xlu0 %1235 }
  0xa5   : > { %877 = vrot.lane.b32.xlu1 %v844_v58, %s3385_s21  ;;  %v2749_v58 = vld [vmem:[%s3436_s19 + $0xa8] sm:$0xf] }
  0xa6   : > { %861 = vrot.lane.b32.xlu0 %v820_v44, %s3385_s21  ;;  %v2873_v44 = vcombine.low %v2713_v25, %v3953_v33  ;;  %v1210_v25 = vsel %vm529_vm1, %v1205_v56, %v1209_v34 }
  0xa7   : > { %v3999_v0 = vpop.permute.xlu1 %1253 }
  0xa8   : > { %v4005_v13 = vpop.permute.xlu0 %1237 }
  0xa9   : > { %987 = vrot.lane.b32.xlu1 %v2849_v14, %s3384_s20  ;;  %v1108_v14 = vrot.slane %v1106_v3, 1  ;;  %v1102_v3 = vsel %vm529_vm1, %v1097_v61, %v1101_v2  ;;  %v2751_v61 = vld [vmem:[%s3436_s19 + $0xb4] sm:$0xf]  ;;  %v1327_v2 = vrot.slane %v2873_v44, 1 }
  0xaa   : > { %971 = vrot.lane.b32.xlu0 %v2841_v48, %s3384_s20  ;;  %v2881_v48 = vcombine.low %v2721_v26, %v3944_v12  ;;  %v4068_v44 = vcombine.low %v2751_v61, %v4045_v10 }
  0xab   : > { %v4012_v30 = vpop.permute.xlu1 %1379  ;;  %v1109_v12 = vor.u32 %v1108_v14, %v1104_v11  ;;  %v1328_v11 = vrot.slane %v3985_v9, 1  ;;  %v2735_v14 = vld [vmem:[%s3436_s19 + $0x54] sm:$0xf] }
  0xac   : > { %v4015_v19 = vpop.permute.xlu0 %1363  ;;  %v1351_v26 = vrot.slane %v2881_v48, 1  ;;  %v4073_v56 = vcombine.low %v2735_v14, %v4053_v27  ;;  %v1714_v62 = vshll.u32 %v4068_v44, 16 }
  0xad   : > { %989 = vrot.lane.b32.xlu1 %v2850_v41, %s3384_s20  ;;  %v4032_v41 = vcombine.low %v2749_v58, %v4019_v43  ;;  %v1114_v58 = vsel %vm529_vm1, %v1109_v12, %v1113_v7  ;;  %v1329_v34 = vsel %vm802_vm0, %v1327_v2, %v1328_v11  ;;  %v1331_v12 = vrot.slane %v4003_v63, 1  ;;  %v4088_v63 = vld [vmem:[%s3436_s19 + $0x50] ss:$0 sps:$4 sm:$0x11]  }
  0xae   : > { %973 = vrot.lane.b32.xlu0 %v2842_v47, %s3384_s20  ;;  %v2733_v47 = vld [vmem:[%s3436_s19 + $0x48] sm:$0xf]  ;;  %v1353_v9 = vsel %vm802_vm0, %v1351_v26, %v1352_v20  ;;  %v1707_v20 = vshll.u32 %v4063_v40, 16  ;;  %v4096_v2 = vld [vmem:[%s3436_s19 + $0xbc] ss:$0 sps:$4 sm:$0x11]   ;;  %v1909_v11 = vsel %vm1907_vm3, %v3473_v23, %v3934_v36 }
  0xaf   : > { %v4028_v60 = vpop.permute.xlu1 %1381  ;;  %v1702_v42 = vshll.u32 %v4032_v41, 16  ;;  %v4060_v48 = vcombine.low %v2733_v47, %v4038_v39 }
  0xb0   : > { %v4034_v33 = vpop.permute.xlu0 %1365  ;;  %v1709_v1 = vrot.slane %v1707_v20, 1 }
  0xb1   : > { %1259 = vrot.lane.b32.xlu1 %v1198_v55, %s3387_s23  ;;  %v1354_v55 = vrot.slane %v2882_v17, 1  ;;  %v1606_v47 = vshll.u32 %v4060_v48, 16  ;;  %v1700_v17 = vshrl.u32 %v4032_v41, 16  ;;  %v1704_v26 = vrot.slane %v1702_v42, 1 }
  0xb2   : > { %1243 = vrot.lane.b32.xlu0 %v1102_v3, %s3387_s23  ;;  %v1330_v3 = vrot.slane %v2874_v35, 1  ;;  %v1925_v35 = vsel %vm1907_vm3, %v3468_v18, %v3955_v8  ;;  %v2785_v18 = vld [vmem:[%s3436_s19 + $0xa8] sm:$0xe]  ;;  %v4106_v8 = vld [vmem:[%s3436_s19 + $0x5c] ss:$0 sps:$4 sm:$0x11]  }
  0xb3   : > { %v4055_v15 = vpop.permute.xlu1 %1491  ;;  %v1356_v14 = vsel %vm802_vm0, %v1354_v55, %v1355_v4  ;;  %v1705_v49 = vor.u32 %v1704_v26, %v1700_v17  ;;  %v1604_v21 = vshrl.u32 %v4060_v48, 16  ;;  %v1608_v57 = vrot.slane %v1606_v47, 1 }
  0xb4   : > { %v4065_v53 = vpop.permute.xlu0 %1475  ;;  %v1958_v23 = vsel %vm1940_vm4, %v1925_v35, %v3891_v6  ;;  %v1712_v55 = vshrl.u32 %v4068_v44, 16  ;;  %v1716_v4 = vrot.slane %v1714_v62, 1  ;;  %v1616_v47 = vshrl.u32 %v4073_v56, 16 }
  0xb5   : > { %1261 = vrot.lane.b32.xlu1 %v1210_v25, %s3387_s23  ;;  %v1618_v25 = vshll.u32 %v4073_v56, 16  ;;  %v2929_v6 = vcombine.low %v2785_v18, %v4019_v43  ;;  %v1623_v20 = vshll.u32 %v4106_v8, 16  ;;  %v1710_v35 = vsel %vm529_vm1, %v1705_v49, %v1709_v1 }
  0xb6   : > { %1245 = vrot.lane.b32.xlu0 %v1114_v58, %s3387_s23  ;;  %v1332_v58 = vsel %vm802_vm0, %v1330_v3, %v1331_v12  ;;  %v1942_v3 = vsel %vm1940_vm4, %v1909_v11, %v3902_v22  ;;  %v1719_v12 = vshll.u32 %v4096_v2, 16  ;;  %v1991_v22 = vsel %vm1973_vm5, %v1958_v23, %v3861_v5  ;;  %v229_v11 = vld [vmem:[%s3436_s19 + $0xa8] sm:$0xf]  ;;  %v4140_v23 = vld [vmem:[%s3436_s19 + $0x4c] sm:$0xf] }
  0xb7   : > { %v4079_v7 = vpop.permute.xlu1 %1493  ;;  %v1620_v17 = vrot.slane %v1618_v25, 1  ;;  %v1609_v25 = vor.u32 %v1608_v57, %v1604_v21  ;;  %v2024_v43 = vsel %vm2006_vm6, %v1991_v22, %v3987_v45  ;;  %v213_v5 = vld [vmem:[%s3436_s19 + $0x48] sm:$0xf]  ;;  %v231_v22 = vld [vmem:[%s3436_s19 + $0xb4] sm:$0xf] }
  0xb8   : > { %v4084_v61 = vpop.permute.xlu0 %1477  ;;  %v2057_v57 = vsel %vm2039_vm7, %v2024_v43, %v4012_v30  ;;  %v1721_v21 = vrot.slane %v1719_v12, 1  ;;  %v1927_v30 = vsel %vm1907_vm3, %v3480_v31, %v3946_v16  ;;  %v1863_v31 = vrot.slane %v2929_v6, 1  ;;  %v4172_v16 = vld [vmem:[%s3436_s19 + $0xb0] ss:$0 sps:$4 sm:$0x11]  }
  0xb9   : > { %1387 = vrot.lane.b32.xlu1 %v1353_v9, %s3388_s24  ;;  %v2777_v9 = vld [vmem:[%s3436_s19 + $0x48] sm:$0xe]  ;;  %v1621_v49 = vor.u32 %v1620_v17, %v1616_v47  ;;  %v2090_v45 = vsel %vm2072_vm8, %v2057_v57, %v4055_v15  ;;  %v4164_v15 = vcombine.low %v213_v5, %v4140_v23  ;;  %v1960_v47 = vsel %vm1940_vm4, %v1927_v30, %v3910_v24 }
  0xba   : > { %1371 = vrot.lane.b32.xlu0 %v1329_v34, %s3388_s24  ;;  %v1611_v34 = vshll.u32 %v4088_v63, 16  ;;  %v2921_v26 = vcombine.low %v2777_v9, %v4038_v39  ;;  %v1975_v39 = vsel %vm1973_vm5, %v1942_v3, %v3875_v50  ;;  %v1717_v9 = vor.u32 %v1716_v4, %v1712_v55 }
  0xbb   : > { %v1764_v42 = vpop.permute.xlu1 %1763  ;;  %v2008_v1 = vsel %vm2006_vm6, %v1975_v39, %v3991_v46  ;;  %v1840_v17 = vrot.slane %v4088_v63, 1  ;;  %v706_v43 = vshll.u32 %v4172_v16, 16  ;;  %v215_v39 = vld [vmem:[%s3436_s19 + $0x54] sm:$0xf] }
  0xbc   : > { %v1748_v36 = vpop.permute.xlu0 %1747  ;;  %v1613_v18 = vrot.slane %v1611_v34, 1  ;;  %v2041_v50 = vsel %vm2039_vm7, %v2008_v1, %v4015_v19  ;;  %v1625_v34 = vrot.slane %v1623_v20, 1  ;;  %v2123_v19 = vsel %vm2105_vm9, %v2090_v45, %v1764_v42 }
  0xbd   : > { %1389 = vrot.lane.b32.xlu1 %v1356_v14, %s3388_s24  ;;  %v4130_v14 = vld [vmem:[%s3436_s19 + $0xac] sm:$0xf]  ;;  %v605_v20 = vshll.u32 %v4164_v15, 16 }
  0xbe   : > { %1373 = vrot.lane.b32.xlu0 %v1332_v58, %s3388_s24  ;;  %v4155_v46 = vcombine.low %v229_v11, %v4130_v14  ;;  %v1614_v42 = vsel %vm529_vm1, %v1609_v25, %v1613_v18  ;;  %v4201_v25 = vld [vmem:[%s3436_s19 + $0xb8] sm:$0xf] }
  0xbf   : > { %v4125_v62 = vpop.permute.xlu1 %1765  ;;  %v4213_v18 = vld [vmem:[%s3436_s19 + $0x58] sm:$0xf] }
  0xc0   : > { %v4136_v58 = vpop.permute.xlu0 %1749  ;;  %v701_v6 = vshll.u32 %v4155_v46, 16 }
  0xc1   : > { %1499 = vrot.lane.b32.xlu1 %v4032_v41, %s3389_s27  ;;  %v2074_v41 = vsel %vm2072_vm8, %v2041_v50, %v4065_v53  ;;  %v4230_v50 = vcombine.low %v231_v22, %v4201_v25 }
  0xc2   : > { %1483 = vrot.lane.b32.xlu0 %v4060_v48, %s3389_s27  ;;  %v1911_v48 = vsel %vm1907_vm3, %v3486_v38, %v3929_v52  ;;  %v2107_v4 = vsel %vm2105_vm9, %v2074_v41, %v1748_v36  ;;  %v1864_v38 = vrot.slane %v4063_v40, 1  ;;  %v1839_v52 = vrot.slane %v2921_v26, 1  ;;  %v4181_v36 = vld [vmem:[%s3436_s19 + $0x50] ss:$0 sps:$4 sm:$0x11]  }
  0xc3   : > { %v1892_v55 = vpop.permute.xlu1 %1891  ;;  %v1993_v40 = vsel %vm1973_vm5, %v1960_v47, %v3967_v29  ;;  %v1944_v26 = vsel %vm1940_vm4, %v1911_v48, %v3922_v59  ;;  %v699_v59 = vshrl.u32 %v4155_v46, 16  ;;  %v708_v48 = vrot.slane %v706_v43, 1  ;;  %v255_v43 = vld [vmem:[%s3436_s19 + $0x48] sm:$0xe] }
  0xc4   : > { %v1876_v3 = vpop.permute.xlu0 %1875  ;;  %v2156_v12 = vsel %vm2138_vm10, %v2123_v19, %v1892_v55  ;;  %v1977_v63 = vsel %vm1973_vm5, %v1944_v26, %v3971_v37  ;;  %v2026_v29 = vsel %vm2006_vm6, %v1993_v40, %v3999_v0  ;;  %v603_v37 = vshrl.u32 %v4164_v15, 16 }
  0xc5   : > { %1501 = vrot.lane.b32.xlu1 %v4068_v44, %s3389_s27  ;;  %v2140_v53 = vsel %vm2138_vm10, %v2107_v4, %v1876_v3  ;;  %3156 = vmatprep.mubr.msk.bf16.mxu1 %vm2198_vm11, %v2156_v12  ;;  %v1722_v44 = vsel %vm529_vm1, %v1717_v9, %v1721_v21  ;;  %v2010_v9 = vsel %vm2006_vm6, %v1977_v63, %v4005_v13  ;;  %v610_v0 = vshll.u32 %v4181_v36, 16  ;;  %v2786_v21 = vld [vmem:[%s3436_s19 + $0xb4] sm:$0xe]  ;;  %v4251_v4 = vld [vmem:[%s3436_s19 + $0xbc] ss:$0 sps:$4 sm:$0x11]  }
  0xc6   : > { %1485 = vrot.lane.b32.xlu0 %v4073_v56, %s3389_s27  ;;  %3140 = vmatprep.mubr.msk.bf16.mxu0 %vm2198_vm11, %v2140_v53  ;;  %v1626_v56 = vsel %vm529_vm1, %v1621_v49, %v1625_v34  ;;  %v2059_v5 = vsel %vm2039_vm7, %v2026_v29, %v4028_v60  ;;  %v2043_v1 = vsel %vm2039_vm7, %v2010_v9, %v4034_v33  ;;  %v2778_v49 = vld [vmem:[%s3436_s19 + $0x54] sm:$0xe]  ;;  %v703_v13 = vrot.slane %v701_v6, 1 }
  0xc7   : > { %v4195_v24 = vpop.permute.xlu1 %742  ;;  %v2092_v57 = vsel %vm2072_vm8, %v2059_v5, %v4079_v7  ;;  %v2076_v60 = vsel %vm2072_vm8, %v2043_v1, %v4084_v61  ;;  %v607_v33 = vrot.slane %v605_v20, 1  ;;  %v4237_v34 = vcombine.low %v215_v39, %v4213_v18 }
  0xc8   : > { %v4207_v11 = vpop.permute.xlu0 %726  ;;  %v2109_v7 = vsel %vm2105_vm9, %v2076_v60, %v4136_v58  ;;  %v2930_v19 = vcombine.low %v2786_v21, %v4045_v10  ;;  %v2922_v61 = vcombine.low %v2778_v49, %v4053_v27  ;;  %v704_v58 = vor.u32 %v703_v13, %v699_v59  ;;  %v264_v13 = vld [vmem:[%s3436_s19 + $0xb4] sm:$0xe] }
  0xc9   : > { %1771 = vrot.lane.b32.xlu1 %v1710_v35, %s3390_s30  ;;  %v2125_v35 = vsel %vm2105_vm9, %v2092_v57, %v4125_v62  ;;  %v1865_v62 = vsel %vm802_vm0, %v1863_v31, %v1864_v38  ;;  %v713_v10 = vshll.u32 %v4230_v50, 16  ;;  %v1841_v27 = vsel %vm802_vm0, %v1839_v52, %v1840_v17 }
  0xca   : > { %1755 = vrot.lane.b32.xlu0 %v1614_v42, %s3390_s30  ;;  %v608_v12 = vor.u32 %v607_v33, %v603_v37  ;;  %v612_v53 = vrot.slane %v610_v0, 1  ;;  %v4258_v42 = vld [vmem:[%s3436_s19 + $0x5c] ss:$0 sps:$4 sm:$0x11]   ;;  %v617_v47 = vshll.u32 %v4237_v34, 16  ;;  %v1866_v31 = vrot.slane %v2930_v19, 1 }
  0xcb   : > { %v1894_v45 = vpop.permute.xlu1 %1893  ;;  %v1867_v38 = vrot.slane %v4096_v2, 1  ;;  %v1842_v6 = vrot.slane %v2922_v61, 1  ;;  %v1843_v40 = vrot.slane %v4106_v8, 1  ;;  %v709_v52 = vsel %vm529_vm1, %v704_v58, %v708_v48  ;;  %v263_v8 = vld [vmem:[%s3436_s19 + $0xa8] sm:$0xe] }
  0xcc   : > { %v2158_v30 = vsel %vm2138_vm10, %v2125_v35, %v1894_v45  ;;  %v1878_v41 = vpop.permute.xlu0 %1877  ;;  %v711_v17 = vshrl.u32 %v4230_v50, 16  ;;  %v715_v26 = vrot.slane %v713_v10, 1  ;;  %v613_v22 = vsel %vm529_vm1, %v608_v12, %v612_v53  ;;  %v256_v35 = vld [vmem:[%s3436_s19 + $0x54] sm:$0xe] }
  0xcd   : > { %v2142_v55 = vsel %vm2138_vm10, %v2109_v7, %v1878_v41  ;;  %1773 = vrot.lane.b32.xlu1 %v1722_v44, %s3390_s30  ;;  %3157 = vmatmul.mubr.msk.bf16.vlgmr.msra.gmra.mrb[0].mxu1 %vm2198_vm11, %v2158_v30  ;;  %v615_v63 = vshrl.u32 %v4237_v34, 16  ;;  %v619_v29 = vrot.slane %v617_v47, 1  ;;  %v622_v2 = vshll.u32 %v4258_v42, 16  ;;  %v2673_v48 = vld [vmem:[%s3436_s19 + $0x54] sm:$0xf] }
  0xce   : > { %1757 = vrot.lane.b32.xlu0 %v1626_v56, %s3390_s30  ;;  %3141 = vmatmul.mubr.msk.bf16.vlgmr.msra.gmra.mrb[0].mxu0 %vm2198_vm11, %v2142_v55  ;;  %v718_v56 = vshll.u32 %v4251_v4, 16  ;;  %v1868_v39 = vsel %vm802_vm0, %v1866_v31, %v1867_v38  ;;  %v716_v9 = vor.u32 %v715_v26, %v711_v17  ;;  %v2835_v37 = vcombine.low %v263_v8, %v4130_v14  ;;  %v2689_v55 = vld [vmem:[%s3436_s19 + $0xb4] sm:$0xf]  ;;  %v2691_v38 = vld [vmem:[%s3436_s19 + $0xc0] sm:$0xf] }
  0xcf   : > { %v4254_v3 = vpop.permute.xlu1 %744  ;;  %v1844_v1 = vsel %vm802_vm0, %v1842_v6, %v1843_v40  ;;  %v620_v57 = vor.u32 %v619_v29, %v615_v63  ;;  %v624_v21 = vrot.slane %v622_v2, 1  ;;  %v2827_v49 = vcombine.low %v255_v43, %v4140_v23  ;;  %v4323_v6 = vld [vmem:[%s3436_s19 + $0xc4] sm:$0xf] }
  0xd0   : > { %v4261_v44 = vpop.permute.xlu0 %728  ;;  %v720_v5 = vrot.slane %v718_v56, 1  ;;  %v845_v45 = vrot.slane %v2835_v37, 1  ;;  %v846_v33 = vrot.slane %v4172_v16, 1  ;;  %v2836_v7 = vcombine.low %v264_v13, %v4201_v25  ;;  %v4309_v16 = vld [vmem:[%s3436_s19 + $0x58] sm:$0xf] }
  0xd1   : > { %1899 = vrot.lane.b32.xlu1 %v1865_v62, %s3391_s4  ;;  %v625_v23 = vsel %vm529_vm1, %v620_v57, %v624_v21  ;;  %v821_v41 = vrot.slane %v2827_v49, 1  ;;  %v822_v19 = vrot.slane %v4181_v36, 1  ;;  %v2828_v61 = vcombine.low %v256_v35, %v4213_v18  ;;  %v4303_v62 = vld [vmem:[%s3436_s19 + $0xb8] sm:$0xf]  ;;  %v4329_v17 = vld [vmem:[%s3436_s19 + $0x64] sm:$0xf] }
  0xd2   : > { %1883 = vrot.lane.b32.xlu0 %v1841_v27, %s3391_s4  ;;  %v721_v14 = vsel %vm529_vm1, %v716_v9, %v720_v5  ;;  %v847_v36 = vsel %vm802_vm0, %v845_v45, %v846_v33  ;;  %v848_v25 = vrot.slane %v2836_v7, 1  ;;  %v849_v18 = vrot.slane %v4251_v4, 1  ;;  %v4333_v4 = vld [vmem:[%s3436_s19 + $0xbc] ss:$0 sps:$4 sm:$0x11]  }
  0xd3   : > { %v4270_v20 = vpop.permute.xlu1 %871  ;;  %v2851_v10 = vcombine.low %v2689_v55, %v4303_v62  ;;  %v823_v12 = vsel %vm802_vm0, %v821_v41, %v822_v19  ;;  %v824_v53 = vrot.slane %v2828_v61, 1  ;;  %v825_v47 = vrot.slane %v4258_v42, 1  ;;  %v4357_v35 = vld [vmem:[%s3436_s19 + $0x68] ss:$0 sps:$4 sm:$0x11]  }
  0xd4   : > { %v4276_v59 = vpop.permute.xlu0 %855  ;;  %v2843_v31 = vcombine.low %v2673_v48, %v4309_v16  ;;  %v850_v26 = vsel %vm802_vm0, %v848_v25, %v849_v18  ;;  %v2852_v42 = vcombine.low %v2691_v38, %v4323_v6  ;;  %v1219_v9 = vshll.u32 %v4333_v4, 16 }
  0xd5   : > { %750 = vrot.lane.b32.xlu1 %v709_v52, %s3386_s22  ;;  %v2675_v52 = vld [vmem:[%s3436_s19 + $0x60] sm:$0xf]  ;;  %v1214_v56 = vshll.u32 %v2851_v10, 16  ;;  %v826_v29 = vsel %vm802_vm0, %v824_v53, %v825_v47  ;;  %v1135_v18 = vshll.u32 %v4357_v35, 16  ;;  %v2715_v53 = vld [vmem:[%s3436_s19 + $0x54] sm:$0xe] }
  0xd6   : > { %734 = vrot.lane.b32.xlu0 %v613_v22, %s3386_s22  ;;  %v4339_v22 = vld [vmem:[%s3436_s19 + $0x5c] ss:$0 sps:$4 sm:$0x11]   ;;  %v2844_v2 = vcombine.low %v2675_v52, %v4329_v17  ;;  %v1118_v8 = vshll.u32 %v2843_v31, 16  ;;  %v1226_v57 = vshll.u32 %v2852_v42, 16  ;;  %v1116_v49 = vshrl.u32 %v2843_v31, 16 }
  0xd7   : > { %v4283_v0 = vpop.permute.xlu1 %873  ;;  %v1216_v5 = vrot.slane %v1214_v56, 1  ;;  %v1123_v37 = vshll.u32 %v4339_v22, 16  ;;  %v1221_v33 = vrot.slane %v1219_v9, 1  ;;  %v1224_v7 = vshrl.u32 %v2852_v42, 16  ;;  %v2724_v9 = vld [vmem:[%s3436_s19 + $0xc0] sm:$0xe] }
  0xd8   : > { %v4288_v60 = vpop.permute.xlu0 %857  ;;  %v1120_v13 = vrot.slane %v1118_v8, 1  ;;  %v1228_v19 = vrot.slane %v1226_v57, 1  ;;  %v1137_v8 = vrot.slane %v1135_v18, 1 }
  0xd9   : > { %1901 = vrot.lane.b32.xlu1 %v1868_v39, %s3391_s4  ;;  %v1212_v39 = vshrl.u32 %v2851_v10, 16  ;;  %v1125_v41 = vrot.slane %v1123_v37, 1  ;;  %v4385_v37 = vld [vmem:[%s3436_s19 + $0xc4] sm:$0xf] }
  0xda   : > { %1885 = vrot.lane.b32.xlu0 %v1844_v1, %s3391_s4  ;;  %v4352_v1 = vld [vmem:[%s3436_s19 + $0xc8] ss:$0 sps:$4 sm:$0x11]   ;;  %v1121_v48 = vor.u32 %v1120_v13, %v1116_v49  ;;  %v2884_v13 = vcombine.low %v2724_v9, %v4323_v6 }
  0xdb   : > { %v4296_v30 = vpop.permute.xlu1 %983  ;;  %v1231_v61 = vshll.u32 %v4352_v1, 16  ;;  %v1361_v18 = vrot.slane %v4352_v1, 1 }
  0xdc   : > { %v4305_v58 = vpop.permute.xlu0 %967  ;;  %v1126_v56 = vsel %vm529_vm1, %v1121_v48, %v1125_v41  ;;  %v2755_v48 = vld [vmem:[%s3436_s19 + $0xcc] sm:$0xf] }
  0xdd   : > { %752 = vrot.lane.b32.xlu1 %v721_v14, %s3386_s22  ;;  %v1130_v14 = vshll.u32 %v2844_v2, 16  ;;  %v1233_v38 = vrot.slane %v1231_v61, 1 }
  0xde   : > { %736 = vrot.lane.b32.xlu0 %v625_v23, %s3386_s22  ;;  %v1217_v23 = vor.u32 %v1216_v5, %v1212_v39  ;;  %v2875_v39 = vcombine.low %v2715_v53, %v4309_v16  ;;  %v2753_v5 = vld [vmem:[%s3436_s19 + $0xc0] sm:$0xf]  ;;  %v1334_v16 = vrot.slane %v4339_v22, 1  ;;  %v4408_v22 = vld [vmem:[%s3436_s19 + $0xd0] sm:$0xf] }
  0xdf   : > { %v4316_v27 = vpop.permute.xlu1 %985  ;;  %v1132_v25 = vrot.slane %v1130_v14, 1  ;;  %v2737_v14 = vld [vmem:[%s3436_s19 + $0x60] sm:$0xf] }
  0xe0   : > { %v4325_v40 = vpop.permute.xlu0 %969  ;;  %v1222_v47 = vsel %vm529_vm1, %v1217_v23, %v1221_v33  ;;  %v4395_v33 = vld [vmem:[%s3436_s19 + $0x64] sm:$0xf]  ;;  %v1333_v41 = vrot.slane %v2875_v39, 1  ;;  %v4430_v39 = vld [vmem:[%s3436_s19 + $0x68] ss:$0 sps:$4 sm:$0x11]  }
  0xe1   : > { %879 = vrot.lane.b32.xlu1 %v847_v36, %s3385_s21  ;;  %v1128_v36 = vshrl.u32 %v2844_v2, 16  ;;  %v2891_v6 = vcombine.low %v2737_v14, %v4395_v33  ;;  %v1635_v14 = vshll.u32 %v4430_v39, 16 }
  0xe2   : > { %863 = vrot.lane.b32.xlu0 %v823_v12, %s3385_s21  ;;  %v2723_v12 = vld [vmem:[%s3436_s19 + $0xb4] sm:$0xe]  ;;  %v1335_v53 = vsel %vm802_vm0, %v1333_v41, %v1334_v16  ;;  %v1929_v41 = vsel %vm1907_vm3, %v3624_v51, %v4195_v24 }
  0xe3   : > { %v4341_v63 = vpop.permute.xlu1 %1255  ;;  %v2883_v52 = vcombine.low %v2723_v12, %v4303_v62  ;;  %v1358_v62 = vrot.slane %v4333_v4, 1  ;;  %v1630_v9 = vshll.u32 %v2891_v6, 16 }
  0xe4   : > { %v4345_v43 = vpop.permute.xlu0 %1239 }
  0xe5   : > { %881 = vrot.lane.b32.xlu1 %v850_v26, %s3385_s21  ;;  %v1357_v49 = vrot.slane %v2883_v52, 1 }
  0xe6   : > { %865 = vrot.lane.b32.xlu0 %v826_v29, %s3385_s21  ;;  %v1133_v29 = vor.u32 %v1132_v25, %v1128_v36  ;;  %v4411_v36 = vld [vmem:[%s3436_s19 + $0xc8] ss:$0 sps:$4 sm:$0x11]   ;;  %v1360_v25 = vrot.slane %v2884_v13, 1 }
  0xe7   : > { %v4354_v21 = vpop.permute.xlu1 %1257  ;;  %v1731_v1 = vshll.u32 %v4411_v36, 16 }
  0xe8   : > { %v4359_v45 = vpop.permute.xlu0 %1241  ;;  %v1138_v23 = vsel %vm529_vm1, %v1133_v29, %v1137_v8  ;;  %v4424_v29 = vcombine.low %v2755_v48, %v4408_v22  ;;  %v4427_v8 = vld [vmem:[%s3436_s19 + $0x70] sm:$0xf]  ;;  %v1628_v48 = vshrl.u32 %v2891_v6, 16 }
  0xe9   : > { %991 = vrot.lane.b32.xlu1 %v2851_v10, %s3384_s20 }
  0xea   : > { %975 = vrot.lane.b32.xlu0 %v2843_v31, %s3384_s20  ;;  %v1229_v31 = vor.u32 %v1228_v19, %v1224_v7  ;;  %v2899_v19 = vcombine.low %v2753_v5, %v4385_v37 }
  0xeb   : > { %v4364_v55 = vpop.permute.xlu1 %1383 }
  0xec   : > { %v4368_v10 = vpop.permute.xlu0 %1367  ;;  %v1234_v57 = vsel %vm529_vm1, %v1229_v31, %v1233_v38  ;;  %v1337_v31 = vrot.slane %v4357_v35, 1  ;;  %v2739_v38 = vld [vmem:[%s3436_s19 + $0x6c] sm:$0xf]  ;;  %v1726_v52 = vshll.u32 %v2899_v19, 16  ;;  %v1362_v35 = vsel %vm802_vm0, %v1360_v25, %v1361_v18 }
  0xed   : > { %993 = vrot.lane.b32.xlu1 %v2852_v42, %s3384_s20  ;;  %v1913_v25 = vsel %vm1907_vm3, %v3627_v54, %v4207_v11  ;;  %v1962_v18 = vsel %vm1940_vm4, %v1929_v41, %v4270_v20 }
  0xee   : > { %977 = vrot.lane.b32.xlu0 %v2844_v2, %s3384_s20  ;;  %v2716_v2 = vld [vmem:[%s3436_s19 + $0x60] sm:$0xe]  ;;  %v1728_v16 = vrot.slane %v1726_v52, 1  ;;  %v1946_v51 = vsel %vm1940_vm4, %v1913_v25, %v4276_v59  ;;  %v1995_v24 = vsel %vm1973_vm5, %v1962_v18, %v4296_v30 }
  0xef   : > { %v4375_v26 = vpop.permute.xlu1 %1385  ;;  %v2876_v4 = vcombine.low %v2716_v2, %v4329_v17  ;;  %v1359_v17 = vsel %vm802_vm0, %v1357_v49, %v1358_v62  ;;  %v4437_v2 = vld [vmem:[%s3436_s19 + $0xd4] ss:$0 sps:$4 sm:$0x11]   ;;  %v1724_v49 = vshrl.u32 %v2899_v19, 16  ;;  %v1979_v20 = vsel %vm1973_vm5, %v1946_v51, %v4305_v58  ;;  %v2787_v58 = vld [vmem:[%s3436_s19 + $0xc0] sm:$0xe] }
  0xf0   : > { %v4380_v42 = vpop.permute.xlu0 %1369  ;;  %v2028_v52 = vsel %vm2006_vm6, %v1995_v24, %v4341_v63  ;;  %v2012_v59 = vsel %vm2006_vm6, %v1979_v20, %v4345_v43  ;;  %v2780_v24 = vld [vmem:[%s3436_s19 + $0x6c] sm:$0xe] }
  0xf1   : > { %1263 = vrot.lane.b32.xlu1 %v1222_v47, %s3387_s23  ;;  %v1336_v47 = vrot.slane %v2876_v4, 1  ;;  %v1733_v4 = vrot.slane %v1731_v1, 1  ;;  %v1729_v54 = vor.u32 %v1728_v16, %v1724_v49  ;;  %v2061_v30 = vsel %vm2039_vm7, %v2028_v52, %v4364_v55 }
  0xf2   : > { %1247 = vrot.lane.b32.xlu0 %v1126_v56, %s3387_s23  ;;  %v2045_v63 = vsel %vm2039_vm7, %v2012_v59, %v4368_v10 }
  0xf3   : > { %v4397_v7 = vpop.permute.xlu1 %1495  ;;  %v1338_v62 = vsel %vm802_vm0, %v1336_v47, %v1337_v31  ;;  %v1743_v47 = vshll.u32 %v4437_v2, 16  ;;  %v4458_v31 = vld [vmem:[%s3436_s19 + $0x74] ss:$0 sps:$4 sm:$0x11]   ;;  %v1734_v41 = vsel %vm529_vm1, %v1729_v54, %v1733_v4  ;;  %v1915_v4 = vsel %vm1907_vm3, %v3670_v32, %v4261_v44 }
  0xf4   : > { %v4402_v61 = vpop.permute.xlu0 %1479  ;;  %v2094_v16 = vsel %vm2072_vm8, %v2061_v30, %v4397_v7  ;;  %v1647_v43 = vshll.u32 %v4458_v31, 16 }
  0xf5   : > { %1265 = vrot.lane.b32.xlu1 %v1234_v57, %s3387_s23  ;;  %v4441_v57 = vcombine.low %v2739_v38, %v4427_v8  ;;  %v2078_v55 = vsel %vm2072_vm8, %v2045_v63, %v4402_v61  ;;  %v1931_v61 = vsel %vm1907_vm3, %v3665_v28, %v4254_v3  ;;  %v1948_v3 = vsel %vm1940_vm4, %v1915_v4, %v4288_v60 }
  0xf6   : > { %1249 = vrot.lane.b32.xlu0 %v1138_v23, %s3387_s23  ;;  %v1738_v23 = vshll.u32 %v4424_v29, 16  ;;  %v1649_v44 = vrot.slane %v1647_v43, 1  ;;  %v1870_v60 = vrot.slane %v4411_v36, 1 }
  0xf7   : > { %v4416_v12 = vpop.permute.xlu1 %1497  ;;  %v1642_v11 = vshll.u32 %v4441_v57, 16  ;;  %v1640_v49 = vshrl.u32 %v4441_v57, 16 }
  0xf8   : > { %v4421_v56 = vpop.permute.xlu0 %1481 }
  0xf9   : > { %1391 = vrot.lane.b32.xlu1 %v1359_v17, %s3388_s24  ;;  %v1632_v17 = vrot.slane %v1630_v9, 1  ;;  %v1637_v9 = vrot.slane %v1635_v14, 1  ;;  %v1745_v14 = vrot.slane %v1743_v47, 1  ;;  %v2788_v47 = vld [vmem:[%s3436_s19 + $0xcc] sm:$0xe] }
  0xfa   : > { %1375 = vrot.lane.b32.xlu0 %v1335_v53, %s3388_s24  ;;  %v1736_v53 = vshrl.u32 %v4424_v29, 16  ;;  %v2932_v52 = vcombine.low %v2788_v47, %v4408_v22 }
  0xfb   : > { %v1768_v5 = vpop.permute.xlu1 %1767 }
  0xfc   : > { %v1752_v13 = vpop.permute.xlu0 %1751 }
  0xfd   : > { %1393 = vrot.lane.b32.xlu1 %v1362_v35, %s3388_s24  ;;  %v1740_v35 = vrot.slane %v1738_v23, 1  ;;  %v2111_v10 = vsel %vm2105_vm9, %v2078_v55, %v1752_v13 }
  0xfe   : > { %1377 = vrot.lane.b32.xlu0 %v1338_v62, %s3388_s24  ;;  %v1633_v62 = vor.u32 %v1632_v17, %v1628_v48  ;;  %v1644_v48 = vrot.slane %v1642_v11, 1  ;;  %v2779_v17 = vld [vmem:[%s3436_s19 + $0x60] sm:$0xe] }
  0xff   : > { %v4464_v38 = vpop.permute.xlu1 %1769  ;;  %v1741_v18 = vor.u32 %v1740_v35, %v1736_v53  ;;  %v2923_v28 = vcombine.low %v2779_v17, %v4395_v33  ;;  %v2924_v35 = vcombine.low %v2780_v24, %v4427_v8  ;;  %v1873_v8 = vrot.slane %v4437_v2, 1 }
 0x100   : > { %v4471_v1 = vpop.permute.xlu0 %1753  ;;  %v1638_v13 = vsel %vm529_vm1, %v1633_v62, %v1637_v9  ;;  %v1645_v32 = vor.u32 %v1644_v48, %v1640_v49  ;;  %v1849_v49 = vrot.slane %v4458_v31, 1 }
 0x101   : > { %1503 = vrot.lane.b32.xlu1 %v2899_v19, %s3389_s27  ;;  %v2127_v19 = vsel %vm2105_vm9, %v2094_v16, %v1768_v5  ;;  %v1746_v33 = vsel %vm529_vm1, %v1741_v18, %v1745_v14  ;;  %v1845_v36 = vrot.slane %v2923_v28, 1  ;;  %v1848_v62 = vrot.slane %v2924_v35, 1 }
 0x102   : > { %1487 = vrot.lane.b32.xlu0 %v2891_v6, %s3389_s27  ;;  %v2931_v6 = vcombine.low %v2787_v58, %v4385_v37  ;;  %v1964_v37 = vsel %vm1940_vm4, %v1931_v61, %v4283_v0  ;;  %v1981_v0 = vsel %vm1973_vm5, %v1948_v3, %v4325_v40  ;;  %v1846_v40 = vrot.slane %v4430_v39, 1 }
 0x103   : > { %v1896_v23 = vpop.permute.xlu1 %1895  ;;  %v1650_v39 = vsel %vm529_vm1, %v1645_v32, %v1649_v44  ;;  %v1850_v14 = vsel %vm802_vm0, %v1848_v62, %v1849_v49  ;;  %v4726_v44 = vld [vmem:[#allocation3_spill] sm:$0xff] }
 0x104   : > { %v2160_v25 = vsel %vm2138_vm10, %v2127_v19, %v1896_v23  ;;  %v1880_v7 = vpop.permute.xlu0 %1879  ;;  %v1869_v11 = vrot.slane %v2931_v6, 1 }
 0x105   : > { %v2144_v5 = vsel %vm2138_vm10, %v2111_v10, %v1880_v7  ;;  %1505 = vrot.lane.b32.xlu1 %v4424_v29, %s3389_s27  ;;  %3160 = vmatprep.mubr.msk.bf16.mxu1 %vm2198_vm11, %v2160_v25  ;;  %v1997_v29 = vsel %vm1973_vm5, %v1964_v37, %v4316_v27  ;;  %v2014_v27 = vsel %vm2006_vm6, %v1981_v0, %v4359_v45 }
 0x106   : > { %1489 = vrot.lane.b32.xlu0 %v4441_v57, %s3389_s27  ;;  %3144 = vmatprep.mubr.msk.bf16.mxu0 %vm2198_vm11, %v2144_v5  ;;  %v2030_v57 = vsel %vm2006_vm6, %v1997_v29, %v4354_v21  ;;  %v2047_v21 = vsel %vm2039_vm7, %v2014_v27, %v4380_v42  ;;  %v1871_v22 = vsel %vm802_vm0, %v1869_v11, %v1870_v60  ;;  %v4725_v29 = vld [vmem:[#allocation2_spill] sm:$0xff] }
 0x107   : > { %v4515_v53 = vpop.permute.xlu1 %746  ;;  %v2063_v54 = vsel %vm2039_vm7, %v2030_v57, %v4375_v26  ;;  %v2080_v45 = vsel %vm2072_vm8, %v2047_v21, %v4421_v56  ;;  %v1872_v56 = vrot.slane %v2932_v52, 1 }
 0x108   : > { %v4522_v51 = vpop.permute.xlu0 %730  ;;  %v2096_v20 = vsel %vm2072_vm8, %v2063_v54, %v4416_v12  ;;  %v2113_v42 = vsel %vm2105_vm9, %v2080_v45, %v4471_v1  ;;  %v1847_v1 = vsel %vm802_vm0, %v1845_v36, %v1846_v40  ;;  %v1933_v32 = vsel %vm1907_vm3, %v4725_v29, %v4515_v53 }
 0x109   : > { %1775 = vrot.lane.b32.xlu1 %v1734_v41, %s3390_s30  ;;  %v2129_v26 = vsel %vm2105_vm9, %v2096_v20, %v4464_v38  ;;  %v1874_v63 = vsel %vm802_vm0, %v1872_v56, %v1873_v8  ;;  %v1917_v47 = vsel %vm1907_vm3, %v4726_v44, %v4522_v51 }
 0x10a   : > { %1759 = vrot.lane.b32.xlu0 %v1638_v13, %s3390_s30 }
 0x10b   : > { %v1898_v9 = vpop.permute.xlu1 %1897 }
 0x10c   : > { %v2162_v12 = vsel %vm2138_vm10, %v2129_v26, %v1898_v9  ;;  %v1882_v59 = vpop.permute.xlu0 %1881  ;;  %v4727_v9 = vld [vmem:[#allocation4_spill] sm:$0xff] }
 0x10d   : > { %v2146_v30 = vsel %vm2138_vm10, %v2113_v42, %v1882_v59  ;;  %1777 = vrot.lane.b32.xlu1 %v1746_v33, %s3390_s30  ;;  %3161 = vmatmul.mubr.msk.bf16.gmra.mrb[4].mxu1 %vm2198_vm11, %v2162_v12  ;;  %v4728_v42 = vld [vmem:[#allocation5_spill] sm:$0xff] }
 0x10e   : > { %1761 = vrot.lane.b32.xlu0 %v1650_v39, %s3390_s30  ;;  %3145 = vmatmul.mubr.msk.bf16.gmra.mrb[4].mxu0 %vm2198_vm11, %v2146_v30 }
 0x10f   : > { %v749_v38 = vpop.permute.xlu1 %748 }
 0x110   : > { %v733_v58 = vpop.permute.xlu0 %732  ;;  %v1935_v39 = vsel %vm1907_vm3, %v4727_v9, %v749_v38 }
 0x111   : > { %1903 = vrot.lane.b32.xlu1 %v1871_v22, %s3391_s4  ;;  %v1919_v12 = vsel %vm1907_vm3, %v4728_v42, %v733_v58 }
 0x112   : > { %1887 = vrot.lane.b32.xlu0 %v1847_v1, %s3391_s4 }
 0x113   : > { %v876_v16 = vpop.permute.xlu1 %875 }
 0x114   : > { %v860_v43 = vpop.permute.xlu0 %859  ;;  %v1966_v0 = vsel %vm1940_vm4, %v1933_v32, %v876_v16 }
 0x115   : > { %1905 = vrot.lane.b32.xlu1 %v1874_v63, %s3391_s4  ;;  %v1950_v57 = vsel %vm1940_vm4, %v1917_v47, %v860_v43 }
 0x116   : > { %1889 = vrot.lane.b32.xlu0 %v1850_v14, %s3391_s4 }
 0x117   : > { %v878_v2 = vpop.permute.xlu1 %877 }
 0x118   : > { %v862_v55 = vpop.permute.xlu0 %861  ;;  %v1968_v59 = vsel %vm1940_vm4, %v1935_v39, %v878_v2 }
 0x119   : > { %v1952_v30 = vsel %vm1940_vm4, %v1919_v12, %v862_v55 }
 0x11b   : > { %v988_v19 = vpop.permute.xlu1 %987 }
 0x11c   : > { %v972_v23 = vpop.permute.xlu0 %971  ;;  %v1999_v33 = vsel %vm1973_vm5, %v1966_v0, %v988_v19 }
 0x11d   : > { %v1983_v24 = vsel %vm1973_vm5, %v1950_v57, %v972_v23 }
 0x11f   : > { %v990_v31 = vpop.permute.xlu1 %989 }
 0x120   : > { %v974_v41 = vpop.permute.xlu0 %973  ;;  %v2001_v22 = vsel %vm1973_vm5, %v1968_v59, %v990_v31 }
 0x121   : > { %v1985_v8 = vsel %vm1973_vm5, %v1952_v30, %v974_v41 }
 0x123   : > { %v1260_v48 = vpop.permute.xlu1 %1259 }
 0x124   : > { %v1244_v17 = vpop.permute.xlu0 %1243  ;;  %v2032_v27 = vsel %vm2006_vm6, %v1999_v33, %v1260_v48 }
 0x125   : > { %v2016_v11 = vsel %vm2006_vm6, %v1983_v24, %v1244_v17 }
 0x127   : > { %v1262_v10 = vpop.permute.xlu1 %1261 }
 0x128   : > { %v1246_v25 = vpop.permute.xlu0 %1245  ;;  %v2034_v38 = vsel %vm2006_vm6, %v2001_v22, %v1262_v10 }
 0x129   : > { %v2018_v62 = vsel %vm2006_vm6, %v1985_v8, %v1246_v25 }
 0x12b   : > { %v1388_v7 = vpop.permute.xlu1 %1387 }
 0x12c   : > { %v1372_v18 = vpop.permute.xlu0 %1371  ;;  %v2065_v53 = vsel %vm2039_vm7, %v2032_v27, %v1388_v7 }
 0x12d   : > { %v2049_v40 = vsel %vm2039_vm7, %v2016_v11, %v1372_v18 }
 0x12f   : > { %v1390_v6 = vpop.permute.xlu1 %1389 }
 0x130   : > { %v1374_v61 = vpop.permute.xlu0 %1373  ;;  %v2067_v49 = vsel %vm2039_vm7, %v2034_v38, %v1390_v6 }
 0x131   : > { %v2051_v58 = vsel %vm2039_vm7, %v2018_v62, %v1374_v61 }
 0x133   : > { %v1500_v5 = vpop.permute.xlu1 %1499 }
 0x134   : > { %v1484_v13 = vpop.permute.xlu0 %1483  ;;  %v2098_v51 = vsel %vm2072_vm8, %v2065_v53, %v1500_v5 }
 0x135   : > { %v2082_v21 = vsel %vm2072_vm8, %v2049_v40, %v1484_v13 }
 0x137   : > { %v1502_v4 = vpop.permute.xlu1 %1501 }
 0x138   : > { %v1486_v37 = vpop.permute.xlu0 %1485  ;;  %v2100_v63 = vsel %vm2072_vm8, %v2067_v49, %v1502_v4 }
 0x139   : > { %v2084_v16 = vsel %vm2072_vm8, %v2051_v58, %v1486_v37 }
 0x13b   : > { %v1772_v28 = vpop.permute.xlu1 %1771 }
 0x13c   : > { %v1756_v3 = vpop.permute.xlu0 %1755  ;;  %v2131_v20 = vsel %vm2105_vm9, %v2098_v51, %v1772_v28 }
 0x13d   : > { %v2115_v52 = vsel %vm2105_vm9, %v2082_v21, %v1756_v3 }
 0x13f   : > { %v1774_v60 = vpop.permute.xlu1 %1773 }
 0x140   : > { %v1758_v54 = vpop.permute.xlu0 %1757  ;;  %v2133_v14 = vsel %vm2105_vm9, %v2100_v63, %v1774_v60 }
 0x141   : > { %v2117_v2 = vsel %vm2105_vm9, %v2084_v16, %v1758_v54 }
 0x143   : > { %v1900_v36 = vpop.permute.xlu1 %1899 }
 0x144   : > { %v2164_v45 = vsel %vm2138_vm10, %v2131_v20, %v1900_v36  ;;  %v1884_v26 = vpop.permute.xlu0 %1883 }
 0x145   : > { %v2148_v35 = vsel %vm2138_vm10, %v2115_v52, %v1884_v26  ;;  %3164 = vmatprep.mubr.msk.bf16.mxu1 %vm2198_vm11, %v2164_v45 }
 0x146   : > { %3148 = vmatprep.mubr.msk.bf16.mxu0 %vm2198_vm11, %v2148_v35 }
 0x147   : > { %v751_v56 = vpop.permute.xlu1 %750 }
 0x148   : > { %v735_v1 = vpop.permute.xlu0 %734  ;;  %v1937_v24 = vsel %vm1907_vm3, %v4155_v46, %v751_v56 }
 0x149   : > { %v1921_v27 = vsel %vm1907_vm3, %v4164_v15, %v735_v1 }
 0x14b   : > { %v1902_v43 = vpop.permute.xlu1 %1901 }
 0x14c   : > { %v2166_v55 = vsel %vm2138_vm10, %v2133_v14, %v1902_v43  ;;  %v1886_v19 = vpop.permute.xlu0 %1885 }
 0x14d   : > { %v2150_v23 = vsel %vm2138_vm10, %v2117_v2, %v1886_v19  ;;  %3165 = vmatmul.mubr.msk.bf16.gmra.mrb[8].mxu1 %vm2198_vm11, %v2166_v55  ;;  %v4648_v19 = vld [vmem:[%s4715_s2] ss:$0 sm:$0xff] }
 0x14e   : > { %3149 = vmatmul.mubr.msk.bf16.gmra.mrb[8].mxu0 %vm2198_vm11, %v2150_v23 }
 0x14f   : > { %v753_v31 = vpop.permute.xlu1 %752 }
 0x150   : > { %v737_v41 = vpop.permute.xlu0 %736  ;;  %v1939_v36 = vsel %vm1907_vm3, %v4230_v50, %v753_v31 }
 0x151   : > { %v1923_v15 = vsel %vm1907_vm3, %v4237_v34, %v737_v41 }
 0x153   : > { %v880_v48 = vpop.permute.xlu1 %879 }
 0x154   : > { %v864_v17 = vpop.permute.xlu0 %863  ;;  %v1970_v54 = vsel %vm1940_vm4, %v1937_v24, %v880_v48 }
 0x155   : > { %v1954_v11 = vsel %vm1940_vm4, %v1921_v27, %v864_v17 }
 0x157   : > { %v882_v10 = vpop.permute.xlu1 %881 }
 0x158   : > { %v866_v25 = vpop.permute.xlu0 %865  ;;  %v1972_v45 = vsel %vm1940_vm4, %v1939_v36, %v882_v10 }
 0x159   : > { %v1956_v39 = vsel %vm1940_vm4, %v1923_v15, %v866_v25 }
 0x15b   : > { %v992_v7 = vpop.permute.xlu1 %991 }
 0x15c   : > { %v976_v18 = vpop.permute.xlu0 %975  ;;  %v2003_v53 = vsel %vm1973_vm5, %v1970_v54, %v992_v7 }
 0x15d   : > { %v1987_v51 = vsel %vm1973_vm5, %v1954_v11, %v976_v18 }
 0x15f   : > { %v994_v6 = vpop.permute.xlu1 %993 }
 0x160   : > { %v978_v61 = vpop.permute.xlu0 %977  ;;  %v2005_v35 = vsel %vm1973_vm5, %v1972_v45, %v994_v6 }
 0x161   : > { %v1989_v59 = vsel %vm1973_vm5, %v1956_v39, %v978_v61 }
 0x163   : > { %v1264_v5 = vpop.permute.xlu1 %1263 }
 0x164   : > { %v1248_v13 = vpop.permute.xlu0 %1247  ;;  %v2036_v21 = vsel %vm2006_vm6, %v2003_v53, %v1264_v5 }
 0x165   : > { %v2020_v46 = vsel %vm2006_vm6, %v1987_v51, %v1248_v13 }
 0x167   : > { %v1266_v4 = vpop.permute.xlu1 %1265 }
 0x168   : > { %v1250_v37 = vpop.permute.xlu0 %1249  ;;  %v2038_v30 = vsel %vm2006_vm6, %v2005_v35, %v1266_v4 }
 0x169   : > { %v2022_v8 = vsel %vm2006_vm6, %v1989_v59, %v1250_v37 }
 0x16b   : > { %v1392_v28 = vpop.permute.xlu1 %1391 }
 0x16c   : > { %v1376_v3 = vpop.permute.xlu0 %1375  ;;  %v2069_v52 = vsel %vm2039_vm7, %v2036_v21, %v1392_v28 }
 0x16d   : > { %v2053_v26 = vsel %vm2039_vm7, %v2020_v46, %v1376_v3 }
 0x16f   : > { %v1394_v29 = vpop.permute.xlu1 %1393 }
 0x170   : > { %v1378_v32 = vpop.permute.xlu0 %1377  ;;  %v2071_v38 = vsel %vm2039_vm7, %v2038_v30, %v1394_v29 }
 0x171   : > { %v2055_v62 = vsel %vm2039_vm7, %v2022_v8, %v1378_v32 }
 0x173   : > { %v1504_v44 = vpop.permute.xlu1 %1503 }
 0x174   : > { %v1488_v47 = vpop.permute.xlu0 %1487  ;;  %v2102_v9 = vsel %vm2072_vm8, %v2069_v52, %v1504_v44 }
 0x175   : > { %v2086_v42 = vsel %vm2072_vm8, %v2053_v26, %v1488_v47 }
 0x177   : > { %v1506_v0 = vpop.permute.xlu1 %1505 }
 0x178   : > { %v1490_v57 = vpop.permute.xlu0 %1489  ;;  %v2104_v49 = vsel %vm2072_vm8, %v2071_v38, %v1506_v0 }
 0x179   : > { %v2088_v58 = vsel %vm2072_vm8, %v2055_v62, %v1490_v57 }
 0x17b   : > { %v1776_v33 = vpop.permute.xlu1 %1775 }
 0x17c   : > { %v1760_v60 = vpop.permute.xlu0 %1759  ;;  %v2135_v50 = vsel %vm2105_vm9, %v2102_v9, %v1776_v33 }
 0x17d   : > { %v2119_v34 = vsel %vm2105_vm9, %v2086_v42, %v1760_v60 }
 0x17f   : > { %v1778_v40 = vpop.permute.xlu1 %1777 }
 0x180   : > { %v1762_v20 = vpop.permute.xlu0 %1761  ;;  %v2137_v63 = vsel %vm2105_vm9, %v2104_v49, %v1778_v40 }
 0x181   : > { %v2121_v14 = vsel %vm2105_vm9, %v2088_v58, %v1762_v20 }
 0x183   : > { %v1904_v12 = vpop.permute.xlu1 %1903 }
 0x184   : > { %v2168_v22 = vsel %vm2138_vm10, %v2135_v50, %v1904_v12  ;;  %v1888_v56 = vpop.permute.xlu0 %1887 }
 0x185   : > { %v2152_v1 = vsel %vm2138_vm10, %v2119_v34, %v1888_v56  ;;  %3168 = vmatprep.mubr.msk.bf16.mxu1 %vm2198_vm11, %v2168_v22 }
 0x186   : > { %3152 = vmatprep.mubr.msk.bf16.mxu0 %vm2198_vm11, %v2152_v1 }
 0x187   : > { %v1906_v16 = vpop.permute.xlu1 %1905 }
 0x188   : > { %v2170_v43 = vsel %vm2138_vm10, %v2137_v63, %v1906_v16  ;;  %v1890_v2 = vpop.permute.xlu0 %1889 }
 0x189   : > { %v2154_v55 = vsel %vm2138_vm10, %v2121_v14, %v1890_v2  ;;  %3169 = vmatmul.mubr.msk.bf16.gmra.mrb[12].mxu1 %vm2198_vm11, %v2170_v43 }
 0x18a   : > { %3153 = vmatmul.mubr.msk.bf16.gmra.mrb[12].mxu0 %vm2198_vm11, %v2154_v55 }
 0x1a0   : > { %v3158_v23 = vpop.f32.mrb[0].mxu1 }
 0x1a1   : > { %v3142_v31 = vpop.f32.mrb[0].mxu0  ;;  %v2333_v41 = vpop.f32.mrb[1].mxu1  ;;  %v2342_v10 = vadd.f32 %v3158_v23, %v4648_v19 }
 0x1a2   : > { %v2269_v48 = vpop.f32.mrb[1].mxu0  ;;  %v3159_v17 = vpop.f32.mrb[2].mxu1  ;;  %v2278_v6 = vadd.f32 %v3142_v31, %v4648_v19  ;;  %v2334_v61 = vadd.f32 %v4648_v19, %v2333_v41 }
 0x1a3   : > { %v3143_v25 = vpop.f32.mrb[2].mxu0  ;;  %v2345_v7 = vadd.f32 %v3159_v17, %v4648_v19  ;;  %v2336_v18 = vpop.f32.mrb[3].mxu1  ;;  %v2270_v37 = vadd.f32 %v4648_v19, %v2269_v48 }
 0x1a4   : > { %v2281_v5 = vadd.f32 %v3143_v25, %v4648_v19  ;;  %v2272_v13 = vpop.f32.mrb[3].mxu0  ;;  %v2337_v4 = vadd.f32 %v4648_v19, %v2336_v18 }
 0x1a5   : > { %v3068_v28 = vpack.c.bf16 %v2345_v7, %v2342_v10  ;;  %v2273_v3 = vadd.f32 %v4648_v19, %v2272_v13 }
 0x1a6   : > { %v3028_v29 = vpack.c.bf16 %v2281_v5, %v2278_v6  ;;  %v3063_v32 = vpack.c.bf16 %v2337_v4, %v2334_v61 }
 0x1a7   : > { %3108 = vst [vmem:[%s4658_s16 + $0x48] sm:$0xff] %v3068_v28   ;;  %v3023_v44 = vpack.c.bf16 %v2273_v3, %v2270_v37 }
 0x1a8   : > { %3100 = vst [vmem:[%s4658_s16 + $0x8] sm:$0xff] %v3028_v29   ;;  %3107 = vst [vmem:[%s4658_s16 + $0x40] sm:$0xff] %v3063_v32  }
 0x1a9   : > { %3024 = vst [vmem:[%s4658_s16] sm:$0xff] %v3023_v44  }
 0x1e0   : > { %v3162_v47 = vpop.f32.mrb[4].mxu1 }
 0x1e1   : > { %v3146_v0 = vpop.f32.mrb[4].mxu0  ;;  %v2349_v57 = vpop.f32.mrb[5].mxu1  ;;  %v2358_v24 = vadd.f32 %v3162_v47, %v4648_v19 }
 0x1e2   : > { %v2285_v33 = vpop.f32.mrb[5].mxu0  ;;  %v3163_v60 = vpop.f32.mrb[6].mxu1  ;;  %v2294_v53 = vadd.f32 %v3146_v0, %v4648_v19  ;;  %v2350_v40 = vadd.f32 %v4648_v19, %v2349_v57 }
 0x1e3   : > { %v3147_v27 = vpop.f32.mrb[6].mxu0  ;;  %v2361_v54 = vadd.f32 %v3163_v60, %v4648_v19  ;;  %v2352_v11 = vpop.f32.mrb[7].mxu1  ;;  %v2286_v36 = vadd.f32 %v4648_v19, %v2285_v33 }
 0x1e4   : > { %v2297_v51 = vadd.f32 %v3147_v27, %v4648_v19  ;;  %v2288_v21 = vpop.f32.mrb[7].mxu0  ;;  %v2353_v20 = vadd.f32 %v4648_v19, %v2352_v11 }
 0x1e5   : > { %v3078_v46 = vpack.c.bf16 %v2361_v54, %v2358_v24  ;;  %v2289_v52 = vadd.f32 %v4648_v19, %v2288_v21 }
 0x1e6   : > { %v3038_v15 = vpack.c.bf16 %v2297_v51, %v2294_v53  ;;  %v3073_v45 = vpack.c.bf16 %v2353_v20, %v2350_v40 }
 0x1e7   : > { %3110 = vst [vmem:[%s4658_s16 + $0x58] sm:$0xff] %v3078_v46   ;;  %v3033_v26 = vpack.c.bf16 %v2289_v52, %v2286_v36 }
 0x1e8   : > { %3102 = vst [vmem:[%s4658_s16 + $0x18] sm:$0xff] %v3038_v15   ;;  %3109 = vst [vmem:[%s4658_s16 + $0x50] sm:$0xff] %v3073_v45  }
 0x1e9   : > { %3101 = vst [vmem:[%s4658_s16 + $0x10] sm:$0xff] %v3033_v26  }
 0x220   : > { %v3166_v9 = vpop.f32.mrb[8].mxu1 }
 0x221   : > { %v3150_v39 = vpop.f32.mrb[8].mxu0  ;;  %v2365_v35 = vpop.f32.mrb[9].mxu1  ;;  %v2374_v12 = vadd.f32 %v3166_v9, %v4648_v19 }
 0x222   : > { %v2301_v42 = vpop.f32.mrb[9].mxu0  ;;  %v3167_v50 = vpop.f32.mrb[10].mxu1  ;;  %v2310_v22 = vadd.f32 %v3150_v39, %v4648_v19  ;;  %v2366_v56 = vadd.f32 %v4648_v19, %v2365_v35 }
 0x223   : > { %v3151_v59 = vpop.f32.mrb[10].mxu0  ;;  %v2377_v30 = vadd.f32 %v3167_v50, %v4648_v19  ;;  %v2368_v34 = vpop.f32.mrb[11].mxu1  ;;  %v2302_v62 = vadd.f32 %v4648_v19, %v2301_v42 }
 0x224   : > { %v2313_v8 = vadd.f32 %v3151_v59, %v4648_v19  ;;  %v2304_v38 = vpop.f32.mrb[11].mxu0  ;;  %v2369_v1 = vadd.f32 %v4648_v19, %v2368_v34 }
 0x225   : > { %v3088_v49 = vpack.c.bf16 %v2377_v30, %v2374_v12  ;;  %v2305_v58 = vadd.f32 %v4648_v19, %v2304_v38 }
 0x226   : > { %v3048_v63 = vpack.c.bf16 %v2313_v8, %v2310_v22  ;;  %v3083_v16 = vpack.c.bf16 %v2369_v1, %v2366_v56 }
 0x227   : > { %3112 = vst [vmem:[%s4658_s16 + $0x68] sm:$0xff] %v3088_v49   ;;  %v3043_v14 = vpack.c.bf16 %v2305_v58, %v2302_v62 }
 0x228   : > { %3104 = vst [vmem:[%s4658_s16 + $0x28] sm:$0xff] %v3048_v63   ;;  %3111 = vst [vmem:[%s4658_s16 + $0x60] sm:$0xff] %v3083_v16  }
 0x229   : > { %3103 = vst [vmem:[%s4658_s16 + $0x20] sm:$0xff] %v3043_v14  }
 0x25c   : > { %v3170_v43 = vpop.f32.mrb[12].mxu1 }
 0x25d   : > { %v3154_v2 = vpop.f32.mrb[12].mxu0  ;;  %v2381_v55 = vpop.f32.mrb[13].mxu1  ;;  %v2390_v41 = vadd.f32 %v3170_v43, %v4648_v19 }
 0x25e   : > { %v2317_v23 = vpop.f32.mrb[13].mxu0  ;;  %v3171_v31 = vpop.f32.mrb[14].mxu1  ;;  %v2326_v25 = vadd.f32 %v3154_v2, %v4648_v19  ;;  %v2382_v7 = vadd.f32 %v4648_v19, %v2381_v55 }
 0x25f   : > { %v3155_v48 = vpop.f32.mrb[14].mxu0  ;;  %v2393_v17 = vadd.f32 %v3171_v31, %v4648_v19  ;;  %v2384_v10 = vpop.f32.mrb[15].mxu1  ;;  %v2318_v5 = vadd.f32 %v4648_v19, %v2317_v23 }
 0x260   : > { %v2329_v18 = vadd.f32 %v3155_v48, %v4648_v19  ;;  %v2320_v6 = vpop.f32.mrb[15].mxu0  ;;  %v2385_v61 = vadd.f32 %v4648_v19, %v2384_v10 }
 0x261   : > { %v3098_v13 = vpack.c.bf16 %v2393_v17, %v2390_v41  ;;  %v2321_v4 = vadd.f32 %v4648_v19, %v2320_v6 }
 0x262   : > { %v3058_v37 = vpack.c.bf16 %v2329_v18, %v2326_v25  ;;  %v3093_v28 = vpack.c.bf16 %v2385_v61, %v2382_v7 }
 0x263   : > { %3114 = vst [vmem:[%s4658_s16 + $0x78] sm:$0xff] %v3098_v13   ;;  %v3053_v3 = vpack.c.bf16 %v2321_v4, %v2318_v5 }
 0x264   : > { %3106 = vst [vmem:[%s4658_s16 + $0x38] sm:$0xff] %v3058_v37   ;;  %3113 = vst [vmem:[%s4658_s16 + $0x70] sm:$0xff] %v3093_v28  }
 0x265   : > { %3105 = vst [vmem:[%s4658_s16 + $0x30] sm:$0xff] %v3053_v3  }
 0x266 PF: > { %s13_s14 = sadd.s32 1, %s3382_s14   ;;  %s4729_s12 = smov %s3378_s13 }
 0x267   : > { %p10_p5 = scmp.ge.s32.totalorder %s13_s14, 4   ;;  %s4730_s13 = smov %s4732_s15 }
 0x269   :  { %12 = sbr.rel (!%p10_p5) target bundleno = 2 (0x2), region = 65 }

</bundles_post_ra>
